<compile_context>
chip_gen: v7x
topology: tpu7x:2x2x1
jax: 0.10.0
libtpu: 0.0.40
codegen_flags: <defaults>
</compile_context>

<pallas_src>
import jax
import jax.numpy as jnp
from jax import lax
from jax.experimental import pallas as pl
from jax.experimental.pallas import tpu as pltpu

# --- model hyperparameters (mirror the PyTorch module) ---
CFG_FC = (128, 10)
IN_FEATURES = 784
IN_PAD = 896          # 7 * 128 : lane-aligned K dimension for fc1
H2_PAD = 128          # lane-dense output slab / full MXU N tile for fc2
THRESH = 0.5
DECAY = 0.2
TIME_WINDOW = 20
_Q_BITS = 16
_Q_SCALE = float(1 << _Q_BITS)   # 16-bit fixed-point input quantisation for integer compare


def _round_up(x, m):
    return -(-x // m) * m


# ----------------------- portable counter-based PRNG -------------------------------------
def _mix32(x):
    """splitmix32-style finalizer on uint32 (xor / shift / mul only — pure VPU work)."""
    x = x ^ (x >> 16)
    x = x * jnp.uint32(0x7FEB352D)
    x = x ^ (x >> 15)
    x = x * jnp.uint32(0x846CA68B)
    x = x ^ (x >> 16)
    return x


def _pair_key(seed, pair_idx):
    """Per-(seed, time-step-pair) scalar key. `seed` is a static Python int."""
    s = jnp.uint32((int(seed) * 0x9E3779B9) & 0xFFFFFFFF)
    p = jnp.asarray(pair_idx, jnp.uint32) * jnp.uint32(0x85EBCA6B)
    return _mix32(s + p + jnp.uint32(0x2545F491))


def _pair_bits(base_idx_u32, seed, pair_idx):
    """One 32-bit random word per element per PAIR of time steps.

    lo 16 bits -> threshold for the even step, hi 16 bits -> odd step.  Identical results
    under Mosaic, interpret mode and on the host (used by the reference check).
    """
    return _mix32(base_idx_u32 ^ _pair_key(seed, pair_idx))


def _quantize_input(x_flat_f32):
    """x in [0,1] -> 16-bit fixed point so the Bernoulli compare is pure integer work."""
    return jnp.clip(jnp.round(x_flat_f32 * _Q_SCALE), 0.0, _Q_SCALE).astype(jnp.int32)


# ----------------------------- fused SNN time recurrence ---------------------------------
def _snn_time_loop(x_q, base_idx, w1, b1_b, w2, b2_b, seed, time_window, mm_dtype):
    """x_q: (tb, in_pad) int32; base_idx: (tb, in_pad) uint32; biases pre-broadcast."""
    tb = x_q.shape[0]
    h1 = w1.shape[1]
    h2 = w2.shape[1]
    decay = jnp.float32(DECAY)
    thresh = jnp.float32(THRESH)

    def snn_step(u16, state):
        h1_mem, h1_spk, h2_mem, h2_spk, h2_sum = state
        # Bernoulli spike encoding: integer-domain compare, cast straight to matmul dtype.
        x = (x_q > u16).astype(mm_dtype)
        a1 = jnp.dot(x, w1, preferred_element_type=jnp.float32) + b1_b
        h1_mem = h1_mem * decay * (1.0 - h1_spk) + a1
        h1_spk = (h1_mem > thresh).astype(jnp.float32)
        a2 = jnp.dot(h1_spk.astype(mm_dtype), w2, preferred_element_type=jnp.float32) + b2_b
        h2_mem = h2_mem * decay * (1.0 - h2_spk) + a2
        h2_spk = (h2_mem > thresh).astype(jnp.float32)
        return (h1_mem, h1_spk, h2_mem, h2_spk, h2_sum + h2_spk)

    def pair_body(p, state):
        bits = _pair_bits(base_idx, seed, p)
        state = snn_step((bits & jnp.uint32(0xFFFF)).astype(jnp.int32), state)  # step 2p
        state = snn_step((bits >> 16).astype(jnp.int32), state)                 # step 2p+1
        return state

    zeros1 = jnp.zeros((tb, h1), jnp.float32)
    zeros2 = jnp.zeros((tb, h2), jnp.float32)
    state = (zeros1, zeros1, zeros2, zeros2, zeros2)
    state = lax.fori_loop(0, time_window // 2, pair_body, state)
    if time_window % 2:  # trailing odd step (static branch)
        bits = _pair_bits(base_idx, seed, time_window // 2)
        state = snn_step((bits & jnp.uint32(0xFFFF)).astype(jnp.int32), state)
    h2_sum = state[4]
    return h2_sum * jnp.float32(1.0 / time_window)


def _make_kernel(time_window, tile_b, seed, mm_dtype):
    def kernel(x_ref, w1_ref, b1_ref, w2_ref, b2_ref, out_ref):
        x_q = x_ref[...]
        w1 = w1_ref[...]
        w2 = w2_ref[...]
        tb, in_pad = x_q.shape
        h1 = w1.shape[1]
        h2 = w2.shape[1]
        # Hoisted, loop-invariant bias broadcasts.
        b1_b = jnp.broadcast_to(b1_ref[...], (tb, h1))
        b2_b = jnp.broadcast_to(b2_ref[...], (tb, h2))
        # Global element index for the counter-based PRNG (matches the host reference).
        row0 = pl.program_id(0) * tile_b
        rows = lax.broadcasted_iota(jnp.int32, (tb, in_pad), 0) + row0
        cols = lax.broadcasted_iota(jnp.int32, (tb, in_pad), 1)
        base_idx = rows.astype(jnp.uint32) * jnp.uint32(in_pad) + cols.astype(jnp.uint32)
        out_ref[...] = _snn_time_loop(x_q, base_idx, w1, b1_b, w2, b2_b,
                                      seed, time_window, mm_dtype)
    return kernel


# ------------------------------------- wrapper -------------------------------------------
def scnn_forward(x_img, w1, b1, w2, b2, *, time_window=TIME_WINDOW, seed=0,
                 matmul_dtype=jnp.bfloat16):
    """SCNN forward.  x_img: (B, 1, 28, 28).  Weights are transposed vs torch.nn.Linear:
    w1 (784,128), b1 (128,), w2 (128,10), b2 (10,).  Thresholds are generated in-kernel."""
    assert time_window >= 1
    B = x_img.shape[0]
    x_flat = x_img.reshape(B, -1).astype(jnp.float32)
    assert x_flat.shape[1] == IN_FEATURES
    H1, H2 = CFG_FC

    x_q = _quantize_input(x_flat)

    # --- batch tiling: lane/sublane friendly, >= 2 tiles when possible (v7x megacore),
    #     TILE_B=256 for large batches (v6e/v7x 256-wide MXU) ---
    B_pad = _round_up(B, 8)
    if B_pad >= 512:
        tile_b = 256
    elif B_pad >= 256:
        tile_b = 128
    elif B_pad >= 16:
        tile_b = _round_up(B_pad // 2, 8)
    else:
        tile_b = B_pad
    B_pad = _round_up(B_pad, tile_b)
    n_tiles = B_pad // tile_b

    # Padded, lane-dense operands.  Padded input columns are 0 -> never spike (0 > u16 is
    # always False), padded fc2 columns have zero weights/bias and are sliced away.
    x_p = jnp.zeros((B_pad, IN_PAD), jnp.int32).at[:B, :IN_FEATURES].set(x_q)
    w1_p = (jnp.zeros((IN_PAD, H1), jnp.float32)
            .at[:IN_FEATURES, :].set(w1.astype(jnp.float32)).astype(matmul_dtype))
    b1_r = b1.reshape(1, H1).astype(jnp.float32)
    w2_p = (jnp.zeros((H1, H2_PAD), jnp.float32)
            .at[:, :H2].set(w2.astype(jnp.float32)).astype(matmul_dtype))
    b2_p = jnp.zeros((1, H2_PAD), jnp.float32).at[0, :H2].set(b2.astype(jnp.float32))

    mm_itemsize = jnp.dtype(matmul_dtype).itemsize
    cost = pl.CostEstimate(
        flops=int(2 * time_window * B_pad * (IN_PAD * H1 + H1 * H2_PAD)),
        transcendentals=0,
        bytes_accessed=int(x_p.size * 4 + (w1_p.size + w2_p.size) * mm_itemsize
                           + (b1_r.size + b2_p.size) * 4 + B_pad * H2_PAD * 4))

    out_p = pl.pallas_call(
        _make_kernel(time_window, tile_b, int(seed), matmul_dtype),
        out_shape=jax.ShapeDtypeStruct((B_pad, H2_PAD), jnp.float32),
        grid=(n_tiles,),
        in_specs=[
            pl.BlockSpec((tile_b, IN_PAD), lambda i: (i, 0)),
            pl.BlockSpec((IN_PAD, H1), lambda i: (0, 0)),
            pl.BlockSpec((1, H1), lambda i: (0, 0)),
            pl.BlockSpec((H1, H2_PAD), lambda i: (0, 0)),
            pl.BlockSpec((1, H2_PAD), lambda i: (0, 0)),
        ],
        out_specs=pl.BlockSpec((tile_b, H2_PAD), lambda i: (i, 0)),
        compiler_params=pltpu.CompilerParams(dimension_semantics=("parallel",)),
        cost_estimate=cost,
    )(x_p, w1_p, b1_r, w2_p, b2_p)

    return out_p[:B, :H2]


# ------------------------------ pure-JAX reference ---------------------------------------
def _reference_forward(x_img, w1, b1, w2, b2, seed=0, time_window=TIME_WINDOW):
    """Straight transcription of the PyTorch forward, using the SAME in-kernel thresholds
    (reconstructed on the host with the same counter hash)."""
    B = x_img.shape[0]
    x_flat = x_img.reshape(B, -1).astype(jnp.float32)
    H1, H2 = CFG_FC
    x_q = _quantize_input(x_flat)
    rows = jnp.arange(B, dtype=jnp.uint32)[:, None]
    cols = jnp.arange(IN_FEATURES, dtype=jnp.uint32)[None, :]
    base_idx = rows * jnp.uint32(IN_PAD) + cols   # stride matches the padded kernel layout

    hi = jax.lax.Precision.HIGHEST
    h1_mem = h1_spk = jnp.zeros((B, H1), jnp.float32)
    h2_mem = h2_spk = jnp.zeros((B, H2), jnp.float32)
    h2_sum = jnp.zeros((B, H2), jnp.float32)
    for t in range(time_window):
        bits = _pair_bits(base_idx, seed, t // 2)
        u = (bits & jnp.uint32(0xFFFF)) if (t % 2 == 0) else (bits >> 16)
        x = (x_q > u.astype(jnp.int32)).astype(jnp.float32)
        h1_mem = h1_mem * DECAY * (1.0 - h1_spk) + jnp.dot(x, w1, precision=hi) + b1
        h1_spk = (h1_mem > THRESH).astype(jnp.float32)
        h2_mem = h2_mem * DECAY * (1.0 - h2_spk) + jnp.dot(h1_spk, w2, precision=hi) + b2
        h2_spk = (h2_mem > THRESH).astype(jnp.float32)
        h2_sum = h2_sum + h2_spk
    return h2_sum / time_window


if __name__ == "__main__":
    key = jax.random.PRNGKey(0)
    k_x, k_w1, k_b1, k_w2, k_b2 = jax.random.split(key, 5)

    B = 100                      # matches the PyTorch module's batch_size
    H1, H2 = CFG_FC

    # torch.nn.Linear-style uniform init bounds
    bound1 = 1.0 / (IN_FEATURES ** 0.5)
    bound2 = 1.0 / (H1 ** 0.5)
    w1 = jax.random.uniform(k_w1, (IN_FEATURES, H1), jnp.float32, -bound1, bound1)
    b1 = jax.random.uniform(k_b1, (H1,), jnp.float32, -bound1, bound1)
    w2 = jax.random.uniform(k_w2, (H1, H2), jnp.float32, -bound2, bound2)
    b2 = jax.random.uniform(k_b2, (H2,), jnp.float32, -bound2, bound2)
    x_img = jax.random.uniform(k_x, (B, 1, 28, 28), jnp.float32)

    # 1) f32-matmul variant vs. pure-JAX reference with identical thresholds.
    #    Spike decisions are hard 0.5 thresholds, so a tolerance-aware metric is used
    #    (accumulation-order differences may legitimately flip a borderline spike).
    out_f32 = jax.block_until_ready(
        scnn_forward(x_img, w1, b1, w2, b2, seed=0, matmul_dtype=jnp.float32))
    ref = jax.block_until_ready(_reference_forward(x_img, w1, b1, w2, b2, seed=0))
    assert out_f32.shape == (B, H2)
    err = jnp.abs(out_f32 - ref)
    mean_err = float(jnp.mean(err))
    frac_mismatch = float(jnp.mean((err > 1e-6).astype(jnp.float32)))
    assert mean_err < 0.03, f"mean |out - ref| too large: {mean_err}"
    assert frac_mismatch < 0.15, f"too many mismatching entries: {frac_mismatch}"
    assert bool(jnp.all((out_f32 >= 0.0) & (out_f32 <= 1.0)))

    # 2) production default (bf16 matmul operands), same thresholds: distributional checks.
    out_bf16 = jax.block_until_ready(scnn_forward(x_img, w1, b1, w2, b2, seed=0))
    assert out_bf16.shape == (B, H2)
    assert bool(jnp.all(jnp.isfinite(out_bf16)))
    assert bool(jnp.all((out_bf16 >= 0.0) & (out_bf16 <= 1.0)))
    assert abs(float(jnp.mean(out_bf16)) - float(jnp.mean(out_f32))) < 0.1

    print("KERNEL_OK")
</pallas_src>

<mosaic_0001>
module attributes {stable_mosaic.version = 11 : i64} {
  func.func @kernel(%arg0: i32, %arg1: memref<56x896xi32, #tpu.memory_space<vmem>>, %arg2: memref<896x128xf32, #tpu.memory_space<vmem>>, %arg3: memref<1x128xf32, #tpu.memory_space<vmem>>, %arg4: memref<128x128xf32, #tpu.memory_space<vmem>>, %arg5: memref<1x128xf32, #tpu.memory_space<vmem>>, %arg6: memref<56x128xf32, #tpu.memory_space<vmem>>) attributes {dimension_semantics = [#tpu.dimension_semantics<parallel>], iteration_bounds = array<i64: 2>, scalar_prefetch = 0 : i64, scratch_operands = 0 : i64, tpu.core_type = #tpu.core_type<tc>, window_params = [{transform_indices = @transform_0, window_bounds = array<i64: 56, 896>}, {pipeline_mode = #tpu.pipeline_mode<synchronous>, transform_indices = @transform_1, window_bounds = array<i64: 896, 128>}, {pipeline_mode = #tpu.pipeline_mode<synchronous>, transform_indices = @transform_2, window_bounds = array<i64: 1, 128>}, {pipeline_mode = #tpu.pipeline_mode<synchronous>, transform_indices = @transform_3, window_bounds = array<i64: 128, 128>}, {pipeline_mode = #tpu.pipeline_mode<synchronous>, transform_indices = @transform_4, window_bounds = array<i64: 1, 128>}, {transform_indices = @transform_5, window_bounds = array<i64: 56, 128>}]} {
    %c0 = arith.constant 0 : index
    %c0_0 = arith.constant 0 : index
    %0 = vector.load %arg1[%c0, %c0_0] : memref<56x896xi32, #tpu.memory_space<vmem>>, vector<56x896xi32>
    %c0_1 = arith.constant 0 : index
    %c0_2 = arith.constant 0 : index
    %1 = vector.load %arg2[%c0_1, %c0_2] : memref<896x128xf32, #tpu.memory_space<vmem>>, vector<896x128xf32>
    %c0_3 = arith.constant 0 : index
    %c0_4 = arith.constant 0 : index
    %2 = vector.load %arg4[%c0_3, %c0_4] : memref<128x128xf32, #tpu.memory_space<vmem>>, vector<128x128xf32>
    %c0_5 = arith.constant 0 : index
    %c0_6 = arith.constant 0 : index
    %3 = vector.load %arg3[%c0_5, %c0_6] : memref<1x128xf32, #tpu.memory_space<vmem>>, vector<1x128xf32>
    %4 = vector.shape_cast %3 : vector<1x128xf32> to vector<1x128xf32>
    %5 = vector.broadcast %4 : vector<1x128xf32> to vector<56x128xf32>
    %c0_7 = arith.constant 0 : index
    %c0_8 = arith.constant 0 : index
    %6 = vector.load %arg5[%c0_7, %c0_8] : memref<1x128xf32, #tpu.memory_space<vmem>>, vector<1x128xf32>
    %7 = vector.shape_cast %6 : vector<1x128xf32> to vector<1x128xf32>
    %8 = vector.broadcast %7 : vector<1x128xf32> to vector<56x128xf32>
    %c56_i32 = arith.constant 56 : i32
    %9 = arith.muli %arg0, %c56_i32 : i32
    %10 = tpu.iota {dimensions = array<i32: 0>} : vector<56x896xi32>
    %11 = vector.broadcast %9 : i32 to vector<56x896xi32>
    %12 = arith.addi %10, %11 : vector<56x896xi32>
    %13 = tpu.iota {dimensions = array<i32: 1>} : vector<56x896xi32>
    %c896_i32 = arith.constant 896 : i32
    %14 = vector.broadcast %c896_i32 : i32 to vector<56x896xi32>
    %15 = arith.muli %12, %14 : vector<56x896xi32>
    %16 = arith.addi %15, %13 : vector<56x896xi32>
    %cst = arith.constant 0.000000e+00 : f32
    %17 = vector.broadcast %cst : f32 to vector<56x128xf32>
    %cst_9 = arith.constant 0.000000e+00 : f32
    %18 = vector.broadcast %cst_9 : f32 to vector<56x128xf32>
    %cst_10 = arith.constant 2.000000e-01 : f32
    %cst_11 = arith.constant 5.000000e-01 : f32
    %c0_i32 = arith.constant 0 : i32
    %c10_i32 = arith.constant 10 : i32
    %19 = arith.addi %c0_i32, %c10_i32 : i32
    %c1_i32 = arith.constant 1 : i32
    %20:5 = scf.for %arg7 = %c0_i32 to %19 step %c1_i32 iter_args(%arg8 = %17, %arg9 = %17, %arg10 = %18, %arg11 = %18, %arg12 = %18) -> (vector<56x128xf32>, vector<56x128xf32>, vector<56x128xf32>, vector<56x128xf32>, vector<56x128xf32>)  : i32 {
      %c-2048144789_i32 = arith.constant -2048144789 : i32
      %24 = arith.muli %arg7, %c-2048144789_i32 : i32
      %c0_i32_16 = arith.constant 0 : i32
      %25 = arith.addi %c0_i32_16, %24 : i32
      %c625341585_i32 = arith.constant 625341585 : i32
      %26 = arith.addi %25, %c625341585_i32 : i32
      %c16_i32 = arith.constant 16 : i32
      %27 = arith.shrui %26, %c16_i32 : i32
      %28 = arith.xori %26, %27 : i32
      %c2146121005_i32 = arith.constant 2146121005 : i32
      %29 = arith.muli %28, %c2146121005_i32 : i32
      %c15_i32 = arith.constant 15 : i32
      %30 = arith.shrui %29, %c15_i32 : i32
      %31 = arith.xori %29, %30 : i32
      %c-2073254261_i32 = arith.constant -2073254261 : i32
      %32 = arith.muli %31, %c-2073254261_i32 : i32
      %c16_i32_17 = arith.constant 16 : i32
      %33 = arith.shrui %32, %c16_i32_17 : i32
      %34 = arith.xori %32, %33 : i32
      %35 = vector.broadcast %34 : i32 to vector<56x896xi32>
      %36 = arith.xori %16, %35 : vector<56x896xi32>
      %c16_i32_18 = arith.constant 16 : i32
      %37 = vector.broadcast %c16_i32_18 : i32 to vector<56x896xi32>
      %38 = arith.shrui %36, %37 : vector<56x896xi32>
      %39 = arith.xori %36, %38 : vector<56x896xi32>
      %c2146121005_i32_19 = arith.constant 2146121005 : i32
      %40 = vector.broadcast %c2146121005_i32_19 : i32 to vector<56x896xi32>
      %41 = arith.muli %39, %40 : vector<56x896xi32>
      %c15_i32_20 = arith.constant 15 : i32
      %42 = vector.broadcast %c15_i32_20 : i32 to vector<56x896xi32>
      %43 = arith.shrui %41, %42 : vector<56x896xi32>
      %44 = arith.xori %41, %43 : vector<56x896xi32>
      %c-2073254261_i32_21 = arith.constant -2073254261 : i32
      %45 = vector.broadcast %c-2073254261_i32_21 : i32 to vector<56x896xi32>
      %46 = arith.muli %44, %45 : vector<56x896xi32>
      %c16_i32_22 = arith.constant 16 : i32
      %47 = vector.broadcast %c16_i32_22 : i32 to vector<56x896xi32>
      %48 = arith.shrui %46, %47 : vector<56x896xi32>
      %49 = arith.xori %46, %48 : vector<56x896xi32>
      %c65535_i32 = arith.constant 65535 : i32
      %50 = vector.broadcast %c65535_i32 : i32 to vector<56x896xi32>
      %51 = arith.andi %49, %50 : vector<56x896xi32>
      %52 = arith.cmpi sgt, %0, %51 : vector<56x896xi32>
      %53 = arith.extui %52 : vector<56x896xi1> to vector<56x896xi32>
      %54 = arith.sitofp %53 : vector<56x896xi32> to vector<56x896xf32>
      %cst_23 = arith.constant dense<0.000000e+00> : vector<56x128xf32>
      %55 = tpu.matmul %54, %1, %cst_23 {dimension_numbers = #tpu.dot_dimension_numbers<[1], [0], [0], [1], [0, 0, 1, 1], [], []>} : vector<56x896xf32>, vector<896x128xf32>, vector<56x128xf32> -> vector<56x128xf32>
      %56 = arith.addf %55, %5 : vector<56x128xf32>
      %57 = vector.broadcast %cst_10 : f32 to vector<56x128xf32>
      %58 = arith.mulf %arg8, %57 : vector<56x128xf32>
      %cst_24 = arith.constant 1.000000e+00 : f32
      %59 = vector.broadcast %cst_24 : f32 to vector<56x128xf32>
      %60 = arith.subf %59, %arg9 : vector<56x128xf32>
      %61 = arith.mulf %58, %60 : vector<56x128xf32>
      %62 = arith.addf %61, %56 : vector<56x128xf32>
      %63 = vector.broadcast %cst_11 : f32 to vector<56x128xf32>
      %64 = arith.cmpf ogt, %62, %63 : vector<56x128xf32>
      %65 = arith.extui %64 : vector<56x128xi1> to vector<56x128xi32>
      %66 = arith.sitofp %65 : vector<56x128xi32> to vector<56x128xf32>
      %cst_25 = arith.constant dense<0.000000e+00> : vector<56x128xf32>
      %67 = tpu.matmul %66, %2, %cst_25 {dimension_numbers = #tpu.dot_dimension_numbers<[1], [0], [0], [1], [0, 0, 1, 1], [], []>} : vector<56x128xf32>, vector<128x128xf32>, vector<56x128xf32> -> vector<56x128xf32>
      %68 = arith.addf %67, %8 : vector<56x128xf32>
      %69 = vector.broadcast %cst_10 : f32 to vector<56x128xf32>
      %70 = arith.mulf %arg10, %69 : vector<56x128xf32>
      %cst_26 = arith.constant 1.000000e+00 : f32
      %71 = vector.broadcast %cst_26 : f32 to vector<56x128xf32>
      %72 = arith.subf %71, %arg11 : vector<56x128xf32>
      %73 = arith.mulf %70, %72 : vector<56x128xf32>
      %74 = arith.addf %73, %68 : vector<56x128xf32>
      %75 = vector.broadcast %cst_11 : f32 to vector<56x128xf32>
      %76 = arith.cmpf ogt, %74, %75 : vector<56x128xf32>
      %77 = arith.extui %76 : vector<56x128xi1> to vector<56x128xi32>
      %78 = arith.sitofp %77 : vector<56x128xi32> to vector<56x128xf32>
      %79 = arith.addf %arg12, %78 : vector<56x128xf32>
      %c16_i32_27 = arith.constant 16 : i32
      %80 = vector.broadcast %c16_i32_27 : i32 to vector<56x896xi32>
      %81 = arith.shrui %49, %80 : vector<56x896xi32>
      %82 = arith.cmpi sgt, %0, %81 : vector<56x896xi32>
      %83 = arith.extui %82 : vector<56x896xi1> to vector<56x896xi32>
      %84 = arith.sitofp %83 : vector<56x896xi32> to vector<56x896xf32>
      %cst_28 = arith.constant dense<0.000000e+00> : vector<56x128xf32>
      %85 = tpu.matmul %84, %1, %cst_28 {dimension_numbers = #tpu.dot_dimension_numbers<[1], [0], [0], [1], [0, 0, 1, 1], [], []>} : vector<56x896xf32>, vector<896x128xf32>, vector<56x128xf32> -> vector<56x128xf32>
      %86 = arith.addf %85, %5 : vector<56x128xf32>
      %87 = vector.broadcast %cst_10 : f32 to vector<56x128xf32>
      %88 = arith.mulf %62, %87 : vector<56x128xf32>
      %cst_29 = arith.constant 1.000000e+00 : f32
      %89 = vector.broadcast %cst_29 : f32 to vector<56x128xf32>
      %90 = arith.subf %89, %66 : vector<56x128xf32>
      %91 = arith.mulf %88, %90 : vector<56x128xf32>
      %92 = arith.addf %91, %86 : vector<56x128xf32>
      %93 = vector.broadcast %cst_11 : f32 to vector<56x128xf32>
      %94 = arith.cmpf ogt, %92, %93 : vector<56x128xf32>
      %95 = arith.extui %94 : vector<56x128xi1> to vector<56x128xi32>
      %96 = arith.sitofp %95 : vector<56x128xi32> to vector<56x128xf32>
      %cst_30 = arith.constant dense<0.000000e+00> : vector<56x128xf32>
      %97 = tpu.matmul %96, %2, %cst_30 {dimension_numbers = #tpu.dot_dimension_numbers<[1], [0], [0], [1], [0, 0, 1, 1], [], []>} : vector<56x128xf32>, vector<128x128xf32>, vector<56x128xf32> -> vector<56x128xf32>
      %98 = arith.addf %97, %8 : vector<56x128xf32>
      %99 = vector.broadcast %cst_10 : f32 to vector<56x128xf32>
      %100 = arith.mulf %74, %99 : vector<56x128xf32>
      %cst_31 = arith.constant 1.000000e+00 : f32
      %101 = vector.broadcast %cst_31 : f32 to vector<56x128xf32>
      %102 = arith.subf %101, %78 : vector<56x128xf32>
      %103 = arith.mulf %100, %102 : vector<56x128xf32>
      %104 = arith.addf %103, %98 : vector<56x128xf32>
      %105 = vector.broadcast %cst_11 : f32 to vector<56x128xf32>
      %106 = arith.cmpf ogt, %104, %105 : vector<56x128xf32>
      %107 = arith.extui %106 : vector<56x128xi1> to vector<56x128xi32>
      %108 = arith.sitofp %107 : vector<56x128xi32> to vector<56x128xf32>
      %109 = arith.addf %79, %108 : vector<56x128xf32>
      scf.yield %92, %96, %104, %108, %109 : vector<56x128xf32>, vector<56x128xf32>, vector<56x128xf32>, vector<56x128xf32>, vector<56x128xf32>
    }
    %c10_i32_12 = arith.constant 10 : i32
    %cst_13 = arith.constant 5.000000e-02 : f32
    %21 = vector.broadcast %cst_13 : f32 to vector<56x128xf32>
    %22 = arith.mulf %20#4, %21 : vector<56x128xf32>
    %c0_14 = arith.constant 0 : index
    %c0_15 = arith.constant 0 : index
    %23 = vector.load %arg6[%c0_14, %c0_15] : memref<56x128xf32, #tpu.memory_space<vmem>>, vector<56x128xf32>
    tpu.vector_store %arg6[%c0_14, %c0_15], %22 {strides = array<i32>} : memref<56x128xf32, #tpu.memory_space<vmem>>, vector<56x128xf32>,
    return
  }
  func.func @transform_0(%arg0: i32) -> (i32, i32) {
    %c0_i32 = arith.constant 0 : i32
    %c0_i32_0 = arith.constant 0 : i32
    return %arg0, %c0_i32 : i32, i32
  }
  func.func @transform_1(%arg0: i32) -> (i32, i32) {
    %c0_i32 = arith.constant 0 : i32
    %c0_i32_0 = arith.constant 0 : i32
    %c0_i32_1 = arith.constant 0 : i32
    return %c0_i32, %c0_i32_0 : i32, i32
  }
  func.func @transform_2(%arg0: i32) -> (i32, i32) {
    %c0_i32 = arith.constant 0 : i32
    %c0_i32_0 = arith.constant 0 : i32
    %c0_i32_1 = arith.constant 0 : i32
    return %c0_i32, %c0_i32_0 : i32, i32
  }
  func.func @transform_3(%arg0: i32) -> (i32, i32) {
    %c0_i32 = arith.constant 0 : i32
    %c0_i32_0 = arith.constant 0 : i32
    %c0_i32_1 = arith.constant 0 : i32
    return %c0_i32, %c0_i32_0 : i32, i32
  }
  func.func @transform_4(%arg0: i32) -> (i32, i32) {
    %c0_i32 = arith.constant 0 : i32
    %c0_i32_0 = arith.constant 0 : i32
    %c0_i32_1 = arith.constant 0 : i32
    return %c0_i32, %c0_i32_0 : i32, i32
  }
  func.func @transform_5(%arg0: i32) -> (i32, i32) {
    %c0_i32 = arith.constant 0 : i32
    %c0_i32_0 = arith.constant 0 : i32
    return %arg0, %c0_i32 : i32, i32
  }
}

</mosaic_0001>

<bundles_post_ra>
// kernel: tpu_custom_call.1
= control target key start
LH: loop header
LB: loop body
LE: loop exit
PB: predicated region body
PF: predicated region fallthrough
CT: control target
= control target key end

     0   :  { %10 = vsyncpa [#allocation3], 0  ;;  %s7249_s0 = inlined_call_operand.hbm [shape: s32[112,896], index: 0, kind: input, shape index: {}]   ;;  %s7250_s1 = inlined_call_operand.hbm [shape: f32[896,128], index: 1, kind: input, shape index: {}]   ;;  %s7251_s2 = inlined_call_operand.vmem [shape: f32[1,128], index: 2, kind: input, shape index: {}]   ;;  %s7252_s3 = inlined_call_operand.hbm [shape: f32[128,128], index: 3, kind: input, shape index: {}]   ;;  %s7253_s4 = inlined_call_operand.vmem [shape: f32[1,128], index: 4, kind: input, shape index: {}]   ;;  %s7254_s5 = inlined_call_operand.hbm [shape: f32[112,128], index: 5, kind: output, shape index: {}]  }
   0x1   :  { %12 = vsyncpa [#allocation3 + $0x1], 0 }
   0x2   :  { %13 = vsyncpa [#allocation6], 0 }
   0x3   :  { %14 = vsyncpa [#allocation4], 0 }
   0x4   :  { %16 = vsyncpa [#allocation4 + $0x1], 0  ;;  %s4895_s18 = smov 0   ;;  %s4897_s19 = smov 0  }
   0x5   :  { %s4899_s20 = smov 0   ;;  %s4901_s21 = smov 0  }
   0x6 LB: > { %s4916_s22 = sadd.s32 4294967295, %s4705_s21   ;;  %s2872_s23 = sadd.s32 4294967294, %s4705_s21   ;;  %s4705_s21 = sphi %s4901_s21, %s8142_s21   ;;  %s4701_s20 = sphi %s4899_s20, %s8141_s20   ;;  %s4697_s19 = sphi %s4897_s19, %s8140_s19   ;;  %s4693_s18 = sphi %s4895_s18, %s8139_s18  }
   0x7   : > { %p42_p0 = scmp.ne.s32.totalorder %s4697_s19, %s4693_s18  ;;  %p7255_p1 = scmp.eq.s32.totalorder %s4916_s22, 0 }
   0x8   : > { %p156_p3 = scmp.eq.s32.totalorder %s2872_s23, 1  ;;  %p2873_p5 = scmp.ge.s32.totalorder %s4705_s21, 1 }
   0x9   : > { %p4925_p4 = por %p7255_p1, %p42_p0  ;;  %p163_p7 = scmp.lt.s32.totalorder %s4705_s21, 3 }
   0xa   : > { %p4930_p6 = por %p156_p3, %p42_p0  ;;  %s4851_s27 = smov [#allocation5]  }
   0xb   : > { %s7388_s24 = scalar_select %p4925_p4, 1, 0 }
   0xc   : > { %s7389_s25 = scalar_select %p4930_p6, 1, 0 }
   0xd   : > { %p4935_p8 = pnand %p2873_p5, %p163_p7  ;;  %s175_s28 = sshll.u32 %s4851_s27, 4  ;;  %s4939_s28 = int_to_ptr.vmem [resolvable:$true] %s175_s28 }
   0xe   : > { %s4852_s30 = smov [#allocation7]   ;;  %s4405_s9 = scalar_lea.hbm %s7250_s1, 14336 }
   0xf   : > { %p4051_p9 = pneg %p4935_p8  ;;  %s191_s6 = sshll.u32 %s4852_s30, 4  ;;  %s4950_s6 = int_to_ptr.vmem [resolvable:$true] %s191_s6 }
  0x10   : > { %p4406_p12 = scmp.ne.s32.totalorder %s7250_s1, %s4405_s9  ;;  %p4412_p5 = scmp.lt.u32.totalorder %s4405_s9, %s7250_s1 }
  0x11   : > { %p4946_p11 = pnand %p4051_p9, %p7255_p1 }
  0x13   : > { %p4407_p13 = pneg %p4946_p11 }
  0x15   : > { %p4408_p0 = pnand %p4407_p13, %p4406_p12 }
  0x17   : > { %p4409_p3 = pneg %p4408_p0 }
  0x19   : > { %p4414_p7 = pnand %p4412_p5, %p4409_p3 }
  0x1b   : > { %4417 = shalt.err (!%p4414_p7)
}
  0x1c   : > { %s4418_s14 = scalar_lea.vmem %s4939_s28, 14336  ;;  %p4426_p2 = scmp.lt.s32.totalorder %s4939_s28, %s4939_s28 }
  0x1d   : > { %p4419_p9 = scmp.ne.s32.totalorder %s4939_s28, %s4418_s14  ;;  %p4427_p12 = scmp.lt.s32.totalorder %s4418_s14, %s4418_s14 }
  0x1f   : > { %p4421_p10 = pnand %p4419_p9, %p4407_p13  ;;  %p4428_p0 = por %p4427_p12, %p4426_p2 }
  0x21   : > { %p4422_p1 = pneg %p4421_p10 }
  0x23   : > { %p4429_p6 = pnand %p4428_p0, %p4422_p1 }
  0x25   : > { %4432 = shalt.err (!%p4429_p6)
}
  0x26   : > { %s4853_s15 = smov 128   ;;  %s4854_s16 = smov 8  }
  0x27   : > { %4054 = dma.hbm_to_vmem [thread:$0]  (!%p4946_p11), %s7250_s1, 14336, %s4939_s28, [#allocation6], %s4853_s15, %s4853_s15, %s4854_s16  }
  0x28   : > { %s4433_s7 = scalar_lea.hbm %s7252_s3, 2048 }
  0x29   : > { %p4434_p2 = scmp.ne.s32.totalorder %s7252_s3, %s4433_s7  ;;  %p4440_p10 = scmp.lt.u32.totalorder %s4433_s7, %s7252_s3 }
  0x2b   : > { %p4436_p1 = pnand %p4434_p2, %p4407_p13 }
  0x2d   : > { %p4437_p6 = pneg %p4436_p1 }
  0x2f   : > { %p4442_p3 = pnand %p4440_p10, %p4437_p6 }
  0x31   : > { %4445 = shalt.err (!%p4442_p3)
}
  0x32   : > { %s4446_s28 = scalar_lea.vmem %s4950_s6, 2048  ;;  %p4454_p12 = scmp.lt.s32.totalorder %s4950_s6, %s4950_s6 }
  0x33   : > { %p4447_p5 = scmp.ne.s32.totalorder %s4950_s6, %s4446_s28  ;;  %p4455_p0 = scmp.lt.s32.totalorder %s4446_s28, %s4446_s28 }
  0x35   : > { %p4449_p7 = pnand %p4447_p5, %p4407_p13  ;;  %p4456_p2 = por %p4455_p0, %p4454_p12 }
  0x37   : > { %p4450_p9 = pneg %p4449_p7 }
  0x39   : > { %p4457_p1 = pnand %p4456_p2, %p4450_p9 }
  0x3b   : > { %4460 = shalt.err (!%p4457_p1)
}
  0x3c   : > { %4057 = dma.hbm_to_vmem [thread:$0]  (!%p4946_p11), %s7252_s3, 2048, %s4950_s6, [#allocation6], %s4853_s15, %s4853_s15, %s4854_s16  }
  0x3d   : > { %s5005_s14 = sadd.s32 1, %s4705_s21   ;;  %s29_s17 = sadd.s32 1, %s4701_s20 }
  0x3e   : > { %s26_s29 = ssub.s32 %s4705_s21, %s5005_s14  ;;  %p36_p6 = scmp.ne.s32.totalorder %s4701_s20, %s4697_s19 }
  0x3f   : > { %p27_p13 = scmp.eq.s32.totalorder %s26_s29, 0  ;;  %p37_p10 = scmp.eq.s32.totalorder %s4705_s21, 0 }
  0x40   : > { %p4068_p3 = scmp.lt.s32.totalorder %s4705_s21, 2  ;;  %p7392_p7 = scmp.eq.s32.totalorder %s4916_s22, 1 }
  0x41   : > { %s5015_s23 = scalar_select %p27_p13, %s4701_s20, %s29_s17  }
  0x42   : > { %p38_p5 = por %p37_p10, %p36_p6  ;;  %p5019_p9 = por %p7392_p7, %p36_p6 }
  0x43   : > { %s208_s30 = sand.u32 1, %s4701_s20   ;;  %s4069_s7 = smul.u32 6272, %s4705_s21 }
  0x44   : > { %s7393_s27 = scalar_select %p5019_p9, 1, 0 }
  0x45   : > { %s4035_s6 = smul.u32 392, %s208_s30  ;;  %s5028_s8 = scalar_lea.hbm %s7249_s0, %s4069_s7 }
  0x46   : > { %p5030_p11 = pnand %p4068_p3, %p38_p5  ;;  %s5036_s28 = scalar_lea.sflag [#allocation3], %s208_s30 }
  0x47   : > { %s212_s10 = scalar_lea.vmem [#allocation2], %s4035_s6  ;;  %s4461_s12 = scalar_lea.hbm %s5028_s8, 6272 }
  0x48   : > { %s220_s11 = sshll.u32 %s212_s10, 4  ;;  %p4462_p12 = scmp.ne.s32.totalorder %s5028_s8, %s4461_s12  ;;  %s5034_s11 = int_to_ptr.vmem [resolvable:$true] %s220_s11 }
  0x49   : > { %p4463_p0 = pneg %p5030_p11  ;;  %s4466_s17 = scalar_lea.hbm %s7249_s0, 12544 }
  0x4a   : > { %p4467_p13 = scmp.lt.u32.totalorder %s5028_s8, %s7249_s0  ;;  %p4468_p6 = scmp.lt.u32.totalorder %s4466_s17, %s4461_s12 }
  0x4b   : > { %p4464_p2 = pnand %p4463_p0, %p4462_p12  ;;  %p4470_p3 = scmp.lt.u32.totalorder %s4461_s12, %s5028_s8 }
  0x4c   : > { %p4469_p10 = por %p4468_p6, %p4467_p13 }
  0x4d   : > { %p4465_p1 = pneg %p4464_p2 }
  0x4e   : > { %p4471_p5 = por %p4470_p3, %p4469_p10 }
  0x50   : > { %p4472_p7 = pnand %p4471_p5, %p4465_p1 }
  0x52   : > { %4475 = shalt.err (!%p4472_p7)
}
  0x53   : > { %s4476_s30 = scalar_lea.vmem %s5034_s11, 6272  ;;  %s4855_s6 = smov [#allocation2]  }
  0x54   : > { %p4477_p12 = scmp.ne.s32.totalorder %s5034_s11, %s4476_s30  ;;  %s4481_s16 = sshll.u32 %s4855_s6, 4  ;;  %s4482_s16 = int_to_ptr.vmem [resolvable:$false] %s4481_s16 }
  0x55   : > { %s4483_s10 = scalar_lea.vmem %s4482_s16, 12544  ;;  %p4484_p4 = scmp.lt.s32.totalorder %s5034_s11, %s4482_s16 }
  0x56   : > { %p4479_p2 = pnand %p4477_p12, %p4463_p0  ;;  %p4485_p13 = scmp.lt.s32.totalorder %s4483_s10, %s4476_s30 }
  0x58   : > { %p4480_p9 = pneg %p4479_p2  ;;  %p4486_p6 = por %p4485_p13, %p4484_p4 }
  0x5a   : > { %p4487_p10 = pnand %p4486_p6, %p4480_p9 }
  0x5c   : > { %4490 = shalt.err (!%p4487_p10)
}
  0x5d   : > { %s4856_s12 = smov 896   ;;  %s4857_s13 = smov 56  }
  0x5e   : > { %4061 = dma.hbm_to_vmem [thread:$0]  (!%p5030_p11), %s5028_s8, 6272, %s5034_s11, %s5036_s28, %s4856_s12, %s4856_s12, %s4857_s13  }
  0x5f   : > { %232 = sbr.rel (%p4935_p8) target bundleno = 1164 (0x48c), region = 40 }
  0x66   : > { %s5067_s29 = sand.u32 1, %s4697_s19   ;;  %p7395_p4 = scmp.ne.s32.totalorder %s7388_s24, 0 }
  0x67   : > { %s4037_s17 = smul.u32 392, %s5067_s29  ;;  %s235_s7 = scalar_lea.sflag [#allocation3], %s5067_s29 }
  0x69   : > { %s5071_s15 = scalar_lea.vmem [#allocation2], %s4037_s17 }
  0x6a   : > { %4680 = dma.done.wait (%p7395_p4), %s235_s7, 6272  }
  0x6b   : > { %4682 = vsyncadd (%p7395_p4), %s235_s7, 4294961024  ;;  %p7396_p9 = scmp.eq.s32.totalorder %s4916_s22, 0 }
  0x6d   : > { %4684 = dma.done.wait (%p7396_p9), [#allocation6], 16384   ;;  %p7397_p8 = pmov %p7396_p9 }
  0x6e   : > { %s4038_s26 = smul.u32 56, %s5067_s29  ;;  %v467_v0 = vlaneseq  ;;  %v5086_v14 = vld [vmem:[%s5071_s15] sm:$0xff]  ;;  %v5089_v15 = vld [vmem:[%s5071_s15 + $0x8] sm:$0xff]  ;;  %v5092_v16 = vld [vmem:[%s5071_s15 + $0x10] sm:$0xff]  ;;  %s5764_s6 = smov 0  }
  0x6f   : > { %4686 = vsyncadd (%p7397_p8), [#allocation6], 4294950912  ;;  %s466_s8 = smul.u32 56, %s4916_s22  ;;  %7398 = vst [vmem:[#allocation12_spill] sm:$0xff] %v5086_v14  ;;  %v5101_v21 = vld [vmem:[%s5071_s15 + $0x18] sm:$0xff]  ;;  %v5104_v22 = vld [vmem:[%s5071_s15 + $0x20] sm:$0xff] }
  0x70   : > { %v468_v1 = vshrl.u32 %v467_v0, 7  ;;  %v5083_v3 = vand.u32 127, %v467_v0  ;;  %7399 = vst [vmem:[#allocation13_spill] sm:$0xff] %v5089_v15  ;;  %7400 = vst [vmem:[#allocation14_spill] sm:$0xff] %v5092_v16  ;;  %v5107_v23 = vld [vmem:[%s5071_s15 + $0x28] sm:$0xff]  ;;  %v5119_v28 = vld [vmem:[%s5071_s15 + $0x30] sm:$0xff] }
  0x71   : > { %v475_v2 = vstv %s466_s8  ;;  %7401 = vst [vmem:[#allocation15_spill] sm:$0xff] %v5101_v21  ;;  %7402 = vst [vmem:[#allocation16_spill] sm:$0xff] %v5104_v22  ;;  %v5122_v29 = vld [vmem:[%s5071_s15 + $0x38] sm:$0xff]  ;;  %v5125_v30 = vld [vmem:[%s5071_s15 + $0x40] sm:$0xff]  ;;  %s5692_s30 = scalar_lea.vmem [#allocation8], %s4038_s26 }
  0x72   : > { %v469_v4 = vadd.s32 8, %v468_v1  ;;  %v470_v5 = vadd.s32 16, %v468_v1  ;;  %v471_v6 = vadd.s32 24, %v468_v1  ;;  %v472_v7 = vadd.s32 32, %v468_v1  ;;  %7403 = vst [vmem:[#allocation17_spill] sm:$0xff] %v5107_v23  ;;  %7404 = vst [vmem:[#allocation18_spill] sm:$0xff] %v5119_v28 }
  0x73   : > { %v473_v8 = vadd.s32 40, %v468_v1  ;;  %v474_v9 = vadd.s32 48, %v468_v1  ;;  %v476_v10 = vadd.s32 %v475_v2, %v468_v1  ;;  %v5095_v19 = vadd.s32 128, %v5083_v3  ;;  %7405 = vst [vmem:[#allocation19_spill] sm:$0xff] %v5122_v29  ;;  %7406 = vst [vmem:[#allocation20_spill] sm:$0xff] %v5125_v30  ;;  %v5131_v34 = vld [vmem:[%s5071_s15 + $0x48] sm:$0xff] }
  0x74   : > { %v477_v11 = vadd.s32 %v475_v2, %v469_v4  ;;  %v478_v12 = vadd.s32 %v475_v2, %v470_v5  ;;  %v479_v13 = vadd.s32 %v475_v2, %v471_v6  ;;  %v480_v17 = vadd.s32 %v475_v2, %v472_v7  ;;  %7407 = vst [vmem:[#allocation21_spill] sm:$0xff] %v5131_v34  ;;  %v5134_v35 = vld [vmem:[%s5071_s15 + $0x50] sm:$0xff]  ;;  %v5137_v36 = vld [vmem:[%s5071_s15 + $0x58] sm:$0xff]  ;;  %v5140_v39 = vld [vmem:[%s5071_s15 + $0x60] sm:$0xff] }
  0x75   : > { %v481_v18 = vadd.s32 %v475_v2, %v473_v8  ;;  %v5098_v20 = vadd.s32 256, %v5083_v3  ;;  %v482_v24 = vadd.s32 %v475_v2, %v474_v9  ;;  %v5110_v25 = vadd.s32 384, %v5083_v3  ;;  %7408 = vst [vmem:[#allocation22_spill] sm:$0xff] %v5134_v35  ;;  %7409 = vst [vmem:[#allocation23_spill] sm:$0xff] %v5137_v36  ;;  %v5143_v40 = vld [vmem:[%s5071_s15 + $0x68] sm:$0xff]  ;;  %v5146_v41 = vld [vmem:[%s5071_s15 + $0x70] sm:$0xff] }
  0x76   : > { %v5113_v26 = vadd.s32 512, %v5083_v3  ;;  %v5116_v27 = vadd.s32 640, %v5083_v3  ;;  %v5128_v31 = vadd.s32 768, %v5083_v3  ;;  %v491_v32 = vmul.u32 896, %v476_v10  ;;  %7410 = vst [vmem:[#allocation24_spill] sm:$0xff] %v5140_v39  ;;  %7411 = vst [vmem:[#allocation25_spill] sm:$0xff] %v5143_v40 }
  0x77   : > { %v492_v33 = vmul.u32 896, %v477_v11  ;;  %v493_v37 = vmul.u32 896, %v478_v12  ;;  %7412 = vst [vmem:[#allocation26_spill] sm:$0xff] %v5146_v41  ;;  %v5159_v46 = vld [vmem:[%s5071_s15 + $0x78] sm:$0xff]  ;;  %v5162_v47 = vld [vmem:[%s5071_s15 + $0x80] sm:$0xff]  ;;  %v5165_v48 = vld [vmem:[%s5071_s15 + $0x88] sm:$0xff] }
  0x78   : > { %v494_v38 = vmul.u32 896, %v479_v13  ;;  %v5148_v42 = vmul.u32 896, %v480_v17  ;;  %v5153_v44 = vadd.s32 %v491_v32, %v5083_v3  ;;  %v5156_v45 = vadd.s32 %v491_v32, %v5095_v19  ;;  %7415 = vst [vmem:[#allocation29_spill] sm:$0xff] %v5159_v46  ;;  %7416 = vst [vmem:[#allocation30_spill] sm:$0xff] %v5162_v47  ;;  %v5179_v53 = vld [vmem:[%s5071_s15 + $0x90] sm:$0xff]  ;;  %v5182_v54 = vld [vmem:[%s5071_s15 + $0x98] sm:$0xff] }
  0x79   : > { %v5150_v43 = vmul.u32 896, %v481_v18  ;;  %7417 = vst [vmem:[#allocation31_spill] sm:$0xff] %v5165_v48  ;;  %v5167_v49 = vmul.u32 896, %v482_v24  ;;  %v5170_v50 = vadd.s32 %v491_v32, %v5098_v20  ;;  %v5173_v51 = vadd.s32 %v491_v32, %v5110_v25  ;;  %7421 = vst [vmem:[#allocation35_spill] sm:$0xff] %v5179_v53  ;;  %v5185_v55 = vld [vmem:[%s5071_s15 + $0xa0] sm:$0xff]  ;;  %v5200_v60 = vld [vmem:[%s5071_s15 + $0xa8] sm:$0xff] }
  0x7a   : > { %7413 = vst [vmem:[#allocation27_spill] sm:$0xff] %v5153_v44  ;;  %7414 = vst [vmem:[#allocation28_spill] sm:$0xff] %v5156_v45  ;;  %v5176_v52 = vadd.s32 %v491_v32, %v5113_v26  ;;  %v5188_v56 = vadd.s32 %v491_v32, %v5116_v27  ;;  %v5191_v57 = vadd.s32 %v491_v32, %v5128_v31  ;;  %v5203_v61 = vld [vmem:[%s5071_s15 + $0xb0] sm:$0xff]  ;;  %v5206_v62 = vld [vmem:[%s5071_s15 + $0xb8] sm:$0xff] }
  0x7b   : > { %7418 = vst [vmem:[#allocation32_spill] sm:$0xff] %v5170_v50  ;;  %7419 = vst [vmem:[#allocation33_spill] sm:$0xff] %v5173_v51  ;;  %v5194_v58 = vadd.s32 %v492_v33, %v5083_v3  ;;  %v5197_v59 = vadd.s32 %v492_v33, %v5095_v19  ;;  %v5209_v63 = vadd.s32 %v492_v33, %v5098_v20  ;;  %v5221_v4 = vld [vmem:[%s5071_s15 + $0xc0] sm:$0xff]  ;;  %v5224_v5 = vld [vmem:[%s5071_s15 + $0xc8] sm:$0xff] }
  0x7c   : > { %7420 = vst [vmem:[#allocation34_spill] sm:$0xff] %v5176_v52  ;;  %7422 = vst [vmem:[#allocation36_spill] sm:$0xff] %v5182_v54  ;;  %v5212_v0 = vadd.s32 %v492_v33, %v5110_v25  ;;  %v5215_v1 = vadd.s32 %v492_v33, %v5113_v26  ;;  %v5218_v2 = vadd.s32 %v492_v33, %v5116_v27  ;;  %v5227_v6 = vld [vmem:[%s5071_s15 + $0xd0] sm:$0xff]  ;;  %v5242_v11 = vld [vmem:[%s5071_s15 + $0xd8] sm:$0xff] }
  0x7d   : > { %7423 = vst [vmem:[#allocation37_spill] sm:$0xff] %v5185_v55  ;;  %7424 = vst [vmem:[#allocation38_spill] sm:$0xff] %v5188_v56  ;;  %v5230_v7 = vadd.s32 %v492_v33, %v5128_v31  ;;  %v5233_v8 = vadd.s32 %v493_v37, %v5083_v3  ;;  %v5236_v9 = vadd.s32 %v493_v37, %v5095_v19  ;;  %v5245_v12 = vld [vmem:[%s5071_s15 + $0xe0] sm:$0xff]  ;;  %v5248_v13 = vld [vmem:[%s5071_s15 + $0xe8] sm:$0xff] }
  0x7e   : > { %7425 = vst [vmem:[#allocation39_spill] sm:$0xff] %v5191_v57  ;;  %7426 = vst [vmem:[#allocation40_spill] sm:$0xff] %v5194_v58  ;;  %v5239_v10 = vadd.s32 %v493_v37, %v5098_v20  ;;  %v5251_v17 = vadd.s32 %v493_v37, %v5110_v25  ;;  %v5254_v18 = vadd.s32 %v493_v37, %v5113_v26  ;;  %v5263_v33 = vld [vmem:[%s5071_s15 + $0xf0] sm:$0xff]  ;;  %v5269_v55 = vld [vmem:[%s5071_s15 + $0x100] sm:$0xff] }
  0x7f   : > { %7427 = vst [vmem:[#allocation41_spill] sm:$0xff] %v5197_v59  ;;  %7428 = vst [vmem:[#allocation42_spill] sm:$0xff] %v5200_v60  ;;  %v5257_v24 = vadd.s32 %v493_v37, %v5116_v27  ;;  %v5260_v32 = vadd.s32 %v493_v37, %v5128_v31  ;;  %v5278_v40 = vadd.s32 %v494_v38, %v5098_v20  ;;  %v5284_v53 = vld [vmem:[%s5071_s15 + $0x108] sm:$0xff]  ;;  %v5287_v54 = vld [vmem:[%s5071_s15 + $0x110] sm:$0xff] }
  0x80   : > { %7429 = vst [vmem:[#allocation43_spill] sm:$0xff] %v5203_v61  ;;  %7430 = vst [vmem:[#allocation44_spill] sm:$0xff] %v5206_v62  ;;  %v5281_v37 = vadd.s32 %v494_v38, %v5110_v25  ;;  %v5293_v28 = vadd.s32 %v494_v38, %v5113_v26  ;;  %v5299_v36 = vadd.s32 %v494_v38, %v5128_v31  ;;  %v5312_v22 = vld [vmem:[%s5071_s15 + $0x130] sm:$0xff]  ;;  %v5334_v23 = vld [vmem:[%s5071_s15 + $0x140] sm:$0xff] }
  0x81   : > { %7431 = vst [vmem:[#allocation45_spill] sm:$0xff] %v5209_v63  ;;  %7432 = vst [vmem:[#allocation46_spill] sm:$0xff] %v5212_v0  ;;  %v5303_v39 = vadd.s32 %v5148_v42, %v5083_v3  ;;  %v5345_v57 = vadd.s32 %v5148_v42, %v5128_v31  ;;  %v5391_v52 = vadd.s32 %v5150_v43, %v5128_v31  ;;  %v5436_v56 = vld [vmem:[#allocation5 + $0x30] sm:$0xff]  ;;  %v5478_v62 = vld [vmem:[#allocation5 + $0xd8] sm:$0xff] }
  0x82   : > { %7433 = vst [vmem:[#allocation47_spill] sm:$0xff] %v5215_v1  ;;  %7434 = vst [vmem:[#allocation48_spill] sm:$0xff] %v5218_v2  ;;  %v5349_v1 = vadd.s32 %v5150_v43, %v5083_v3  ;;  %v5378_v2 = vadd.s32 %v5150_v43, %v5116_v27  ;;  %v5484_v60 = vld [vmem:[#allocation5 + $0xf0] sm:$0xff]  ;;  %v5488_v61 = vld [vmem:[#allocation5 + $0x100] sm:$0xff] }
  0x83   : > { %7435 = vst [vmem:[#allocation49_spill] sm:$0xff] %v5221_v4  ;;  %7436 = vst [vmem:[#allocation50_spill] sm:$0xff] %v5224_v5  ;;  %v5272_v5 = vadd.s32 %v494_v38, %v5083_v3  ;;  %v5480_v4 = vld [vmem:[#allocation5 + $0xe0] sm:$0xff]  ;;  %v5492_v47 = vld [vmem:[#allocation5 + $0x110] sm:$0xff] }
  0x84   : > { %7437 = vst [vmem:[#allocation51_spill] sm:$0xff] %v5227_v6  ;;  %7438 = vst [vmem:[#allocation52_spill] sm:$0xff] %v5230_v7  ;;  %v5275_v6 = vadd.s32 %v494_v38, %v5095_v19  ;;  %v5331_v7 = vld [vmem:[%s5071_s15 + $0x138] sm:$0xff]  ;;  %v5494_v48 = vld [vmem:[#allocation5 + $0x118] sm:$0xff] }
  0x85   : > { %7439 = vst [vmem:[#allocation53_spill] sm:$0xff] %v5233_v8  ;;  %7440 = vst [vmem:[#allocation54_spill] sm:$0xff] %v5236_v9  ;;  %v5496_v41 = vld [vmem:[#allocation5 + $0x120] sm:$0xff]  ;;  %v5498_v46 = vld [vmem:[#allocation5 + $0x128] sm:$0xff] }
  0x86   : > { %7441 = vst [vmem:[#allocation55_spill] sm:$0xff] %v5239_v10  ;;  %7442 = vst [vmem:[#allocation56_spill] sm:$0xff] %v5242_v11  ;;  %v5266_v11 = vld [vmem:[%s5071_s15 + $0xf8] sm:$0xff]  ;;  %v5512_v34 = vld [vmem:[#allocation5 + $0x160] sm:$0xff] }
  0x87   : > { %7443 = vst [vmem:[#allocation57_spill] sm:$0xff] %v5245_v12  ;;  %7444 = vst [vmem:[#allocation58_spill] sm:$0xff] %v5248_v13  ;;  %v5468_v12 = vld [vmem:[#allocation5 + $0xb0] sm:$0xff]  ;;  %v5470_v13 = vld [vmem:[#allocation5 + $0xb8] sm:$0xff] }
  0x88   : > { %7445 = vst [vmem:[#allocation59_spill] sm:$0xff] %v5251_v17  ;;  %7446 = vst [vmem:[#allocation60_spill] sm:$0xff] %v5254_v18  ;;  %v5337_v18 = vld [vmem:[%s5071_s15 + $0x148] sm:$0xff]  ;;  %v5514_v35 = vld [vmem:[#allocation5 + $0x168] sm:$0xff] }
  0x89   : > { %7447 = vst [vmem:[#allocation61_spill] sm:$0xff] %v5257_v24  ;;  %7448 = vst [vmem:[#allocation62_spill] sm:$0xff] %v5260_v32  ;;  %v5296_v32 = vadd.s32 %v494_v38, %v5116_v27  ;;  %v5320_v38 = vadd.s32 %v5148_v42, %v5098_v20  ;;  %v5341_v24 = vadd.s32 %v5148_v42, %v5116_v27  ;;  %v5516_v10 = vld [vmem:[#allocation5 + $0x170] sm:$0xff]  ;;  %v5518_v29 = vld [vmem:[#allocation5 + $0x178] sm:$0xff] }
  0x8a   : > { %7449 = vst [vmem:[#allocation63_spill] sm:$0xff] %v5263_v33  ;;  %7450 = vst [vmem:[#allocation64_spill] sm:$0xff] %v5266_v11  ;;  %v5460_v33 = vld [vmem:[#allocation5 + $0x90] sm:$0xff]  ;;  %v5462_v11 = vld [vmem:[#allocation5 + $0x98] sm:$0xff] }
  0x8b   : > { %7451 = vst [vmem:[#allocation65_spill] sm:$0xff] %v5269_v55  ;;  %7452 = vst [vmem:[#allocation66_spill] sm:$0xff] %v5272_v5  ;;  %v5290_v55 = vld [vmem:[%s5071_s15 + $0x118] sm:$0xff]  ;;  %v5520_v30 = vld [vmem:[#allocation5 + $0x180] sm:$0xff] }
  0x8c   : > { %7453 = vst [vmem:[#allocation67_spill] sm:$0xff] %v5275_v6  ;;  %7454 = vst [vmem:[#allocation68_spill] sm:$0xff] %v5278_v40  ;;  %v5504_v40 = vld [vmem:[#allocation5 + $0x140] sm:$0xff]  ;;  %v5508_v5 = vld [vmem:[#allocation5 + $0x150] sm:$0xff] }
  0x8d   : > { %7455 = vst [vmem:[#allocation69_spill] sm:$0xff] %v5281_v37  ;;  %7456 = vst [vmem:[#allocation70_spill] sm:$0xff] %v5284_v53  ;;  %v5306_v53 = vld [vmem:[%s5071_s15 + $0x120] sm:$0xff]  ;;  %v5506_v37 = vld [vmem:[#allocation5 + $0x148] sm:$0xff] }
  0x8e   : > { %7457 = vst [vmem:[#allocation71_spill] sm:$0xff] %v5287_v54  ;;  %7458 = vst [vmem:[#allocation72_spill] sm:$0xff] %v5290_v55  ;;  %v5309_v54 = vld [vmem:[%s5071_s15 + $0x128] sm:$0xff]  ;;  %v5452_v55 = vld [vmem:[#allocation5 + $0x70] sm:$0xff] }
  0x8f   : > { %7459 = vst [vmem:[#allocation73_spill] sm:$0xff] %v5293_v28  ;;  %7460 = vst [vmem:[#allocation74_spill] sm:$0xff] %v5296_v32  ;;  %v5316_v28 = vadd.s32 %v5148_v42, %v5095_v19  ;;  %v5328_v32 = vadd.s32 %v5148_v42, %v5113_v26  ;;  %v5510_v6 = vld [vmem:[#allocation5 + $0x158] sm:$0xff]  ;;  %v5522_v16 = vld [vmem:[#allocation5 + $0x188] sm:$0xff] }
  0x90   : > { %7461 = vst [vmem:[#allocation75_spill] sm:$0xff] %v5299_v36  ;;  %7462 = vst [vmem:[#allocation76_spill] sm:$0xff] %v5303_v39  ;;  %v5324_v36 = vadd.s32 %v5148_v42, %v5110_v25  ;;  %v5370_v42 = vadd.s32 %v5150_v43, %v5110_v25  ;;  %v5500_v39 = vld [vmem:[#allocation5 + $0x130] sm:$0xff]  ;;  %v5526_v14 = vld [vmem:[#allocation5 + $0x198] sm:$0xff] }
  0x91   : > { %7463 = vst [vmem:[#allocation77_spill] sm:$0xff] %v5306_v53  ;;  %7464 = vst [vmem:[#allocation78_spill] sm:$0xff] %v5309_v54  ;;  %v5395_v54 = vadd.s32 %v5167_v49, %v5083_v3  ;;  %v5418_v3 = vadd.s32 %v5167_v49, %v5113_v26  ;;  %v5456_v53 = vld [vmem:[#allocation5 + $0x80] sm:$0xff]  ;;  %v5524_v21 = vld [vmem:[#allocation5 + $0x190] sm:$0xff] }
  0x92   : > { %7465 = vst [vmem:[#allocation79_spill] sm:$0xff] %v5312_v22  ;;  %7466 = vst [vmem:[#allocation80_spill] sm:$0xff] %v5316_v28  ;;  %v5432_v22 = vld [vmem:[#allocation5 + $0x20] sm:$0xff]  ;;  %v5502_v28 = vld [vmem:[#allocation5 + $0x138] sm:$0xff] }
  0x93   : > { %7467 = vst [vmem:[#allocation81_spill] sm:$0xff] %v5320_v38  ;;  %7468 = vst [vmem:[#allocation82_spill] sm:$0xff] %v5324_v36  ;;  %v5486_v38 = vld [vmem:[#allocation5 + $0xf8] sm:$0xff]  ;;  %v5490_v36 = vld [vmem:[#allocation5 + $0x108] sm:$0xff] }
  0x94   : > { %7469 = vst [vmem:[#allocation83_spill] sm:$0xff] %v5328_v32  ;;  %7470 = vst [vmem:[#allocation84_spill] sm:$0xff] %v5331_v7  ;;  %v5353_v7 = vadd.s32 %v5150_v43, %v5095_v19  ;;  %v5362_v32 = vld [vmem:[%s5071_s15 + $0x160] sm:$0xff]  ;;  %v5528_v15 = vld [vmem:[#allocation5 + $0x1a0] sm:$0xff] }
  0x95   : > { %7471 = vst [vmem:[#allocation85_spill] sm:$0xff] %v5334_v23  ;;  %7472 = vst [vmem:[#allocation86_spill] sm:$0xff] %v5337_v18  ;;  %v5356_v23 = vld [vmem:[%s5071_s15 + $0x150] sm:$0xff]  ;;  %v5359_v18 = vld [vmem:[%s5071_s15 + $0x158] sm:$0xff] }
  0x96   : > { %7473 = vst [vmem:[#allocation87_spill] sm:$0xff] %v5341_v24  ;;  %7474 = vst [vmem:[#allocation88_spill] sm:$0xff] %v5345_v57  ;;  %v5366_v24 = vadd.s32 %v5150_v43, %v5098_v20  ;;  %v5374_v57 = vadd.s32 %v5150_v43, %v5113_v26  ;;  %v5414_v43 = vadd.s32 %v5167_v49, %v5110_v25  ;;  %v5434_v25 = vld [vmem:[#allocation5 + $0x28] sm:$0xff]  ;;  %v5438_v26 = vld [vmem:[#allocation5 + $0x38] sm:$0xff] }
  0x97   : > { %7475 = vst [vmem:[#allocation89_spill] sm:$0xff] %v5349_v1  ;;  %7476 = vst [vmem:[#allocation90_spill] sm:$0xff] %v5353_v7  ;;  %v5476_v1 = vld [vmem:[#allocation5 + $0xd0] sm:$0xff]  ;;  %v5482_v7 = vld [vmem:[#allocation5 + $0xe8] sm:$0xff] }
  0x98   : > { %7477 = vst [vmem:[#allocation91_spill] sm:$0xff] %v5356_v23  ;;  %7478 = vst [vmem:[#allocation92_spill] sm:$0xff] %v5359_v18  ;;  %v5381_v23 = vld [vmem:[%s5071_s15 + $0x168] sm:$0xff]  ;;  %v5384_v18 = vld [vmem:[%s5071_s15 + $0x170] sm:$0xff] }
  0x99   : > { %7479 = vst [vmem:[#allocation93_spill] sm:$0xff] %v5362_v32  ;;  %7480 = vst [vmem:[#allocation94_spill] sm:$0xff] %v5366_v24  ;;  %v5387_v32 = vld [vmem:[%s5071_s15 + $0x178] sm:$0xff]  ;;  %v5472_v24 = vld [vmem:[#allocation5 + $0xc0] sm:$0xff] }
  0x9a   : > { %7481 = vst [vmem:[#allocation95_spill] sm:$0xff] %v5370_v42  ;;  %7482 = vst [vmem:[#allocation96_spill] sm:$0xff] %v5374_v57  ;;  %v5399_v57 = vadd.s32 %v5167_v49, %v5095_v19  ;;  %v5422_v19 = vadd.s32 %v5167_v49, %v5116_v27  ;;  %v5442_v27 = vld [vmem:[#allocation5 + $0x48] sm:$0xff]  ;;  %v5532_v8 = vld [vmem:[#allocation5 + $0x1b0] sm:$0xff] }
  0x9b   : > { %7483 = vst [vmem:[#allocation97_spill] sm:$0xff] %v5378_v2  ;;  %7484 = vst [vmem:[#allocation98_spill] sm:$0xff] %v5381_v23  ;;  %v5403_v2 = vadd.s32 %v5167_v49, %v5098_v20  ;;  %v5406_v23 = vld [vmem:[%s5071_s15 + $0x180] sm:$0xff]  ;;  %v5426_v20 = vadd.s32 %v5167_v49, %v5128_v31  ;;  %v5448_v49 = vld [vmem:[#allocation5 + $0x60] sm:$0xff] }
  0x9c   : > { %7485 = vst [vmem:[#allocation99_spill] sm:$0xff] %v5384_v18  ;;  %7486 = vst [vmem:[#allocation100_spill] sm:$0xff] %v5387_v32  ;;  %v5408_v18 = vld [vmem:[#allocation5] sm:$0xff]  ;;  %v5410_v32 = vld [vmem:[#allocation5 + $0x8] sm:$0xff] }
  0x9d   : > { %7487 = vst [vmem:[#allocation101_spill] sm:$0xff] %v5391_v52  ;;  %7488 = vst [vmem:[#allocation102_spill] sm:$0xff] %v5395_v54  ;;  %v5430_v52 = vld [vmem:[#allocation5 + $0x18] sm:$0xff]  ;;  %v5464_v54 = vld [vmem:[#allocation5 + $0xa0] sm:$0xff] }
  0x9e   : > { %7489 = vst [vmem:[#allocation103_spill] sm:$0xff] %v5399_v57  ;;  %7490 = vst [vmem:[#allocation104_spill] sm:$0xff] %v5403_v2  ;;  %v5446_v31 = vld [vmem:[#allocation5 + $0x58] sm:$0xff]  ;;  %v5466_v57 = vld [vmem:[#allocation5 + $0xa8] sm:$0xff] }
  0x9f   : > { %7491 = vst [vmem:[#allocation105_spill] sm:$0xff] %v5406_v23  ;;  %7492 = vst [vmem:[#allocation106_spill] sm:$0xff] %v5408_v18  ;;  %v5428_v23 = vld [vmem:[#allocation5 + $0x10] sm:$0xff]  ;;  %v5454_v2 = vld [vmem:[#allocation5 + $0x78] sm:$0xff] }
  0xa0   : > { %7493 = vst [vmem:[#allocation107_spill] sm:$0xff] %v5410_v32  ;;  %7494 = vst [vmem:[#allocation108_spill] sm:$0xff] %v5414_v43  ;;  %v5458_v43 = vld [vmem:[#allocation5 + $0x88] sm:$0xff]  ;;  %v5534_v9 = vld [vmem:[#allocation5 + $0x1b8] sm:$0xff] }
  0xa1   : > { %7495 = vst [vmem:[#allocation109_spill] sm:$0xff] %v5418_v3  ;;  %7496 = vst [vmem:[#allocation110_spill] sm:$0xff] %v5422_v19  ;;  %v5440_v3 = vld [vmem:[#allocation5 + $0x40] sm:$0xff]  ;;  %v5444_v19 = vld [vmem:[#allocation5 + $0x50] sm:$0xff] }
  0xa2   : > { %7497 = vst [vmem:[#allocation111_spill] sm:$0xff] %v5426_v20  ;;  %7498 = vst [vmem:[#allocation112_spill] sm:$0xff] %v5428_v23  ;;  %v5450_v20 = vld [vmem:[#allocation5 + $0x68] sm:$0xff]  ;;  %v5536_v63 = vld [vmem:[#allocation5 + $0x1c0] sm:$0xff] }
  0xa3   : > { %7499 = vst [vmem:[#allocation113_spill] sm:$0xff] %v5430_v52  ;;  %7500 = vst [vmem:[#allocation114_spill] sm:$0xff] %v5432_v22  ;;  %v5474_v42 = vld [vmem:[#allocation5 + $0xc8] sm:$0xff]  ;;  %v5540_v58 = vld [vmem:[#allocation5 + $0x1d0] sm:$0xff] }
  0xa4   : > { %7501 = vst [vmem:[#allocation115_spill] sm:$0xff] %v5434_v25  ;;  %7502 = vst [vmem:[#allocation116_spill] sm:$0xff] %v5436_v56  ;;  %v5530_v17 = vld [vmem:[#allocation5 + $0x1a8] sm:$0xff]  ;;  %v5542_v59 = vld [vmem:[#allocation5 + $0x1d8] sm:$0xff] }
  0xa5   : > { %7503 = vst [vmem:[#allocation117_spill] sm:$0xff] %v5438_v26  ;;  %7504 = vst [vmem:[#allocation118_spill] sm:$0xff] %v5440_v3  ;;  %v5538_v0 = vld [vmem:[#allocation5 + $0x1c8] sm:$0xff]  ;;  %v5544_v50 = vld [vmem:[#allocation5 + $0x1e0] sm:$0xff]  ;;  %v5752_v3 = vmov 0.0  }
  0xa6   : > { %7505 = vst [vmem:[#allocation119_spill] sm:$0xff] %v5442_v27  ;;  %7506 = vst [vmem:[#allocation120_spill] sm:$0xff] %v5444_v19  ;;  %v5546_v51 = vld [vmem:[#allocation5 + $0x1e8] sm:$0xff]  ;;  %v5548_v44 = vld [vmem:[#allocation5 + $0x1f0] sm:$0xff]  ;;  %v5736_v19 = vmov 0.0   ;;  %v5750_v27 = vmov 0.0  }
  0xa7   : > { %7507 = vst [vmem:[#allocation121_spill] sm:$0xff] %v5446_v31  ;;  %7508 = vst [vmem:[#allocation122_spill] sm:$0xff] %v5448_v49  ;;  %v5550_v45 = vld [vmem:[#allocation5 + $0x1f8] sm:$0xff]  ;;  %v5720_v49 = vmov 0.0   ;;  %v5734_v31 = vmov 0.0  }
  0xa8   : > { %7509 = vst [vmem:[#allocation123_spill] sm:$0xff] %v5450_v20  ;;  %7510 = vst [vmem:[#allocation124_spill] sm:$0xff] %v5452_v55  ;;  %v5558_v55 = vld [vmem:[#allocation5 + $0x218] sm:$0xff]  ;;  %v5718_v20 = vmov 0.0  }
  0xa9   : > { %7511 = vst [vmem:[#allocation125_spill] sm:$0xff] %v5454_v2  ;;  %7512 = vst [vmem:[#allocation126_spill] sm:$0xff] %v5456_v53  ;;  %v5556_v2 = vld [vmem:[#allocation5 + $0x210] sm:$0xff] }
  0xaa   : > { %7513 = vst [vmem:[#allocation127_spill] sm:$0xff] %v5458_v43  ;;  %7514 = vst [vmem:[#allocation128_spill] sm:$0xff] %v5460_v33 }
  0xab   : > { %7515 = vst [vmem:[#allocation129_spill] sm:$0xff] %v5462_v11  ;;  %7516 = vst [vmem:[#allocation130_spill] sm:$0xff] %v5464_v54 }
  0xac   : > { %7517 = vst [vmem:[#allocation131_spill] sm:$0xff] %v5466_v57  ;;  %7518 = vst [vmem:[#allocation132_spill] sm:$0xff] %v5468_v12 }
  0xad   : > { %7519 = vst [vmem:[#allocation133_spill] sm:$0xff] %v5470_v13  ;;  %7520 = vst [vmem:[#allocation134_spill] sm:$0xff] %v5472_v24  ;;  %v5760_v24 = vmov 0.0  }
  0xae   : > { %7521 = vst [vmem:[#allocation135_spill] sm:$0xff] %v5474_v42  ;;  %7522 = vst [vmem:[#allocation136_spill] sm:$0xff] %v5476_v1  ;;  %v5744_v1 = vmov 0.0   ;;  %v5758_v42 = vmov 0.0  }
  0xaf   : > { %7523 = vst [vmem:[#allocation137_spill] sm:$0xff] %v5478_v62  ;;  %7524 = vst [vmem:[#allocation138_spill] sm:$0xff] %v5480_v4  ;;  %v5728_v4 = vmov 0.0   ;;  %v5742_v62 = vmov 0.0  }
  0xb0   : > { %7525 = vst [vmem:[#allocation139_spill] sm:$0xff] %v5482_v7  ;;  %7526 = vst [vmem:[#allocation140_spill] sm:$0xff] %v5484_v60  ;;  %v5566_v60 = vld [vmem:[#allocation5 + $0x238] sm:$0xff]  ;;  %v5726_v7 = vmov 0.0  }
  0xb1   : > { %7527 = vst [vmem:[#allocation141_spill] sm:$0xff] %v5486_v38  ;;  %7528 = vst [vmem:[#allocation142_spill] sm:$0xff] %v5488_v61  ;;  %v5564_v38 = vld [vmem:[#allocation5 + $0x230] sm:$0xff] }
  0xb2   : > { %7529 = vst [vmem:[#allocation143_spill] sm:$0xff] %v5490_v36  ;;  %7530 = vst [vmem:[#allocation144_spill] sm:$0xff] %v5492_v47 }
  0xb3   : > { %7531 = vst [vmem:[#allocation145_spill] sm:$0xff] %v5494_v48  ;;  %7532 = vst [vmem:[#allocation146_spill] sm:$0xff] %v5496_v41 }
  0xb4   : > { %7533 = vst [vmem:[#allocation147_spill] sm:$0xff] %v5498_v46  ;;  %7534 = vst [vmem:[#allocation148_spill] sm:$0xff] %v5500_v39  ;;  %v5756_v39 = vmov 0.0  }
  0xb5   : > { %7535 = vst [vmem:[#allocation149_spill] sm:$0xff] %v5502_v28  ;;  %7536 = vst [vmem:[#allocation150_spill] sm:$0xff] %v5504_v40  ;;  %v5740_v40 = vmov 0.0   ;;  %v5754_v28 = vmov 0.0  }
  0xb6   : > { %7537 = vst [vmem:[#allocation151_spill] sm:$0xff] %v5506_v37  ;;  %7538 = vst [vmem:[#allocation152_spill] sm:$0xff] %v5508_v5  ;;  %v5724_v5 = vmov 0.0   ;;  %v5738_v37 = vmov 0.0  }
  0xb7   : > { %7539 = vst [vmem:[#allocation153_spill] sm:$0xff] %v5510_v6  ;;  %7540 = vst [vmem:[#allocation154_spill] sm:$0xff] %v5512_v34  ;;  %v5562_v34 = vld [vmem:[#allocation5 + $0x228] sm:$0xff]  ;;  %v5722_v6 = vmov 0.0  }
  0xb8   : > { %7541 = vst [vmem:[#allocation155_spill] sm:$0xff] %v5514_v35  ;;  %7542 = vst [vmem:[#allocation156_spill] sm:$0xff] %v5516_v10  ;;  %v5554_v10 = vld [vmem:[#allocation5 + $0x208] sm:$0xff]  ;;  %v5560_v35 = vld [vmem:[#allocation5 + $0x220] sm:$0xff] }
  0xb9   : > { %7543 = vst [vmem:[#allocation157_spill] sm:$0xff] %v5518_v29  ;;  %7544 = vst [vmem:[#allocation158_spill] sm:$0xff] %v5520_v30  ;;  %v5552_v29 = vld [vmem:[#allocation5 + $0x200] sm:$0xff] }
  0xba   : > { %7545 = vst [vmem:[#allocation159_spill] sm:$0xff] %v5522_v16  ;;  %7546 = vst [vmem:[#allocation160_spill] sm:$0xff] %v5524_v21 }
  0xbb   : > { %7547 = vst [vmem:[#allocation161_spill] sm:$0xff] %v5526_v14  ;;  %7548 = vst [vmem:[#allocation162_spill] sm:$0xff] %v5528_v15 }
  0xbc   : > { %7549 = vst [vmem:[#allocation163_spill] sm:$0xff] %v5530_v17  ;;  %7550 = vst [vmem:[#allocation164_spill] sm:$0xff] %v5532_v8 }
  0xbd   : > { %7551 = vst [vmem:[#allocation165_spill] sm:$0xff] %v5534_v9  ;;  %7552 = vst [vmem:[#allocation166_spill] sm:$0xff] %v5536_v63  ;;  %v5748_v63 = vmov 0.0   ;;  %v5762_v9 = vmov 0.0  }
  0xbe   : > { %7553 = vst [vmem:[#allocation167_spill] sm:$0xff] %v5538_v0  ;;  %7554 = vst [vmem:[#allocation168_spill] sm:$0xff] %v5540_v58  ;;  %v5732_v58 = vmov 0.0   ;;  %v5746_v0 = vmov 0.0  }
  0xbf   : > { %7555 = vst [vmem:[#allocation169_spill] sm:$0xff] %v5542_v59  ;;  %7556 = vst [vmem:[#allocation170_spill] sm:$0xff] %v5544_v50  ;;  %v5716_v50 = vmov 0.0   ;;  %v5730_v59 = vmov 0.0  }
  0xc0   : > { %7557 = vst [vmem:[#allocation171_spill] sm:$0xff] %v5546_v51  ;;  %7558 = vst [vmem:[#allocation172_spill] sm:$0xff] %v5548_v44  ;;  %v5568_v51 = vld [vmem:[#allocation5 + $0x240] sm:$0xff]  ;;  %v5570_v44 = vld [vmem:[#allocation5 + $0x248] sm:$0xff] }
  0xc1   : > { %7559 = vst [vmem:[#allocation173_spill] sm:$0xff] %v5550_v45  ;;  %7560 = vst [vmem:[#allocation174_spill] sm:$0xff] %v5552_v29  ;;  %v5572_v45 = vld [vmem:[#allocation5 + $0x250] sm:$0xff]  ;;  %v5574_v29 = vld [vmem:[#allocation5 + $0x258] sm:$0xff] }
  0xc2   : > { %7561 = vst [vmem:[#allocation175_spill] sm:$0xff] %v5554_v10  ;;  %7562 = vst [vmem:[#allocation176_spill] sm:$0xff] %v5556_v2  ;;  %v5576_v10 = vld [vmem:[#allocation5 + $0x260] sm:$0xff]  ;;  %v5578_v2 = vld [vmem:[#allocation5 + $0x268] sm:$0xff] }
  0xc3   : > { %7563 = vst [vmem:[#allocation177_spill] sm:$0xff] %v5558_v55  ;;  %7564 = vst [vmem:[#allocation178_spill] sm:$0xff] %v5560_v35  ;;  %v5580_v55 = vld [vmem:[#allocation5 + $0x270] sm:$0xff]  ;;  %v5582_v35 = vld [vmem:[#allocation5 + $0x278] sm:$0xff] }
  0xc4   : > { %7565 = vst [vmem:[#allocation179_spill] sm:$0xff] %v5562_v34  ;;  %7566 = vst [vmem:[#allocation180_spill] sm:$0xff] %v5564_v38  ;;  %v5584_v34 = vld [vmem:[#allocation5 + $0x280] sm:$0xff]  ;;  %v5586_v38 = vld [vmem:[#allocation5 + $0x288] sm:$0xff] }
  0xc5   : > { %7567 = vst [vmem:[#allocation181_spill] sm:$0xff] %v5566_v60  ;;  %7568 = vst [vmem:[#allocation182_spill] sm:$0xff] %v5568_v51  ;;  %v5588_v60 = vld [vmem:[#allocation5 + $0x290] sm:$0xff]  ;;  %v5590_v51 = vld [vmem:[#allocation5 + $0x298] sm:$0xff] }
  0xc6   : > { %7569 = vst [vmem:[#allocation183_spill] sm:$0xff] %v5570_v44  ;;  %7570 = vst [vmem:[#allocation184_spill] sm:$0xff] %v5572_v45  ;;  %v5592_v44 = vld [vmem:[#allocation5 + $0x2a0] sm:$0xff]  ;;  %v5594_v45 = vld [vmem:[#allocation5 + $0x2a8] sm:$0xff] }
  0xc7   : > { %7571 = vst [vmem:[#allocation185_spill] sm:$0xff] %v5574_v29  ;;  %7572 = vst [vmem:[#allocation186_spill] sm:$0xff] %v5576_v10  ;;  %v5596_v29 = vld [vmem:[#allocation5 + $0x2b0] sm:$0xff]  ;;  %v5598_v10 = vld [vmem:[#allocation5 + $0x2b8] sm:$0xff] }
  0xc8   : > { %7573 = vst [vmem:[#allocation187_spill] sm:$0xff] %v5578_v2  ;;  %7574 = vst [vmem:[#allocation188_spill] sm:$0xff] %v5580_v55  ;;  %v5600_v2 = vld [vmem:[#allocation5 + $0x2c0] sm:$0xff]  ;;  %v5602_v55 = vld [vmem:[#allocation5 + $0x2c8] sm:$0xff] }
  0xc9   : > { %7575 = vst [vmem:[#allocation189_spill] sm:$0xff] %v5582_v35  ;;  %7576 = vst [vmem:[#allocation190_spill] sm:$0xff] %v5584_v34  ;;  %v5604_v35 = vld [vmem:[#allocation5 + $0x2d0] sm:$0xff]  ;;  %v5606_v34 = vld [vmem:[#allocation5 + $0x2d8] sm:$0xff] }
  0xca   : > { %7577 = vst [vmem:[#allocation191_spill] sm:$0xff] %v5586_v38  ;;  %7578 = vst [vmem:[#allocation192_spill] sm:$0xff] %v5588_v60  ;;  %v5608_v38 = vld [vmem:[#allocation5 + $0x2e0] sm:$0xff]  ;;  %v5610_v60 = vld [vmem:[#allocation5 + $0x2e8] sm:$0xff] }
  0xcb   : > { %7579 = vst [vmem:[#allocation193_spill] sm:$0xff] %v5590_v51  ;;  %7580 = vst [vmem:[#allocation194_spill] sm:$0xff] %v5592_v44  ;;  %v5612_v51 = vld [vmem:[#allocation5 + $0x2f0] sm:$0xff]  ;;  %v5614_v44 = vld [vmem:[#allocation5 + $0x2f8] sm:$0xff] }
  0xcc   : > { %7581 = vst [vmem:[#allocation195_spill] sm:$0xff] %v5594_v45  ;;  %7582 = vst [vmem:[#allocation196_spill] sm:$0xff] %v5596_v29  ;;  %v5616_v45 = vld [vmem:[#allocation5 + $0x300] sm:$0xff]  ;;  %v5618_v29 = vld [vmem:[#allocation5 + $0x308] sm:$0xff] }
  0xcd   : > { %7583 = vst [vmem:[#allocation197_spill] sm:$0xff] %v5598_v10  ;;  %7584 = vst [vmem:[#allocation198_spill] sm:$0xff] %v5600_v2  ;;  %v5620_v10 = vld [vmem:[#allocation5 + $0x310] sm:$0xff]  ;;  %v5622_v2 = vld [vmem:[#allocation5 + $0x318] sm:$0xff] }
  0xce   : > { %7585 = vst [vmem:[#allocation199_spill] sm:$0xff] %v5602_v55  ;;  %7586 = vst [vmem:[#allocation200_spill] sm:$0xff] %v5604_v35  ;;  %v5624_v55 = vld [vmem:[#allocation5 + $0x320] sm:$0xff]  ;;  %v5626_v35 = vld [vmem:[#allocation5 + $0x328] sm:$0xff] }
  0xcf   : > { %7587 = vst [vmem:[#allocation201_spill] sm:$0xff] %v5606_v34  ;;  %7588 = vst [vmem:[#allocation202_spill] sm:$0xff] %v5608_v38  ;;  %v5628_v34 = vld [vmem:[#allocation5 + $0x330] sm:$0xff]  ;;  %v5630_v38 = vld [vmem:[#allocation5 + $0x338] sm:$0xff] }
  0xd0   : > { %7589 = vst [vmem:[#allocation203_spill] sm:$0xff] %v5610_v60  ;;  %7590 = vst [vmem:[#allocation204_spill] sm:$0xff] %v5612_v51  ;;  %v5632_v60 = vld [vmem:[#allocation5 + $0x340] sm:$0xff]  ;;  %v5634_v51 = vld [vmem:[#allocation5 + $0x348] sm:$0xff] }
  0xd1   : > { %7591 = vst [vmem:[#allocation205_spill] sm:$0xff] %v5614_v44  ;;  %7592 = vst [vmem:[#allocation206_spill] sm:$0xff] %v5616_v45  ;;  %v5636_v44 = vld [vmem:[#allocation5 + $0x350] sm:$0xff]  ;;  %v5638_v45 = vld [vmem:[#allocation5 + $0x358] sm:$0xff] }
  0xd2   : > { %7593 = vst [vmem:[#allocation207_spill] sm:$0xff] %v5618_v29  ;;  %7594 = vst [vmem:[#allocation208_spill] sm:$0xff] %v5620_v10  ;;  %v5640_v29 = vld [vmem:[#allocation5 + $0x360] sm:$0xff]  ;;  %v5642_v10 = vld [vmem:[#allocation5 + $0x368] sm:$0xff] }
  0xd3   : > { %7595 = vst [vmem:[#allocation209_spill] sm:$0xff] %v5622_v2  ;;  %7596 = vst [vmem:[#allocation210_spill] sm:$0xff] %v5624_v55  ;;  %v5644_v2 = vld [vmem:[#allocation5 + $0x370] sm:$0xff]  ;;  %v5646_v55 = vld [vmem:[#allocation5 + $0x378] sm:$0xff] }
  0xd4   : > { %7597 = vst [vmem:[#allocation211_spill] sm:$0xff] %v5626_v35  ;;  %7598 = vst [vmem:[#allocation212_spill] sm:$0xff] %v5628_v34  ;;  %v5648_v35 = vld [vmem:[#allocation7] sm:$0xff]  ;;  %v5650_v34 = vld [vmem:[#allocation7 + $0x8] sm:$0xff] }
  0xd5   : > { %7599 = vst [vmem:[#allocation213_spill] sm:$0xff] %v5630_v38  ;;  %7600 = vst [vmem:[#allocation214_spill] sm:$0xff] %v5632_v60  ;;  %v5652_v38 = vld [vmem:[#allocation7 + $0x10] sm:$0xff]  ;;  %v5674_v60 = vld [vmem:[#allocation7 + $0x68] sm:$0xff] }
  0xd6   : > { %7601 = vst [vmem:[#allocation215_spill] sm:$0xff] %v5634_v51  ;;  %7602 = vst [vmem:[#allocation216_spill] sm:$0xff] %v5636_v44  ;;  %v5654_v51 = vld [vmem:[#allocation7 + $0x18] sm:$0xff]  ;;  %v5656_v44 = vld [vmem:[#allocation7 + $0x20] sm:$0xff] }
  0xd7   : > { %7603 = vst [vmem:[#allocation217_spill] sm:$0xff] %v5638_v45  ;;  %7604 = vst [vmem:[#allocation218_spill] sm:$0xff] %v5640_v29  ;;  %v5658_v45 = vld [vmem:[#allocation7 + $0x28] sm:$0xff]  ;;  %v5660_v29 = vld [vmem:[#allocation7 + $0x30] sm:$0xff] }
  0xd8   : > { %7605 = vst [vmem:[#allocation219_spill] sm:$0xff] %v5642_v10  ;;  %7606 = vst [vmem:[#allocation220_spill] sm:$0xff] %v5644_v2  ;;  %v5662_v10 = vld [vmem:[#allocation7 + $0x38] sm:$0xff]  ;;  %v5664_v2 = vld [vmem:[#allocation7 + $0x40] sm:$0xff] }
  0xd9   : > { %7607 = vst [vmem:[#allocation221_spill] sm:$0xff] %v5646_v55  ;;  %7608 = vst [vmem:[#allocation222_spill] sm:$0xff] %v5648_v35  ;;  %v5666_v55 = vld [vmem:[#allocation7 + $0x48] sm:$0xff]  ;;  %v5668_v35 = vld [vmem:[#allocation7 + $0x50] sm:$0xff] }
  0xda   : > { %7609 = vst [vmem:[#allocation223_spill] sm:$0xff] %v5650_v34  ;;  %7610 = vst [vmem:[#allocation224_spill] sm:$0xff] %v5652_v38  ;;  %v5670_v34 = vld [vmem:[#allocation7 + $0x58] sm:$0xff]  ;;  %v5672_v38 = vld [vmem:[#allocation7 + $0x60] sm:$0xff] }
  0xdb   : > { %7611 = vst [vmem:[#allocation225_spill] sm:$0xff] %v5654_v51  ;;  %7612 = vst [vmem:[#allocation226_spill] sm:$0xff] %v5656_v44  ;;  %v5676_v51 = vld [vmem:[#allocation7 + $0x70] sm:$0xff]  ;;  %v5678_v44 = vld [vmem:[#allocation7 + $0x78] sm:$0xff] }
  0xdc   : > { %7613 = vst [vmem:[#allocation227_spill] sm:$0xff] %v5658_v45  ;;  %7614 = vst [vmem:[#allocation228_spill] sm:$0xff] %v5660_v29  ;;  %v5712_v29 = vmov 0.0   ;;  %v5714_v45 = vmov 0.0  }
  0xdd   : > { %7615 = vst [vmem:[#allocation229_spill] sm:$0xff] %v5662_v10  ;;  %7616 = vst [vmem:[#allocation230_spill] sm:$0xff] %v5664_v2  ;;  %v5683_v10 = vld [vmem:[%s7251_s2] ss:$0 sm:$0xff]  ;;  %v5708_v2 = vmov 0.0  }
  0xde   : > { %7617 = vst [vmem:[#allocation231_spill] sm:$0xff] %v5666_v55  ;;  %7618 = vst [vmem:[#allocation232_spill] sm:$0xff] %v5668_v35  ;;  %v5688_v55 = vld [vmem:[%s7253_s4] ss:$0 sm:$0xff]  ;;  %v5704_v35 = vmov 0.0  }
  0xdf   : > { %7619 = vst [vmem:[#allocation233_spill] sm:$0xff] %v5670_v34  ;;  %7620 = vst [vmem:[#allocation234_spill] sm:$0xff] %v5672_v38  ;;  %v5694_v38 = vmov 0.0   ;;  %v5702_v34 = vmov 0.0  }
  0xe0   : > { %7621 = vst [vmem:[#allocation235_spill] sm:$0xff] %v5674_v60  ;;  %7622 = vst [vmem:[#allocation236_spill] sm:$0xff] %v5676_v51  ;;  %v5696_v60 = vmov 0.0   ;;  %v5698_v51 = vmov 0.0  }
  0xe1   : > { %7623 = vst [vmem:[#allocation237_spill] sm:$0xff] %v5678_v44  ;;  %7624 = vst [vmem:[#allocation238_spill] sm:$0xff] %v5683_v10  ;;  %v5700_v44 = vmov 0.0   ;;  %v5706_v10 = vmov 0.0  }
  0xe2   : > { %7625 = vst [vmem:[#allocation239_spill] sm:$0xff] %v5688_v55  ;;  %v5710_v55 = vmov 0.0  }
  0xe3 LB: >> { %7626 = vst [vmem:[#allocation240_spill] sm:$0xff] %v4709_v38  ;;  %7627 = vst [vmem:[#allocation241_spill] sm:$0xff] %v4713_v60  ;;  %v7661_v53 = vld [vmem:[#allocation126_spill] sm:$0xff]  ;;  %v7662_v43 = vld [vmem:[#allocation127_spill] sm:$0xff]  ;;  %s588_s16 = smul.u32 2246822507, %s4849_s6  ;;  %s4849_s6 = sphi %s5764_s6, %s8135_s6   ;;  %v4845_v9 = vphi %v5762_v9, %v6935_v9   ;;  %v4841_v24 = vphi %v5760_v24, %v6943_v24   ;;  %v4837_v42 = vphi %v5758_v42, %v8134_v42   ;;  %v4833_v39 = vphi %v5756_v39, %v6963_v39   ;;  %v4829_v28 = vphi %v5754_v28, %v8133_v28   ;;  %v4825_v3 = vphi %v5752_v3, %v6983_v3   ;;  %v4821_v27 = vphi %v5750_v27, %v6993_v27   ;;  %v4817_v63 = vphi %v5748_v63, %v8132_v63   ;;  %v4813_v0 = vphi %v5746_v0, %v6949_v0   ;;  %v4809_v1 = vphi %v5744_v1, %v6959_v1   ;;  %v4805_v62 = vphi %v5742_v62, %v6969_v62   ;;  %v4801_v40 = vphi %v5740_v40, %v8131_v40   ;;  %v4797_v37 = vphi %v5738_v37, %v6989_v37   ;;  %v4793_v19 = vphi %v5736_v19, %v6999_v19   ;;  %v4789_v31 = vphi %v5734_v31, %v7032_v31   ;;  %v4785_v58 = vphi %v5732_v58, %v7046_v58   ;;  %v4781_v59 = vphi %v5730_v59, %v7058_v59   ;;  %v4777_v4 = vphi %v5728_v4, %v2610_v4   ;;  %v4773_v7 = vphi %v5726_v7, %v8130_v7   ;;  %v4769_v5 = vphi %v5724_v5, %v2612_v5   ;;  %v4765_v6 = vphi %v5722_v6, %v2613_v6   ;;  %v4761_v49 = vphi %v5720_v49, %v8129_v49   ;;  %v4757_v20 = vphi %v5718_v20, %v7053_v20   ;;  %v4753_v50 = vphi %v5716_v50, %v8128_v50   ;;  %v4749_v45 = vphi %v5714_v45, %v8127_v45   ;;  %v4745_v29 = vphi %v5712_v29, %v3118_v29   ;;  %v4741_v55 = vphi %v5710_v55, %v8126_v55   ;;  %v4737_v2 = vphi %v5708_v2, %v3120_v2   ;;  %v4733_v10 = vphi %v5706_v10, %v8125_v10   ;;  %v4729_v35 = vphi %v5704_v35, %v8124_v35   ;;  %v4725_v34 = vphi %v5702_v34, %v8123_v34   ;;  %v4721_v44 = vphi %v5700_v44, %v8122_v44   ;;  %v4717_v51 = vphi %v5698_v51, %v8121_v51   ;;  %v4713_v60 = vphi %v5696_v60, %v8120_v60   ;;  %v4709_v38 = vphi %v5694_v38, %v8119_v38  }
  0xe4   : >> { %7628 = vst [vmem:[#allocation242_spill] sm:$0xff] %v4717_v51  ;;  %7629 = vst [vmem:[#allocation243_spill] sm:$0xff] %v4721_v44  ;;  %v5876_v38 = vpack.c.bf16 %v7662_v43, %v7661_v53  ;;  %v7664_v18 = vld [vmem:[#allocation106_spill] sm:$0xff]  ;;  %v7665_v32 = vld [vmem:[#allocation107_spill] sm:$0xff]  ;;  %s552_s9 = sadd.s32 1, %s4849_s6  }
  0xe5   : >> { %7630 = vst [vmem:[#allocation244_spill] sm:$0xff] %v4725_v34  ;;  %7631 = vst [vmem:[#allocation245_spill] sm:$0xff] %v4729_v35  ;;  %v5880_v60 = vpack.c.bf16 %v7665_v32, %v7664_v18  ;;  %v7667_v30 = vld [vmem:[#allocation158_spill] sm:$0xff]  ;;  %v7668_v16 = vld [vmem:[#allocation159_spill] sm:$0xff]  ;;  %s589_s10 = sadd.s32 625341585, %s588_s16  ;;  %s8135_s6 = smov %s552_s9 }
  0xe6   : >> { %7632 = vst [vmem:[#allocation246_spill] sm:$0xff] %v4733_v10  ;;  %7633 = vst [vmem:[#allocation247_spill] sm:$0xff] %v4737_v2  ;;  %v5884_v51 = vpack.c.bf16 %v7668_v16, %v7667_v30  ;;  %v7670_v33 = vld [vmem:[#allocation128_spill] sm:$0xff]  ;;  %v7671_v11 = vld [vmem:[#allocation129_spill] sm:$0xff]  ;;  %3748 = vmatprep.subr.bf16.mxu0 %v5876_v38  ;;  %s590_s12 = sshrl.u32 %s589_s10, 16  ;;  %p7084_p11 = scmp.ge.s32.totalorder %s552_s9, 10  }
  0xe7   : >> { %7634 = vst [vmem:[#allocation248_spill] sm:$0xff] %v4741_v55  ;;  %7635 = vst [vmem:[#allocation249_spill] sm:$0xff] %v4745_v29  ;;  %v5888_v44 = vpack.c.bf16 %v7671_v11, %v7670_v33  ;;  %v7673_v61 = vld [vmem:[#allocation142_spill] sm:$0xff]  ;;  %v7674_v36 = vld [vmem:[#allocation143_spill] sm:$0xff]  ;;  %3750 = vmatpush3.bf16.msra.mxu0 %v5880_v60  ;;  %s591_s13 = sxor.u32 %s590_s12, %s589_s10  ;;  %s3124_s28 = smul.u32 (%p7084_p11), 896, %s4916_s22 }
  0xe8   : >> { %7636 = vst [vmem:[#allocation250_spill] sm:$0xff] %v4749_v45  ;;  %7637 = vst [vmem:[#allocation251_spill] sm:$0xff] %v4753_v50  ;;  %v5892_v34 = vpack.c.bf16 %v7674_v36, %v7673_v61  ;;  %v7676_v21 = vld [vmem:[#allocation160_spill] sm:$0xff]  ;;  %v7677_v14 = vld [vmem:[#allocation161_spill] sm:$0xff]  ;;  %3780 = vmatprep.subr.bf16.mxu1 %v5884_v51  ;;  %s592_s17 = smul.u32 2146121005, %s591_s13 }
  0xe9   : >> { %7638 = vst [vmem:[#allocation252_spill] sm:$0xff] %v4757_v20  ;;  %7639 = vst [vmem:[#allocation253_spill] sm:$0xff] %v4761_v49  ;;  %v5896_v43 = vpack.c.bf16 %v7677_v14, %v7676_v21  ;;  %v7679_v23 = vld [vmem:[#allocation112_spill] sm:$0xff]  ;;  %v7680_v52 = vld [vmem:[#allocation113_spill] sm:$0xff]  ;;  %3752 = vmatprep.subr.bf16.mxu0 %v5888_v44  ;;  %s2670_s6 = sshll.u32 (%p7084_p11), %s5692_s30, 4  ;;  %s7203_s12 = scalar_lea.hbm (%p7084_p11), %s7254_s5, %s3124_s28  ;;  %s7205_s6 = int_to_ptr.vmem [resolvable:$true] %s2670_s6 }
  0xea   : >> { %7640 = vst [vmem:[#allocation254_spill] sm:$0xff] %v4765_v6  ;;  %7641 = vst [vmem:[#allocation255_spill] sm:$0xff] %v4769_v5  ;;  %v5902_v16 = vpack.c.bf16 %v7680_v52, %v7679_v23  ;;  %v7682_v54 = vld [vmem:[#allocation130_spill] sm:$0xff]  ;;  %v7683_v57 = vld [vmem:[#allocation131_spill] sm:$0xff]  ;;  %3782 = vmatpush3.bf16.msra.mxu1 %v5892_v34  ;;  %s593_s7 = sshrl.u32 %s592_s17, 15  ;;  %s2657_s13 = scalar_lea.sflag (%p7084_p11), [#allocation4], %s5067_s29 }
  0xeb   : >> { %7642 = vst [vmem:[#allocation256_spill] sm:$0xff] %v4773_v7  ;;  %7643 = vst [vmem:[#allocation257_spill] sm:$0xff] %v4777_v4  ;;  %v5906_v11 = vpack.c.bf16 %v7683_v57, %v7682_v54  ;;  %v7685_v47 = vld [vmem:[#allocation144_spill] sm:$0xff]  ;;  %v7686_v48 = vld [vmem:[#allocation145_spill] sm:$0xff]  ;;  %3784 = vmatprep.subr.bf16.mxu1 %v5896_v43  ;;  %s594_s15 = sxor.u32 %s593_s7, %s592_s17  ;;  %s4491_s17 = scalar_lea.vmem (%p7084_p11), %s7205_s6, 896 }
  0xec   : >> { %7644 = vst [vmem:[#allocation258_spill] sm:$0xff] %v4781_v59  ;;  %7645 = vst [vmem:[#allocation259_spill] sm:$0xff] %v4785_v58  ;;  %v5910_v18 = vpack.c.bf16 %v7686_v48, %v7685_v47  ;;  %v7688_v22 = vld [vmem:[#allocation114_spill] sm:$0xff]  ;;  %v7689_v25 = vld [vmem:[#allocation115_spill] sm:$0xff]  ;;  %3754 = vmatpush3.bf16.msra.mxu0 %v5902_v16  ;;  %s595_s26 = smul.u32 2221713035, %s594_s15  ;;  %p4492_p0 = scmp.ne.s32.totalorder (%p7084_p11), %s7205_s6, %s4491_s17 }
  0xed   : >> { %7646 = vst [vmem:[#allocation260_spill] sm:$0xff] %v4789_v31  ;;  %7647 = vst [vmem:[#allocation261_spill] sm:$0xff] %v4793_v19  ;;  %v5917_v14 = vpack.c.bf16 %v7689_v25, %v7688_v22  ;;  %v7691_v15 = vld [vmem:[#allocation162_spill] sm:$0xff]  ;;  %v7692_v17 = vld [vmem:[#allocation163_spill] sm:$0xff]  ;;  %3756 = vmatprep.subr.bf16.mxu0 %v5906_v11  ;;  %p8136_p1 = scmp.ne.s32.totalorder (%p7084_p11), %s7393_s27, 0  ;;  %s4862_s22 = smov (%p7084_p11), [#allocation8]  }
  0xee   : >> { %7648 = vst [vmem:[#allocation262_spill] sm:$0xff] %v4797_v37  ;;  %7649 = vst [vmem:[#allocation263_spill] sm:$0xff] %v4801_v40  ;;  %v5921_v21 = vpack.c.bf16 %v7692_v17, %v7691_v15  ;;  %v7694_v12 = vld [vmem:[#allocation132_spill] sm:$0xff]  ;;  %v7695_v13 = vld [vmem:[#allocation133_spill] sm:$0xff]  ;;  %3786 = vmatpush3.bf16.msra.mxu1 %v5910_v18  ;;  %s596_s8 = sshrl.u32 %s595_s26, 16  ;;  %s4495_s7 = sshll.u32 (%p7084_p11), %s4862_s22, 4  ;;  %s4496_s7 = int_to_ptr.vmem [resolvable:$false] %s4495_s7 }
  0xef   : >> { %7650 = vst [vmem:[#allocation264_spill] sm:$0xff] %v4805_v62  ;;  %7651 = vst [vmem:[#allocation265_spill] sm:$0xff] %v4809_v1  ;;  %v5925_v23 = vpack.c.bf16 %v7695_v13, %v7694_v12  ;;  %v7697_v41 = vld [vmem:[#allocation146_spill] sm:$0xff]  ;;  %v7698_v46 = vld [vmem:[#allocation147_spill] sm:$0xff]  ;;  %s597_s24 = sxor.u32 %s596_s8, %s595_s26  ;;  %p4493_p3 = pnand (%p7084_p11), %p4492_p0, %p8136_p1 }
  0xf0   : >> { %7652 = vst [vmem:[#allocation266_spill] sm:$0xff] %v4813_v0  ;;  %7653 = vst [vmem:[#allocation267_spill] sm:$0xff] %v4817_v63  ;;  %v5931_v30 = vpack.c.bf16 %v7698_v46, %v7697_v41  ;;  %v7700_v56 = vld [vmem:[#allocation116_spill] sm:$0xff]  ;;  %v7701_v26 = vld [vmem:[#allocation117_spill] sm:$0xff]  ;;  %3788 = vmatprep.subr.bf16.mxu1 %v5921_v21  ;;  %3758 = vmatpush3.bf16.msra.mxu0 %v5917_v14  ;;  %p4498_p7 = scmp.lt.s32.totalorder (%p7084_p11), %s7205_s6, %s4496_s7 }
  0xf1   : >> { %7654 = vst [vmem:[#allocation268_spill] sm:$0xff] %v4821_v27  ;;  %7655 = vst [vmem:[#allocation269_spill] sm:$0xff] %v4825_v3  ;;  %v5935_v22 = vpack.c.bf16 %v7701_v26, %v7700_v56  ;;  %v7703_v8 = vld [vmem:[#allocation164_spill] sm:$0xff]  ;;  %v7704_v25 = vld [vmem:[#allocation165_spill] sm:$0xff]  ;;  %3760 = vmatprep.subr.bf16.mxu0 %v5925_v23  ;;  %p4494_p5 = pneg (%p7084_p11), %p4493_p3 }
  0xf2   : >> { %7656 = vst [vmem:[#allocation270_spill] sm:$0xff] %v4829_v28  ;;  %7657 = vst [vmem:[#allocation271_spill] sm:$0xff] %v4833_v39  ;;  %v5939_v15 = vpack.c.bf16 %v7704_v25, %v7703_v8  ;;  %v7706_v17 = vld [vmem:[#allocation134_spill] sm:$0xff]  ;;  %v7707_v12 = vld [vmem:[#allocation135_spill] sm:$0xff]  ;;  %3790 = vmatpush3.bf16.msra.mxu1 %v5931_v30 }
  0xf3   : >> { %7658 = vst [vmem:[#allocation272_spill] sm:$0xff] %v4837_v42  ;;  %7659 = vst [vmem:[#allocation273_spill] sm:$0xff] %v4841_v24  ;;  %v5943_v13 = vpack.c.bf16 %v7707_v12, %v7706_v17  ;;  %v7709_v32 = vld [vmem:[#allocation148_spill] sm:$0xff]  ;;  %v7710_v33 = vld [vmem:[#allocation149_spill] sm:$0xff] }
  0xf4   : >> { %7660 = vst [vmem:[#allocation274_spill] sm:$0xff] %v4845_v9  ;;  %7663 = vst [vmem:[#allocation275_spill] sm:$0xff] %v5876_v38  ;;  %v5947_v36 = vpack.c.bf16 %v7710_v33, %v7709_v32  ;;  %v7712_v47 = vld [vmem:[#allocation118_spill] sm:$0xff]  ;;  %v7713_v41 = vld [vmem:[#allocation119_spill] sm:$0xff]  ;;  %3792 = vmatprep.subr.bf16.mxu1 %v5939_v15  ;;  %3762 = vmatpush3.bf16.msra.mxu0 %v5935_v22 }
  0xf5   : >> { %7666 = vst [vmem:[#allocation276_spill] sm:$0xff] %v5880_v60  ;;  %7669 = vst [vmem:[#allocation277_spill] sm:$0xff] %v5884_v51  ;;  %v5951_v46 = vpack.c.bf16 %v7713_v41, %v7712_v47  ;;  %v7715_v48 = vld [vmem:[#allocation166_spill] sm:$0xff]  ;;  %v7716_v26 = vld [vmem:[#allocation167_spill] sm:$0xff]  ;;  %3764 = vmatprep.subr.bf16.mxu0 %v5943_v13 }
  0xf6   : >> { %7672 = vst [vmem:[#allocation278_spill] sm:$0xff] %v5888_v44  ;;  %7675 = vst [vmem:[#allocation279_spill] sm:$0xff] %v5892_v34  ;;  %v5955_v52 = vpack.c.bf16 %v7716_v26, %v7715_v48  ;;  %v7718_v25 = vld [vmem:[#allocation136_spill] sm:$0xff]  ;;  %v7719_v8 = vld [vmem:[#allocation137_spill] sm:$0xff]  ;;  %3794 = vmatpush3.bf16.msra.mxu1 %v5947_v36 }
  0xf7   : >> { %7678 = vst [vmem:[#allocation280_spill] sm:$0xff] %v5896_v43  ;;  %7681 = vst [vmem:[#allocation281_spill] sm:$0xff] %v5902_v16  ;;  %v5959_v53 = vpack.c.bf16 %v7719_v8, %v7718_v25  ;;  %v7720_v54 = vld [vmem:[#allocation150_spill] sm:$0xff]  ;;  %v7721_v12 = vld [vmem:[#allocation151_spill] sm:$0xff] }
  0xf8   : >> { %7684 = vst [vmem:[#allocation282_spill] sm:$0xff] %v5906_v11  ;;  %7687 = vst [vmem:[#allocation283_spill] sm:$0xff] %v5910_v18  ;;  %v5963_v17 = vpack.c.bf16 %v7721_v12, %v7720_v54  ;;  %v7723_v56 = vld [vmem:[#allocation120_spill] sm:$0xff]  ;;  %v7724_v32 = vld [vmem:[#allocation121_spill] sm:$0xff]  ;;  %3796 = vmatprep.subr.bf16.mxu1 %v5955_v52  ;;  %3766 = vmatpush3.bf16.msra.mxu0 %v5951_v46 }
  0xf9   : >> { %7690 = vst [vmem:[#allocation284_spill] sm:$0xff] %v5917_v14  ;;  %7693 = vst [vmem:[#allocation285_spill] sm:$0xff] %v5921_v21  ;;  %v5967_v33 = vpack.c.bf16 %v7724_v32, %v7723_v56  ;;  %v7725_v57 = vld [vmem:[#allocation168_spill] sm:$0xff]  ;;  %v7726_v41 = vld [vmem:[#allocation169_spill] sm:$0xff]  ;;  %3768 = vmatprep.subr.bf16.mxu0 %v5959_v53 }
  0xfa   : >> { %7696 = vst [vmem:[#allocation286_spill] sm:$0xff] %v5925_v23  ;;  %7699 = vst [vmem:[#allocation287_spill] sm:$0xff] %v5931_v30  ;;  %v5971_v47 = vpack.c.bf16 %v7726_v41, %v7725_v57  ;;  %v7728_v48 = vld [vmem:[#allocation138_spill] sm:$0xff]  ;;  %v7729_v8 = vld [vmem:[#allocation139_spill] sm:$0xff]  ;;  %3798 = vmatpush3.bf16.msra.mxu1 %v5963_v17 }
  0xfb   : >> { %7702 = vst [vmem:[#allocation288_spill] sm:$0xff] %v5935_v22  ;;  %7705 = vst [vmem:[#allocation289_spill] sm:$0xff] %v5939_v15  ;;  %v5977_v26 = vpack.c.bf16 %v7729_v8, %v7728_v48  ;;  %v7730_v25 = vld [vmem:[#allocation152_spill] sm:$0xff]  ;;  %v7731_v54 = vld [vmem:[#allocation153_spill] sm:$0xff] }
  0xfc   : >> { %7708 = vst [vmem:[#allocation290_spill] sm:$0xff] %v5943_v13  ;;  %7711 = vst [vmem:[#allocation291_spill] sm:$0xff] %v5947_v36  ;;  %v5981_v12 = vpack.c.bf16 %v7731_v54, %v7730_v25  ;;  %v7733_v61 = vld [vmem:[#allocation122_spill] sm:$0xff]  ;;  %v7734_v56 = vld [vmem:[#allocation123_spill] sm:$0xff]  ;;  %3800 = vmatprep.subr.bf16.mxu1 %v5971_v47  ;;  %3770 = vmatpush3.bf16.msra.mxu0 %v5967_v33 }
  0xfd   : >> { %7714 = vst [vmem:[#allocation292_spill] sm:$0xff] %v5951_v46  ;;  %7717 = vst [vmem:[#allocation293_spill] sm:$0xff] %v5955_v52  ;;  %v5985_v32 = vpack.c.bf16 %v7734_v56, %v7733_v61  ;;  %v7735_v57 = vld [vmem:[#allocation170_spill] sm:$0xff]  ;;  %v7736_v41 = vld [vmem:[#allocation171_spill] sm:$0xff]  ;;  %3772 = vmatprep.subr.bf16.mxu0 %v5977_v26 }
  0xfe   : >> { %7722 = vst [vmem:[#allocation294_spill] sm:$0xff] %v5963_v17  ;;  %7727 = vst [vmem:[#allocation295_spill] sm:$0xff] %v5971_v47  ;;  %v5991_v35 = vpack.c.bf16 %v7736_v41, %v7735_v57  ;;  %v7738_v10 = vld [vmem:[#allocation140_spill] sm:$0xff]  ;;  %v7739_v48 = vld [vmem:[#allocation141_spill] sm:$0xff]  ;;  %3802 = vmatpush3.bf16.msra.mxu1 %v5981_v12 }
  0xff   : >> { %7732 = vst [vmem:[#allocation296_spill] sm:$0xff] %v5981_v12  ;;  %v5995_v8 = vpack.c.bf16 %v7739_v48, %v7738_v10  ;;  %v7740_v2 = vld [vmem:[#allocation154_spill] sm:$0xff]  ;;  %v7741_v25 = vld [vmem:[#allocation155_spill] sm:$0xff]  ;;  %v7743_v6 = vld [vmem:[#allocation124_spill] sm:$0xff] }
 0x100   : >> { %7737 = vst [vmem:[#allocation297_spill] sm:$0xff] %v5991_v35  ;;  %v5999_v54 = vpack.c.bf16 %v7741_v25, %v7740_v2  ;;  %v7744_v61 = vld [vmem:[#allocation125_spill] sm:$0xff]  ;;  %v7745_v55 = vld [vmem:[#allocation172_spill] sm:$0xff]  ;;  %v7751_v45 = vld [vmem:[#allocation190_spill] sm:$0xff]  ;;  %3804 = vmatprep.subr.bf16.mxu1 %v5991_v35  ;;  %3774 = vmatpush3.bf16.msra.mxu0 %v5985_v32 }
 0x101   : >> { %v6003_v56 = vpack.c.bf16 %v7744_v61, %v7743_v6  ;;  %v7746_v5 = vld [vmem:[#allocation173_spill] sm:$0xff]  ;;  %v7748_v7 = vld [vmem:[#allocation156_spill] sm:$0xff]  ;;  %v7752_v10 = vld [vmem:[#allocation191_spill] sm:$0xff]  ;;  %3776 = vmatprep.subr.bf16.mxu0 %v5995_v8 }
 0x102   : >> { %7742 = vst [vmem:[#allocation298_spill] sm:$0xff] %v5999_v54  ;;  %v6007_v29 = vpack.c.bf16 %v7746_v5, %v7745_v55  ;;  %v7749_v57 = vld [vmem:[#allocation157_spill] sm:$0xff]  ;;  %v6015_v48 = vpack.c.bf16 %v7752_v10, %v7751_v45  ;;  %v7753_v2 = vld [vmem:[#allocation174_spill] sm:$0xff]  ;;  %v7754_v25 = vld [vmem:[#allocation175_spill] sm:$0xff]  ;;  %3806 = vmatpush3.bf16.msra.mxu1 %v5999_v54 }
 0x103   : >> { %v6011_v41 = vpack.c.bf16 %v7749_v57, %v7748_v7  ;;  %v6019_v4 = vpack.c.bf16 %v7754_v25, %v7753_v2  ;;  %v7755_v6 = vld [vmem:[#allocation192_spill] sm:$0xff]  ;;  %v7756_v61 = vld [vmem:[#allocation193_spill] sm:$0xff]  ;;  %v7759_v20 = vld [vmem:[#allocation206_spill] sm:$0xff] }
 0x104   : >> { %7747 = vst [vmem:[#allocation299_spill] sm:$0xff] %v6007_v29  ;;  %v6023_v50 = vpack.c.bf16 %v7756_v61, %v7755_v6  ;;  %v7757_v55 = vld [vmem:[#allocation176_spill] sm:$0xff]  ;;  %v7758_v5 = vld [vmem:[#allocation177_spill] sm:$0xff]  ;;  %v7760_v7 = vld [vmem:[#allocation207_spill] sm:$0xff]  ;;  %3808 = vmatprep.subr.bf16.mxu1 %v6007_v29  ;;  %3778 = vmatpush3.bf16.msra.mxu0 %v6003_v56 }
 0x105   : >> { %7750 = vst [vmem:[#allocation300_spill] sm:$0xff] %v6011_v41  ;;  %v6027_v59 = vpack.c.bf16 %v7758_v5, %v7757_v55  ;;  %v6031_v57 = vpack.c.bf16 %v7760_v7, %v7759_v20  ;;  %v7762_v45 = vld [vmem:[#allocation194_spill] sm:$0xff]  ;;  %v7763_v10 = vld [vmem:[#allocation195_spill] sm:$0xff]  ;;  %v7766_v58 = vld [vmem:[#allocation208_spill] sm:$0xff]  ;;  %3812 = vmatprep.subr.bf16.mxu0 %v6015_v48 }
 0x106   : >> { %v6037_v2 = vpack.c.bf16 %v7763_v10, %v7762_v45  ;;  %v7764_v25 = vld [vmem:[#allocation178_spill] sm:$0xff]  ;;  %v7765_v6 = vld [vmem:[#allocation179_spill] sm:$0xff]  ;;  %v7767_v55 = vld [vmem:[#allocation209_spill] sm:$0xff]  ;;  %3810 = vmatpush3.bf16.msra.mxu1 %v6011_v41 }
 0x107   : >> { %7761 = vst [vmem:[#allocation301_spill] sm:$0xff] %v6031_v57  ;;  %v6041_v61 = vpack.c.bf16 %v7765_v6, %v7764_v25  ;;  %v6045_v5 = vpack.c.bf16 %v7767_v55, %v7766_v58  ;;  %v7769_v20 = vld [vmem:[#allocation196_spill] sm:$0xff]  ;;  %v7770_v7 = vld [vmem:[#allocation197_spill] sm:$0xff]  ;;  %v7773_v10 = vld [vmem:[#allocation210_spill] sm:$0xff] }
 0x108   : >> { %v6051_v49 = vpack.c.bf16 %v7770_v7, %v7769_v20  ;;  %v7771_v31 = vld [vmem:[#allocation180_spill] sm:$0xff]  ;;  %v7772_v19 = vld [vmem:[#allocation181_spill] sm:$0xff]  ;;  %v7774_v27 = vld [vmem:[#allocation211_spill] sm:$0xff] }
 0x109   : >> { %7768 = vst [vmem:[#allocation302_spill] sm:$0xff] %v6045_v5  ;;  %v6055_v45 = vpack.c.bf16 %v7772_v19, %v7771_v31  ;;  %v6059_v25 = vpack.c.bf16 %v7774_v27, %v7773_v10  ;;  %v7776_v6 = vld [vmem:[#allocation198_spill] sm:$0xff]  ;;  %v7777_v58 = vld [vmem:[#allocation199_spill] sm:$0xff]  ;;  %v7780_v28 = vld [vmem:[#allocation212_spill] sm:$0xff] }
 0x10a   : >> { %v6063_v55 = vpack.c.bf16 %v7777_v58, %v7776_v6  ;;  %v7778_v37 = vld [vmem:[#allocation182_spill] sm:$0xff]  ;;  %v7779_v3 = vld [vmem:[#allocation183_spill] sm:$0xff]  ;;  %v7781_v20 = vld [vmem:[#allocation213_spill] sm:$0xff] }
 0x10b   : >> { %7775 = vst [vmem:[#allocation303_spill] sm:$0xff] %v6059_v25  ;;  %v6067_v40 = vpack.c.bf16 %v7779_v3, %v7778_v37  ;;  %v6071_v7 = vpack.c.bf16 %v7781_v20, %v7780_v28  ;;  %v7783_v15 = vld [vmem:[#allocation200_spill] sm:$0xff]  ;;  %v7784_v19 = vld [vmem:[#allocation201_spill] sm:$0xff]  ;;  %v7787_v62 = vld [vmem:[#allocation214_spill] sm:$0xff] }
 0x10c   : >> { %v6075_v31 = vpack.c.bf16 %v7784_v19, %v7783_v15  ;;  %v7785_v27 = vld [vmem:[#allocation184_spill] sm:$0xff]  ;;  %v7786_v10 = vld [vmem:[#allocation185_spill] sm:$0xff]  ;;  %v7788_v6 = vld [vmem:[#allocation215_spill] sm:$0xff]  ;;  %v6095_v15 = vstv %s597_s24 }
 0x10d   : >> { %7782 = vst [vmem:[#allocation304_spill] sm:$0xff] %v6071_v7  ;;  %v6079_v30 = vpack.c.bf16 %v7786_v10, %v7785_v27  ;;  %v6083_v58 = vpack.c.bf16 %v7788_v6, %v7787_v62  ;;  %v7790_v39 = vld [vmem:[#allocation202_spill] sm:$0xff]  ;;  %v7791_v37 = vld [vmem:[#allocation203_spill] sm:$0xff]  ;;  %v7795_v19 = vld [vmem:[#allocation216_spill] sm:$0xff] }
 0x10e   : >> { %v6087_v3 = vpack.c.bf16 %v7791_v37, %v7790_v39  ;;  %v7792_v21 = vld [vmem:[#allocation186_spill] sm:$0xff]  ;;  %v7793_v28 = vld [vmem:[#allocation187_spill] sm:$0xff]  ;;  %v7796_v27 = vld [vmem:[#allocation217_spill] sm:$0xff] }
 0x10f   : >> { %7789 = vst [vmem:[#allocation305_spill] sm:$0xff] %v6083_v58  ;;  %v6091_v20 = vpack.c.bf16 %v7793_v28, %v7792_v21  ;;  %v6099_v10 = vpack.c.bf16 %v7796_v27, %v7795_v19  ;;  %v7798_v62 = vld [vmem:[#allocation204_spill] sm:$0xff]  ;;  %v7799_v6 = vld [vmem:[#allocation205_spill] sm:$0xff]  ;;  %v7805_v36 = vld [vmem:[#allocation27_spill] sm:$0xff] }
 0x110   : >> { %v6103_v18 = vpack.c.bf16 %v7799_v6, %v7798_v62  ;;  %v7801_v39 = vld [vmem:[#allocation188_spill] sm:$0xff]  ;;  %v7802_v37 = vld [vmem:[#allocation189_spill] sm:$0xff]  ;;  %v599_v34 = vxor.u32 %v6095_v15, %v7805_v36  ;;  %v7810_v0 = vld [vmem:[#allocation46_spill] sm:$0xff] }
 0x111   : >> { %7794 = vst [vmem:[#allocation306_spill] sm:$0xff] %v6091_v20  ;;  %7797 = vst [vmem:[#allocation307_spill] sm:$0xff] %v6099_v10  ;;  %v6107_v43 = vpack.c.bf16 %v7802_v37, %v7801_v39  ;;  %v7804_v21 = vld [vmem:[#allocation28_spill] sm:$0xff]  ;;  %v7806_v19 = vld [vmem:[#allocation33_spill] sm:$0xff]  ;;  %v609_v52 = vxor.u32 %v6095_v15, %v7810_v0 }
 0x112   : >> { %7800 = vst [vmem:[#allocation308_spill] sm:$0xff] %v6103_v18  ;;  %v600_v28 = vxor.u32 %v6095_v15, %v7804_v21  ;;  %v602_v27 = vxor.u32 %v6095_v15, %v7806_v19  ;;  %v7807_v1 = vld [vmem:[#allocation32_spill] sm:$0xff]  ;;  %v7808_v6 = vld [vmem:[#allocation41_spill] sm:$0xff]  ;;  %v648_v21 = vshrl.u32 %v599_v34, 16  ;;  %v7812_v17 = vld [vmem:[#allocation218_spill] sm:$0xff] }
 0x113   : >> { %7803 = vst [vmem:[#allocation309_spill] sm:$0xff] %v6107_v43  ;;  %v601_v62 = vxor.u32 %v6095_v15, %v7807_v1  ;;  %v607_v39 = vxor.u32 %v6095_v15, %v7808_v6  ;;  %v7809_v37 = vld [vmem:[#allocation40_spill] sm:$0xff]  ;;  %v7811_v9 = vld [vmem:[#allocation45_spill] sm:$0xff]  ;;  %v658_v6 = vshrl.u32 %v609_v52, 16  ;;  %v7813_v60 = vld [vmem:[#allocation219_spill] sm:$0xff] }
 0x114   : >> { %v606_v42 = vxor.u32 %v6095_v15, %v7809_v37  ;;  %v649_v24 = vshrl.u32 %v600_v28, 16  ;;  %v651_v63 = vshrl.u32 %v602_v27, 16  ;;  %v608_v36 = vxor.u32 %v6095_v15, %v7811_v9 }
 0x115   : >> { %v650_v1 = vshrl.u32 %v601_v62, 16  ;;  %v656_v19 = vshrl.u32 %v607_v39, 16  ;;  %v697_v0 = vxor.u32 %v648_v21, %v599_v34  ;;  %v707_v9 = vxor.u32 %v658_v6, %v609_v52  ;;  %v7815_v34 = vld [vmem:[#allocation54_spill] sm:$0xff] }
 0x116   : >> { %v655_v51 = vshrl.u32 %v606_v42, 16  ;;  %v698_v37 = vxor.u32 %v649_v24, %v600_v28  ;;  %v700_v13 = vxor.u32 %v651_v63, %v602_v27  ;;  %v657_v22 = vshrl.u32 %v608_v36, 16  ;;  %v7816_v28 = vld [vmem:[#allocation220_spill] sm:$0xff] }
 0x117   : >> { %v699_v23 = vxor.u32 %v650_v1, %v601_v62  ;;  %v705_v14 = vxor.u32 %v656_v19, %v607_v39  ;;  %v746_v46 = vmul.u32 2146121005, %v697_v0  ;;  %v6133_v38 = vpack.c.bf16 %v7813_v60, %v7812_v17 }
 0x118   : >> { %v704_v11 = vxor.u32 %v655_v51, %v606_v42  ;;  %v747_v16 = vmul.u32 2146121005, %v698_v37  ;;  %v706_v44 = vxor.u32 %v657_v22, %v608_v36  ;;  %v749_v47 = vmul.u32 2146121005, %v700_v13  ;;  %v7817_v51 = vld [vmem:[#allocation221_spill] sm:$0xff] }
 0x119   : >> { %7814 = vst [vmem:[#allocation310_spill] sm:$0xff] %v6133_v38  ;;  %v748_v24 = vmul.u32 2146121005, %v699_v23  ;;  %v6139_v63 = vxor.u32 %v6095_v15, %v7815_v34  ;;  %v6143_v52 = vpack.c.bf16 %v7817_v51, %v7816_v28  ;;  %v795_v60 = vshrl.u32 %v746_v46, 15 }
 0x11a   : >> { %v796_v22 = vshrl.u32 %v747_v16, 15  ;;  %v754_v42 = vmul.u32 2146121005, %v705_v14  ;;  %v753_v17 = vmul.u32 2146121005, %v704_v11  ;;  %v798_v27 = vshrl.u32 %v749_v47, 15 }
 0x11b   : >> { %7818 = vst [vmem:[#allocation311_spill] sm:$0xff] %v6143_v52  ;;  %v797_v62 = vshrl.u32 %v748_v24, 15  ;;  %v756_v13 = vmul.u32 2146121005, %v707_v9  ;;  %v755_v23 = vmul.u32 2146121005, %v706_v44  ;;  %v844_v21 = vxor.u32 %v795_v60, %v746_v46 }
 0x11c   : >> { %v845_v39 = vxor.u32 %v796_v22, %v747_v16  ;;  %v803_v36 = vshrl.u32 %v754_v42, 15  ;;  %v802_v1 = vshrl.u32 %v753_v17, 15  ;;  %v847_v19 = vxor.u32 %v798_v27, %v749_v47 }
 0x11d   : >> { %v846_v6 = vxor.u32 %v797_v62, %v748_v24  ;;  %v805_v37 = vshrl.u32 %v756_v13, 15  ;;  %v804_v0 = vshrl.u32 %v755_v23, 15  ;;  %v893_v11 = vmul.u32 2221713035, %v844_v21 }
 0x11e   : >> { %v894_v14 = vmul.u32 2221713035, %v845_v39  ;;  %v852_v9 = vxor.u32 %v803_v36, %v754_v42  ;;  %v851_v44 = vxor.u32 %v802_v1, %v753_v17  ;;  %v896_v16 = vmul.u32 2221713035, %v847_v19 }
 0x11f   : >> { %v895_v46 = vmul.u32 2221713035, %v846_v6  ;;  %v854_v34 = vxor.u32 %v805_v37, %v756_v13  ;;  %v853_v28 = vxor.u32 %v804_v0, %v755_v23  ;;  %v942_v22 = vshrl.u32 %v893_v11, 16 }
 0x120   : >> { %v943_v51 = vshrl.u32 %v894_v14, 16  ;;  %v901_v60 = vmul.u32 2221713035, %v852_v9  ;;  %v900_v54 = vmul.u32 2221713035, %v851_v44  ;;  %v945_v47 = vshrl.u32 %v896_v16, 16 }
 0x121   : >> { %v944_v24 = vshrl.u32 %v895_v46, 16  ;;  %v903_v27 = vmul.u32 2221713035, %v854_v34  ;;  %v902_v62 = vmul.u32 2221713035, %v853_v28  ;;  %v6156_v42 = vxor.u32 %v942_v22, %v893_v11  ;;  %v7823_v28 = vld [vmem:[#allocation13_spill] sm:$0xff] }
 0x122   : >> { %v6153_v39 = vxor.u32 %v943_v51, %v894_v14  ;;  %v7331_v17 = vmov 0.0|0.0   ;;  %v950_v13 = vshrl.u32 %v901_v60, 16  ;;  %v949_v23 = vshrl.u32 %v900_v54, 16  ;;  %v7821_v14 = vld [vmem:[#allocation53_spill] sm:$0xff]  ;;  %v7825_v51 = vld [vmem:[#allocation12_spill] sm:$0xff] }
 0x123   : >> { %3843 = vmatprep.subr.bf16.mxu1 %v7331_v17  ;;  %v6159_v21 = vxor.u32 %v945_v47, %v896_v16  ;;  %v6161_v36 = vxor.u32 %v944_v24, %v895_v46  ;;  %v952_v1 = vshrl.u32 %v903_v27, 16  ;;  %v951_v19 = vshrl.u32 %v902_v62, 16  ;;  %v7822_v16 = vld [vmem:[#allocation59_spill] sm:$0xff]  ;;  %v7829_v17 = vld [vmem:[#allocation14_spill] sm:$0xff] }
 0x124   : >> { %v1041_v6 = vand.u32 65535, %v6153_v39  ;;  %v1040_v37 = vand.u32 65535, %v6156_v42  ;;  %v6165_v0 = vxor.u32 %v950_v13, %v901_v60  ;;  %v613_v11 = vxor.u32 %v6095_v15, %v7821_v14  ;;  %v7828_v14 = vld [vmem:[#allocation15_spill] sm:$0xff] }
 0x125   : >> { %7819 = vst [vmem:[#allocation312_spill] sm:$0xff] %v6159_v21  ;;  %7820 = vst [vmem:[#allocation313_spill] sm:$0xff] %v6161_v36  ;;  %v1043_v9 = vand.u32 65535, %v6159_v21  ;;  %v1042_v44 = vand.u32 65535, %v6161_v36  ;;  %v6171_v34 = vxor.u32 %v949_v23, %v900_v54  ;;  %v616_v46 = vxor.u32 %v6095_v15, %v7822_v16  ;;  %v7841_v16 = vld [vmem:[#allocation80_spill] sm:$0xff] }
 0x126   : >> { %v7824_v22 = vmov %v7823_v28  ;;  %vm1090_vm0 = vcmp.gt.s32.totalorder %v7823_v28, %v1041_v6  ;;  %v7826_v47 = vmov %v7825_v51  ;;  %vm1089_vm1 = vcmp.gt.s32.totalorder %v7825_v51, %v1040_v37  ;;  %v7831_v6 = vld [vmem:[#allocation20_spill] sm:$0xff]  ;;  %v7834_v51 = vld [vmem:[#allocation22_spill] sm:$0xff] }
 0x127   : >> { %v1048_v24 = vand.u32 65535, %v6165_v0  ;;  %v6178_v60 = vxor.u32 %v952_v1, %v903_v27  ;;  %v7338_v13 = vmov 1.0   ;;  %vm1092_vm2 = vcmp.gt.s32.totalorder %v7828_v14, %v1043_v9  ;;  %v7832_v9 = vld [vmem:[#allocation19_spill] sm:$0xff] }
 0x128   : >> { %2932 = vmatprep.mubr.msk.f32.mxu0 %vm1090_vm0, %v7338_v13  ;;  %vm1091_vm3 = vcmp.gt.s32.totalorder %v7829_v17, %v1042_v44  ;;  %v1047_v54 = vand.u32 65535, %v6171_v34  ;;  %v6184_v23 = vxor.u32 %v951_v19, %v902_v62  ;;  %2946 = vmatprep.mubr.msk.f32.mxu1 %vm1092_vm2, %v7338_v13  ;;  %v663_v1 = vshrl.u32 %v6139_v63, 16  ;;  %v7833_v44 = vld [vmem:[#allocation55_spill] sm:$0xff] }
 0x129   : >> { %7827 = vst [vmem:[#allocation314_spill] sm:$0xff] %v6178_v60  ;;  %2933 = vmatmul.mubr.msk.f32.vlgmr.msra.gmra.mrb[0].mxu0 %vm1089_vm1, %v7338_v13  ;;  %vm1097_vm4 = vcmp.gt.s32.totalorder %v7831_v6, %v1048_v24  ;;  %v1050_v27 = vand.u32 65535, %v6178_v60  ;;  %v662_v37 = vshrl.u32 %v613_v11, 16  ;;  %2947 = vmatmul.mubr.msk.f32.vlgmr.msra.gmra.mrb[0].mxu1 %vm1091_vm3, %v7338_v13  ;;  %v665_v19 = vshrl.u32 %v616_v46, 16  ;;  %v7836_v60 = vld [vmem:[#allocation67_spill] sm:$0xff] }
 0x12a   : >> { %7830 = vst [vmem:[#allocation315_spill] sm:$0xff] %v6184_v23  ;;  %3814 = vmatpush3.bf16.msra.mxu0 %v6019_v4  ;;  %vm1096_vm5 = vcmp.gt.s32.totalorder %v7832_v9, %v1047_v54  ;;  %v1049_v62 = vand.u32 65535, %v6184_v23  ;;  %v615_v28 = vxor.u32 %v6095_v15, %v7833_v44  ;;  %3845 = vmatpush3.bf16.msra.mxu1 %v6031_v57  ;;  %v7835_v54 = vld [vmem:[#allocation21_spill] sm:$0xff]  ;;  %v7837_v36 = vmov 0.0|0.0  }
 0x12b   : >> { %3816 = vmatprep.subr.bf16.mxu0 %v6023_v50  ;;  %vm1099_vm6 = vcmp.gt.s32.totalorder %v7834_v51, %v1050_v27  ;;  %v712_v24 = vxor.u32 %v663_v1, %v6139_v63  ;;  %v711_v6 = vxor.u32 %v662_v37, %v613_v11  ;;  %2934 = vmatprep.mubr.msk.f32.mxu0 %vm1097_vm4, %v7338_v13  ;;  %v7838_v51 = vld [vmem:[#allocation66_spill] sm:$0xff]  ;;  %v7839_v11 = vld [vmem:[#allocation69_spill] sm:$0xff] }
 0x12c   : >> { %2948 = vmatprep.mubr.msk.f32.mxu1 %vm1099_vm6, %v7338_v13  ;;  %vm1098_vm7 = vcmp.gt.s32.totalorder %v7835_v54, %v1049_v62  ;;  %v714_v9 = vxor.u32 %v665_v19, %v616_v46  ;;  %v664_v23 = vshrl.u32 %v615_v28, 16  ;;  %v621_v44 = vxor.u32 %v6095_v15, %v7836_v60  ;;  %3846 = vmatprep.subr.bf16.mxu1 %v7837_v36  ;;  %v7840_v60 = vld [vmem:[#allocation68_spill] sm:$0xff] }
 0x12d   : >> { %2935 = vmatmul.mubr.msk.f32.gmra.mrb[2].mxu0 %vm1096_vm5, %v7338_v13  ;;  %v761_v57 = vmul.u32 2146121005, %v712_v24  ;;  %v760_v27 = vmul.u32 2146121005, %v711_v6  ;;  %v620_v63 = vxor.u32 %v6095_v15, %v7838_v51  ;;  %v623_v1 = vxor.u32 %v6095_v15, %v7839_v11  ;;  %2949 = vmatmul.mubr.msk.f32.gmra.mrb[2].mxu1 %vm1098_vm7, %v7338_v13 }
 0x12e   : >> { %3818 = vmatpush3.bf16.msra.mxu0 %v6027_v59  ;;  %v763_v46 = vmul.u32 2146121005, %v714_v9  ;;  %v713_v37 = vxor.u32 %v664_v23, %v615_v28  ;;  %v670_v62 = vshrl.u32 %v621_v44, 16  ;;  %v622_v19 = vxor.u32 %v6095_v15, %v7840_v60  ;;  %3848 = vmatpush3.bf16.msra.mxu1 %v6045_v5 }
 0x12f   : >> { %3820 = vmatprep.subr.bf16.mxu0 %v6037_v2  ;;  %v810_v24 = vshrl.u32 %v761_v57, 15  ;;  %v809_v6 = vshrl.u32 %v760_v27, 15  ;;  %v669_v51 = vshrl.u32 %v620_v63, 16  ;;  %v672_v54 = vshrl.u32 %v623_v1, 16  ;;  %3849 = vmatprep.subr.bf16.mxu1 %v7837_v36 }
 0x130   : >> { %v812_v14 = vshrl.u32 %v763_v46, 15  ;;  %v762_v11 = vmul.u32 2146121005, %v713_v37  ;;  %v719_v21 = vxor.u32 %v670_v62, %v621_v44  ;;  %v671_v13 = vshrl.u32 %v622_v19, 16  ;;  %v7842_v37 = vld [vmem:[#allocation76_spill] sm:$0xff] }
 0x131   : >> { %v859_v9 = vxor.u32 %v810_v24, %v761_v57  ;;  %v858_v23 = vxor.u32 %v809_v6, %v760_v27  ;;  %v718_v28 = vxor.u32 %v669_v51, %v620_v63  ;;  %v721_v41 = vxor.u32 %v672_v54, %v623_v1 }
 0x132   : >> { %3822 = vmatpush3.bf16.msra.mxu0 %v6041_v61  ;;  %v861_v60 = vxor.u32 %v812_v14, %v763_v46  ;;  %v811_v29 = vshrl.u32 %v762_v11, 15  ;;  %v768_v35 = vmul.u32 2146121005, %v719_v21  ;;  %v720_v5 = vxor.u32 %v671_v13, %v622_v19  ;;  %3851 = vmatpush3.bf16.msra.mxu1 %v6059_v25  ;;  %v7855_v25 = vld [vmem:[#allocation43_spill] sm:$0xff] }
 0x133   : >> { %v908_v12 = vmul.u32 2221713035, %v859_v9  ;;  %v907_v17 = vmul.u32 2221713035, %v858_v23  ;;  %3824 = vmatprep.subr.bf16.mxu0 %v6051_v49  ;;  %v628_v44 = vxor.u32 %v6095_v15, %v7841_v16  ;;  %v627_v57 = vxor.u32 %v6095_v15, %v7842_v37  ;;  %3852 = vmatprep.subr.bf16.mxu1 %v7837_v36 }
 0x134   : >> { %v910_v27 = vmul.u32 2221713035, %v861_v60  ;;  %v860_v54 = vxor.u32 %v811_v29, %v762_v11  ;;  %v817_v63 = vshrl.u32 %v768_v35, 15  ;;  %v767_v1 = vmul.u32 2146121005, %v718_v28 }
 0x135   : >> { %v957_v21 = vshrl.u32 %v908_v12, 16  ;;  %v956_v13 = vshrl.u32 %v907_v17, 16  ;;  %v770_v14 = vmul.u32 2146121005, %v721_v41  ;;  %v769_v46 = vmul.u32 2146121005, %v720_v5 }
 0x136   : >> { %v959_v62 = vshrl.u32 %v910_v27, 16  ;;  %v909_v19 = vmul.u32 2221713035, %v860_v54  ;;  %3826 = vmatpush3.bf16.msra.mxu0 %v6055_v45  ;;  %v866_v24 = vxor.u32 %v817_v63, %v768_v35  ;;  %v816_v6 = vshrl.u32 %v767_v1, 15  ;;  %3854 = vmatpush3.bf16.msra.mxu1 %v6071_v7 }
 0x137   : >> { %v6228_v16 = vxor.u32 %v957_v21, %v908_v12  ;;  %v6230_v51 = vxor.u32 %v956_v13, %v907_v17  ;;  %v819_v9 = vshrl.u32 %v770_v14, 15  ;;  %3828 = vmatprep.subr.bf16.mxu0 %v6063_v55  ;;  %v818_v29 = vshrl.u32 %v769_v46, 15  ;;  %3855 = vmatprep.subr.bf16.mxu1 %v7837_v36  ;;  %v7847_v13 = vld [vmem:[#allocation26_spill] sm:$0xff] }
 0x138   : >> { %v6234_v11 = vxor.u32 %v959_v62, %v910_v27  ;;  %v958_v41 = vshrl.u32 %v909_v19, 16  ;;  %v915_v5 = vmul.u32 2221713035, %v866_v24  ;;  %v865_v23 = vxor.u32 %v816_v6, %v767_v1  ;;  %v7845_v27 = vld [vmem:[#allocation29_spill] sm:$0xff] }
 0x139   : >> { %v1055_v35 = vand.u32 65535, %v6228_v16  ;;  %v1054_v12 = vand.u32 65535, %v6230_v51  ;;  %v868_v28 = vxor.u32 %v819_v9, %v770_v14  ;;  %v867_v17 = vxor.u32 %v818_v29, %v769_v46  ;;  %v7849_v46 = vld [vmem:[#allocation31_spill] sm:$0xff] }
 0x13a   : >> { %7843 = vst [vmem:[#allocation316_spill] sm:$0xff] %v6234_v11  ;;  %v1057_v60 = vand.u32 65535, %v6234_v11  ;;  %v6240_v37 = vxor.u32 %v958_v41, %v909_v19  ;;  %v964_v54 = vshrl.u32 %v915_v5, 16  ;;  %v914_v63 = vmul.u32 2221713035, %v865_v23  ;;  %3830 = vmatpush3.bf16.msra.mxu0 %v6067_v40  ;;  %3857 = vmatpush3.bf16.msra.mxu1 %v6083_v58 }
 0x13b   : >> { %v7846_v21 = vmov %v7845_v27  ;;  %vm1104_vm8 = vcmp.gt.s32.totalorder %v7845_v27, %v1055_v35  ;;  %vm1103_vm9 = vcmp.gt.s32.totalorder %v7847_v13, %v1054_v12  ;;  %v917_v1 = vmul.u32 2221713035, %v868_v28  ;;  %3832 = vmatprep.subr.bf16.mxu0 %v6075_v31  ;;  %3858 = vmatprep.subr.bf16.mxu1 %v7837_v36  ;;  %v7850_v35 = vld [vmem:[#allocation30_spill] sm:$0xff] }
 0x13c   : >> { %7844 = vst [vmem:[#allocation317_spill] sm:$0xff] %v6240_v37  ;;  %v916_v62 = vmul.u32 2221713035, %v867_v17  ;;  %v7848_v14 = vmov 1.0   ;;  %vm1106_vm10 = vcmp.gt.s32.totalorder %v7849_v46, %v1057_v60  ;;  %v1056_v19 = vand.u32 65535, %v6240_v37  ;;  %v7852_v60 = vld [vmem:[#allocation82_spill] sm:$0xff] }
 0x13d   : >> { %2936 = vmatprep.mubr.msk.f32.mxu0 %vm1104_vm8, %v7848_v14  ;;  %v6250_v24 = vxor.u32 %v964_v54, %v915_v5  ;;  %v963_v6 = vshrl.u32 %v914_v63, 16  ;;  %2950 = vmatprep.mubr.msk.f32.mxu1 %vm1106_vm10, %v7848_v14  ;;  %v966_v9 = vshrl.u32 %v917_v1, 16  ;;  %v677_v41 = vshrl.u32 %v628_v44, 16 }
 0x13e   : >> { %2937 = vmatmul.mubr.msk.f32.gmra.mrb[4].mxu0 %vm1103_vm9, %v7848_v14  ;;  %v965_v29 = vshrl.u32 %v916_v62, 16  ;;  %v676_v23 = vshrl.u32 %v627_v57, 16  ;;  %vm1105_vm11 = vcmp.gt.s32.totalorder %v7850_v35, %v1056_v19  ;;  %v630_v5 = vxor.u32 %v6095_v15, %v7852_v60  ;;  %3860 = vmatpush3.bf16.msra.mxu1 %v6099_v10  ;;  %v7860_v10 = vld [vmem:[#allocation44_spill] sm:$0xff] }
 0x13f   : >> { %v1062_v28 = vand.u32 65535, %v6250_v24  ;;  %v6257_v17 = vxor.u32 %v963_v6, %v914_v63  ;;  %3834 = vmatpush3.bf16.msra.mxu0 %v6079_v30  ;;  %2951 = vmatmul.mubr.msk.f32.gmra.mrb[4].mxu1 %vm1105_vm11, %v7848_v14  ;;  %v6263_v54 = vxor.u32 %v966_v9, %v917_v1  ;;  %v726_v58 = vxor.u32 %v677_v41, %v628_v44  ;;  %v7856_v63 = vld [vmem:[#allocation81_spill] sm:$0xff]  ;;  %v7857_v9 = vld [vmem:[#allocation42_spill] sm:$0xff] }
 0x140   : >> { %v6265_v27 = vxor.u32 %v965_v29, %v916_v62  ;;  %v725_v7 = vxor.u32 %v676_v23, %v627_v57  ;;  %v679_v35 = vshrl.u32 %v630_v5, 16  ;;  %v629_v6 = vxor.u32 %v6095_v15, %v7856_v63  ;;  %3836 = vmatprep.subr.bf16.mxu0 %v6087_v3  ;;  %3861 = vmatprep.subr.bf16.mxu1 %v7837_v36  ;;  %v7859_v63 = vld [vmem:[#allocation49_spill] sm:$0xff] }
 0x141   : >> { %7851 = vst [vmem:[#allocation318_spill] sm:$0xff] %v6257_v17  ;;  %7853 = vst [vmem:[#allocation319_spill] sm:$0xff] %v6263_v54  ;;  %vm1111_vm12 = vcmp.gt.s32.totalorder %v7855_v25, %v1062_v28  ;;  %v1061_v19 = vand.u32 65535, %v6257_v17  ;;  %v1064_v1 = vand.u32 65535, %v6263_v54  ;;  %v775_v44 = vmul.u32 2146121005, %v726_v58 }
 0x142   : >> { %7854 = vst [vmem:[#allocation320_spill] sm:$0xff] %v6265_v27  ;;  %2938 = vmatprep.mubr.msk.f32.mxu0 %vm1111_vm12, %v7848_v14  ;;  %v1063_v62 = vand.u32 65535, %v6265_v27  ;;  %v774_v57 = vmul.u32 2146121005, %v725_v7  ;;  %v728_v29 = vxor.u32 %v679_v35, %v630_v5  ;;  %v678_v23 = vshrl.u32 %v629_v6, 16  ;;  %v7858_v28 = vld [vmem:[#allocation90_spill] sm:$0xff]  ;;  %3863 = vmatpush3.bf16.msra.mxu1 %v6133_v38 }
 0x143   : >> { %vm1110_vm13 = vcmp.gt.s32.totalorder %v7857_v9, %v1061_v19  ;;  %v635_v60 = vxor.u32 %v6095_v15, %v7858_v28  ;;  %3838 = vmatpush3.bf16.msra.mxu0 %v6091_v20  ;;  %vm1113_vm14 = vcmp.gt.s32.totalorder %v7859_v63, %v1064_v1  ;;  %v824_v27 = vshrl.u32 %v775_v44, 15  ;;  %v7861_v35 = vld [vmem:[#allocation89_spill] sm:$0xff]  ;;  %v7862_v63 = vld [vmem:[#allocation95_spill] sm:$0xff]  ;;  %3864 = vmatprep.subr.bf16.mxu1 %v7837_v36 }
 0x144   : >> { %2939 = vmatmul.mubr.msk.f32.gmra.mrb[6].mxu0 %vm1110_vm13, %v7848_v14  ;;  %vm1112_vm15 = vcmp.gt.s32.totalorder %v7860_v10, %v1063_v62  ;;  %v823_v58 = vshrl.u32 %v774_v57, 15  ;;  %3840 = vmatprep.subr.bf16.mxu0 %v6103_v18  ;;  %v777_v7 = vmul.u32 2146121005, %v728_v29  ;;  %v727_v5 = vxor.u32 %v678_v23, %v629_v6  ;;  %v7863_v62 = vld [vmem:[#allocation94_spill] sm:$0xff] }
 0x145   : >> { %2952 = vmatprep.mubr.msk.f32.mxu1 %vm1113_vm14, %v7848_v14  ;;  %v684_v19 = vshrl.u32 %v635_v60, 16  ;;  %v634_v9 = vxor.u32 %v6095_v15, %v7861_v35  ;;  %v873_v28 = vxor.u32 %v824_v27, %v775_v44  ;;  %v637_v10 = vxor.u32 %v6095_v15, %v7862_v63 }
 0x146   : >> { %2953 = vmatmul.mubr.msk.f32.gmra.mrb[6].mxu1 %vm1112_vm15, %v7848_v14  ;;  %v872_v1 = vxor.u32 %v823_v58, %v774_v57  ;;  %v636_v54 = vxor.u32 %v6095_v15, %v7863_v62  ;;  %v826_v12 = vshrl.u32 %v777_v7, 15  ;;  %v776_v46 = vmul.u32 2146121005, %v727_v5  ;;  %v7864_v62 = vld [vmem:[#allocation275_spill] sm:$0xff] }
 0x147   : >> { %v733_v29 = vxor.u32 %v684_v19, %v635_v60  ;;  %v683_v6 = vshrl.u32 %v634_v9, 16  ;;  %3842 = vmatpush3.bf16.msra.mxu0 %v6107_v43  ;;  %v922_v23 = vmul.u32 2221713035, %v873_v28  ;;  %v686_v38 = vshrl.u32 %v637_v10, 16  ;;  %3866 = vmatpush3.bf16.msra.mxu1 %v6143_v52 }
 0x148   : >> { %v921_v35 = vmul.u32 2221713035, %v872_v1  ;;  %v685_v37 = vshrl.u32 %v636_v54, 16  ;;  %3867 = vmatprep.subr.bf16.mxu0 %v7837_v36  ;;  %v875_v27 = vxor.u32 %v826_v12, %v777_v7  ;;  %v825_v44 = vshrl.u32 %v776_v46, 15  ;;  %3892 = vmatprep.subr.bf16.mxu1 %v7864_v62  ;;  %v7871_v62 = vld [vmem:[#allocation103_spill] sm:$0xff] }
 0x149   : >> { %v782_v57 = vmul.u32 2146121005, %v733_v29  ;;  %v732_v58 = vxor.u32 %v683_v6, %v634_v9  ;;  %v971_v63 = vshrl.u32 %v922_v23, 16  ;;  %v735_v60 = vxor.u32 %v686_v38, %v637_v10 }
 0x14a   : >> { %v970_v5 = vshrl.u32 %v921_v35, 16  ;;  %v734_v19 = vxor.u32 %v685_v37, %v636_v54  ;;  %v924_v11 = vmul.u32 2221713035, %v875_v27  ;;  %v874_v43 = vxor.u32 %v825_v44, %v776_v46  ;;  %v7868_v44 = vld [vmem:[#allocation58_spill] sm:$0xff] }
 0x14b   : >> { %v831_v28 = vshrl.u32 %v782_v57, 15  ;;  %v781_v1 = vmul.u32 2146121005, %v732_v58  ;;  %v6299_v18 = vxor.u32 %v971_v63, %v922_v23  ;;  %v784_v12 = vmul.u32 2146121005, %v735_v60 }
 0x14c   : >> { %v6301_v20 = vxor.u32 %v970_v5, %v921_v35  ;;  %v783_v7 = vmul.u32 2146121005, %v734_v19  ;;  %v973_v29 = vshrl.u32 %v924_v11, 16  ;;  %v923_v9 = vmul.u32 2221713035, %v874_v43  ;;  %v7869_v35 = vld [vmem:[#allocation57_spill] sm:$0xff] }
 0x14d   : >> { %7865 = vst [vmem:[#allocation275_spill] sm:$0xff] %v6299_v18  ;;  %v880_v6 = vxor.u32 %v831_v28, %v782_v57  ;;  %v830_v52 = vshrl.u32 %v781_v1, 15  ;;  %v1069_v41 = vand.u32 65535, %v6299_v18  ;;  %v833_v37 = vshrl.u32 %v784_v12, 15 }
 0x14e   : >> { %7866 = vst [vmem:[#allocation321_spill] sm:$0xff] %v6301_v20  ;;  %v1068_v38 = vand.u32 65535, %v6301_v20  ;;  %v832_v54 = vshrl.u32 %v783_v7, 15  ;;  %v6305_v10 = vxor.u32 %v973_v29, %v924_v11  ;;  %v972_v46 = vshrl.u32 %v923_v9, 16 }
 0x14f   : >> { %v929_v27 = vmul.u32 2221713035, %v880_v6  ;;  %v879_v23 = vxor.u32 %v830_v52, %v781_v1  ;;  %vm1118_vm0 = vcmp.gt.s32.totalorder %v7868_v44, %v1069_v41  ;;  %v882_v58 = vxor.u32 %v833_v37, %v784_v12  ;;  %v7872_v41 = vld [vmem:[#allocation102_spill] sm:$0xff]  ;;  %v7873_v1 = vld [vmem:[#allocation64_spill] sm:$0xff] }
 0x150   : >> { %7867 = vst [vmem:[#allocation322_spill] sm:$0xff] %v6305_v10  ;;  %vm1117_vm1 = vcmp.gt.s32.totalorder %v7869_v35, %v1068_v38  ;;  %v881_v63 = vxor.u32 %v832_v54, %v783_v7  ;;  %2940 = vmatprep.mubr.msk.f32.mxu0 %vm1118_vm0, %v7848_v14  ;;  %v1071_v43 = vand.u32 65535, %v6305_v10  ;;  %v6311_v57 = vxor.u32 %v972_v46, %v923_v9  ;;  %v7875_v46 = vld [vmem:[#allocation63_spill] sm:$0xff]  ;;  %v7877_v35 = vld [vmem:[#allocation108_spill] sm:$0xff] }
 0x151   : >> { %v978_v5 = vshrl.u32 %v929_v27, 16  ;;  %v928_v60 = vmul.u32 2221713035, %v879_v23  ;;  %2941 = vmatmul.mubr.msk.f32.gmra.mrb[8].mxu0 %vm1117_vm1, %v7848_v14  ;;  %v931_v11 = vmul.u32 2221713035, %v882_v58  ;;  %v642_v52 = vxor.u32 %v6095_v15, %v7871_v62  ;;  %v7880_v62 = vld [vmem:[#allocation77_spill] sm:$0xff] }
 0x152   : >> { %7870 = vst [vmem:[#allocation323_spill] sm:$0xff] %v6311_v57  ;;  %v930_v19 = vmul.u32 2221713035, %v881_v63  ;;  %v641_v28 = vxor.u32 %v6095_v15, %v7872_v41  ;;  %vm1120_vm2 = vcmp.gt.s32.totalorder %v7873_v1, %v1071_v43  ;;  %v1070_v7 = vand.u32 65535, %v6311_v57 }
 0x153   : >> { %v6320_v29 = vxor.u32 %v978_v5, %v929_v27  ;;  %v977_v9 = vshrl.u32 %v928_v60, 16  ;;  %2954 = vmatprep.mubr.msk.f32.mxu1 %vm1120_vm2, %v7848_v14  ;;  %v980_v6 = vshrl.u32 %v931_v11, 16  ;;  %v691_v37 = vshrl.u32 %v642_v52, 16 }
 0x154   : >> { %v979_v38 = vshrl.u32 %v930_v19, 16  ;;  %v690_v54 = vshrl.u32 %v641_v28, 16  ;;  %vm1119_vm3 = vcmp.gt.s32.totalorder %v7875_v46, %v1070_v7  ;;  %v644_v58 = vxor.u32 %v6095_v15, %v7877_v35  ;;  %v7881_v46 = vld [vmem:[#allocation104_spill] sm:$0xff] }
 0x155   : >> { %7874 = vst [vmem:[#allocation324_spill] sm:$0xff] %v6320_v29  ;;  %v1076_v23 = vand.u32 65535, %v6320_v29  ;;  %v6325_v44 = vxor.u32 %v977_v9, %v928_v60  ;;  %2955 = vmatmul.mubr.msk.f32.gmra.mrb[8].mxu1 %vm1119_vm3, %v7848_v14  ;;  %v6330_v27 = vxor.u32 %v980_v6, %v931_v11  ;;  %v740_v43 = vxor.u32 %v691_v37, %v642_v52 }
 0x156   : >> { %v6332_v63 = vxor.u32 %v979_v38, %v930_v19  ;;  %v739_v5 = vxor.u32 %v690_v54, %v641_v28  ;;  %v693_v7 = vshrl.u32 %v644_v58, 16  ;;  %v643_v60 = vxor.u32 %v6095_v15, %v7881_v46  ;;  %v7882_v19 = vld [vmem:[#allocation72_spill] sm:$0xff]  ;;  %v7883_v38 = vld [vmem:[#allocation38_spill] sm:$0xff]  ;;  %v7884_v54 = vld [vmem:[#allocation79_spill] sm:$0xff] }
 0x157   : >> { %7876 = vst [vmem:[#allocation325_spill] sm:$0xff] %v6325_v44  ;;  %7878 = vst [vmem:[#allocation326_spill] sm:$0xff] %v6330_v27  ;;  %vm1125_vm4 = vcmp.gt.s32.totalorder %v7880_v62, %v1076_v23  ;;  %v1075_v1 = vand.u32 65535, %v6325_v44  ;;  %v1078_v9 = vand.u32 65535, %v6330_v27  ;;  %v789_v11 = vmul.u32 2146121005, %v740_v43 }
 0x158   : >> { %7879 = vst [vmem:[#allocation327_spill] sm:$0xff] %v6332_v63  ;;  %2942 = vmatprep.mubr.msk.f32.mxu0 %vm1125_vm4, %v7848_v14  ;;  %v1077_v35 = vand.u32 65535, %v6332_v63  ;;  %v788_v6 = vmul.u32 2146121005, %v739_v5  ;;  %v742_v52 = vxor.u32 %v693_v7, %v644_v58  ;;  %v692_v28 = vshrl.u32 %v643_v60, 16  ;;  %v7885_v46 = vld [vmem:[#allocation78_spill] sm:$0xff] }
 0x159   : >> { %vm1124_vm5 = vcmp.gt.s32.totalorder %v7882_v19, %v1075_v1  ;;  %v604_v37 = vxor.u32 %v6095_v15, %v7883_v38  ;;  %vm1127_vm6 = vcmp.gt.s32.totalorder %v7884_v54, %v1078_v9  ;;  %v838_v23 = vshrl.u32 %v789_v11, 15  ;;  %v7886_v27 = vld [vmem:[#allocation34_spill] sm:$0xff]  ;;  %v7887_v19 = vld [vmem:[#allocation48_spill] sm:$0xff]  ;;  %v7888_v9 = vld [vmem:[#allocation47_spill] sm:$0xff] }
 0x15a   : >> { %2943 = vmatmul.mubr.msk.f32.gmra.mrb[10].mxu0 %vm1124_vm5, %v7848_v14  ;;  %vm1126_vm7 = vcmp.gt.s32.totalorder %v7885_v46, %v1077_v35  ;;  %v837_v62 = vshrl.u32 %v788_v6, 15  ;;  %2956 = vmatprep.mubr.msk.f32.mxu1 %vm1127_vm6, %v7848_v14  ;;  %v791_v63 = vmul.u32 2146121005, %v742_v52  ;;  %v741_v43 = vxor.u32 %v692_v28, %v643_v60 }
 0x15b   : >> { %v653_v5 = vshrl.u32 %v604_v37, 16  ;;  %v603_v58 = vxor.u32 %v6095_v15, %v7886_v27  ;;  %2957 = vmatmul.mubr.msk.f32.gmra.mrb[10].mxu1 %vm1126_vm7, %v7848_v14  ;;  %v887_v1 = vxor.u32 %v838_v23, %v789_v11  ;;  %v611_v38 = vxor.u32 %v6095_v15, %v7887_v19 }
 0x15c   : >> { %v886_v7 = vxor.u32 %v837_v62, %v788_v6  ;;  %v610_v35 = vxor.u32 %v6095_v15, %v7888_v9  ;;  %v840_v46 = vshrl.u32 %v791_v63, 15  ;;  %v790_v54 = vmul.u32 2146121005, %v741_v43 }
 0x15d   : >> { %v702_v57 = vxor.u32 %v653_v5, %v604_v37  ;;  %v652_v10 = vshrl.u32 %v603_v58, 16  ;;  %v936_v52 = vmul.u32 2221713035, %v887_v1  ;;  %v660_v28 = vshrl.u32 %v611_v38, 16 }
 0x15e   : >> { %v935_v60 = vmul.u32 2221713035, %v886_v7  ;;  %v659_v12 = vshrl.u32 %v610_v35, 16  ;;  %v889_v41 = vxor.u32 %v840_v46, %v791_v63  ;;  %v839_v27 = vshrl.u32 %v790_v54, 15 }
 0x15f   : >> { %v751_v44 = vmul.u32 2146121005, %v702_v57  ;;  %v701_v29 = vxor.u32 %v652_v10, %v603_v58  ;;  %v985_v11 = vshrl.u32 %v936_v52, 16  ;;  %v709_v23 = vxor.u32 %v660_v28, %v611_v38 }
 0x160   : >> { %v984_v6 = vshrl.u32 %v935_v60, 16  ;;  %v708_v62 = vxor.u32 %v659_v12, %v610_v35  ;;  %v938_v19 = vmul.u32 2221713035, %v889_v41  ;;  %v888_v17 = vxor.u32 %v839_v27, %v790_v54  ;;  %v7892_v35 = vld [vmem:[#allocation92_spill] sm:$0xff] }
 0x161   : >> { %v800_v25 = vshrl.u32 %v751_v44, 15  ;;  %v750_v9 = vmul.u32 2146121005, %v701_v29  ;;  %v6355_v20 = vxor.u32 %v985_v11, %v936_v52  ;;  %v758_v43 = vmul.u32 2146121005, %v709_v23 }
 0x162   : >> { %v6357_v37 = vxor.u32 %v984_v6, %v935_v60  ;;  %v757_v5 = vmul.u32 2146121005, %v708_v62  ;;  %v987_v1 = vshrl.u32 %v938_v19, 16  ;;  %v937_v7 = vmul.u32 2221713035, %v888_v17  ;;  %v7893_v60 = vld [vmem:[#allocation91_spill] sm:$0xff] }
 0x163   : >> { %7889 = vst [vmem:[#allocation328_spill] sm:$0xff] %v6355_v20  ;;  %v849_v63 = vxor.u32 %v800_v25, %v751_v44  ;;  %v799_v46 = vshrl.u32 %v750_v9, 15  ;;  %v1083_v10 = vand.u32 65535, %v6355_v20  ;;  %v807_v58 = vshrl.u32 %v758_v43, 15 }
 0x164   : >> { %7890 = vst [vmem:[#allocation329_spill] sm:$0xff] %v6357_v37  ;;  %v1082_v57 = vand.u32 65535, %v6357_v37  ;;  %v806_v12 = vshrl.u32 %v757_v5, 15  ;;  %v6361_v41 = vxor.u32 %v987_v1, %v938_v19  ;;  %v986_v54 = vshrl.u32 %v937_v7, 16  ;;  %v7895_v19 = vld [vmem:[#allocation39_spill] sm:$0xff]  ;;  %v7896_v1 = vld [vmem:[#allocation61_spill] sm:$0xff] }
 0x165   : >> { %v898_v29 = vmul.u32 2221713035, %v849_v63  ;;  %v848_v38 = vxor.u32 %v799_v46, %v750_v9  ;;  %vm1132_vm8 = vcmp.gt.s32.totalorder %v7892_v35, %v1083_v10  ;;  %v856_v28 = vxor.u32 %v807_v58, %v758_v43  ;;  %v7897_v43 = vld [vmem:[#allocation98_spill] sm:$0xff] }
 0x166   : >> { %7891 = vst [vmem:[#allocation330_spill] sm:$0xff] %v6361_v41  ;;  %vm1131_vm9 = vcmp.gt.s32.totalorder %v7893_v60, %v1082_v57  ;;  %v855_v27 = vxor.u32 %v806_v12, %v757_v5  ;;  %2944 = vmatprep.mubr.msk.f32.mxu0 %vm1132_vm8, %v7848_v14  ;;  %v1085_v25 = vand.u32 65535, %v6361_v41  ;;  %v6367_v17 = vxor.u32 %v986_v54, %v937_v7  ;;  %v7899_v54 = vld [vmem:[#allocation93_spill] sm:$0xff]  ;;  %v7901_v60 = vld [vmem:[#allocation60_spill] sm:$0xff] }
 0x167   : >> { %v947_v44 = vshrl.u32 %v898_v29, 16  ;;  %v897_v6 = vmul.u32 2221713035, %v848_v38  ;;  %2945 = vmatmul.mubr.msk.f32.gmra.mrb[12].mxu0 %vm1131_vm9, %v7848_v14  ;;  %v905_v23 = vmul.u32 2221713035, %v856_v28  ;;  %v605_v9 = vxor.u32 %v6095_v15, %v7895_v19  ;;  %v7904_v19 = vld [vmem:[#allocation17_spill] sm:$0xff] }
 0x168   : >> { %7894 = vst [vmem:[#allocation331_spill] sm:$0xff] %v6367_v17  ;;  %v904_v62 = vmul.u32 2221713035, %v855_v27  ;;  %v618_v63 = vxor.u32 %v6095_v15, %v7896_v1  ;;  %vm1134_vm10 = vcmp.gt.s32.totalorder %v7897_v43, %v1085_v25  ;;  %v1084_v5 = vand.u32 65535, %v6367_v17 }
 0x169   : >> { %v6376_v46 = vxor.u32 %v947_v44, %v898_v29  ;;  %v946_v7 = vshrl.u32 %v897_v6, 16  ;;  %2958 = vmatprep.mubr.msk.f32.mxu1 %vm1134_vm10, %v7848_v14  ;;  %v954_v10 = vshrl.u32 %v905_v23, 16  ;;  %v654_v58 = vshrl.u32 %v605_v9, 16 }
 0x16a   : >> { %v953_v57 = vshrl.u32 %v904_v62, 16  ;;  %v667_v12 = vshrl.u32 %v618_v63, 16  ;;  %vm1133_vm11 = vcmp.gt.s32.totalorder %v7899_v54, %v1084_v5  ;;  %v617_v28 = vxor.u32 %v6095_v15, %v7901_v60 }
 0x16b   : >> { %7898 = vst [vmem:[#allocation332_spill] sm:$0xff] %v6376_v46  ;;  %v1045_v38 = vand.u32 65535, %v6376_v46  ;;  %v6381_v35 = vxor.u32 %v946_v7, %v897_v6  ;;  %2959 = vmatmul.mubr.msk.f32.gmra.mrb[12].mxu1 %vm1133_vm11, %v7848_v14  ;;  %v6386_v29 = vxor.u32 %v954_v10, %v905_v23  ;;  %v703_v25 = vxor.u32 %v654_v58, %v605_v9  ;;  %v7905_v7 = vld [vmem:[#allocation52_spill] sm:$0xff] }
 0x16c   : >> { %v6388_v27 = vxor.u32 %v953_v57, %v904_v62  ;;  %v716_v44 = vxor.u32 %v667_v12, %v618_v63  ;;  %vm4860_vm13 = vmmov 0   ;;  %v7366_v5 = vmov 0.0   ;;  %v7906_v10 = vld [vmem:[#allocation16_spill] sm:$0xff]  ;;  %v7913_v57 = vld [vmem:[#allocation62_spill] sm:$0xff] }
 0x16d   : >> { %7900 = vst [vmem:[#allocation333_spill] sm:$0xff] %v6381_v35  ;;  %7902 = vst [vmem:[#allocation334_spill] sm:$0xff] %v6386_v29  ;;  %vm1094_vm12 = vcmp.gt.s32.totalorder %v7904_v19, %v1045_v38  ;;  %v1044_v1 = vand.u32 65535, %v6381_v35  ;;  %3567 = vmatprep.mubr.msk.f32.mxu1 %vm4860_vm13, %v7366_v5  ;;  %v666_v6 = vshrl.u32 %v617_v28, 16  ;;  %v612_v60 = vxor.u32 %v6095_v15, %v7905_v7  ;;  %v7907_v38 = vld [vmem:[#allocation74_spill] sm:$0xff]  ;;  %v7908_v5 = vld [vmem:[#allocation24_spill] sm:$0xff] }
 0x16e   : >> { %7903 = vst [vmem:[#allocation335_spill] sm:$0xff] %v6388_v27  ;;  %2960 = vmatprep.mubr.msk.f32.mxu0 %vm1094_vm12, %v7848_v14  ;;  %v1052_v23 = vand.u32 65535, %v6386_v29  ;;  %v1051_v62 = vand.u32 65535, %v6388_v27  ;;  %v752_v9 = vmul.u32 2146121005, %v703_v25  ;;  %v625_v19 = vxor.u32 %v6095_v15, %v7907_v38  ;;  %v7909_v7 = vld [vmem:[#allocation23_spill] sm:$0xff] }
 0x16f   : >> { %v765_v63 = vmul.u32 2146121005, %v716_v44  ;;  %vm1093_vm14 = vcmp.gt.s32.totalorder %v7906_v10, %v1044_v1  ;;  %v715_v58 = vxor.u32 %v666_v6, %v617_v28  ;;  %v661_v12 = vshrl.u32 %v612_v60, 16  ;;  %v7912_v1 = vld [vmem:[#allocation73_spill] sm:$0xff] }
 0x170   : >> { %2961 = vmatmul.mubr.msk.f32.vlgmr.msra.gmra.mrb[14].mxu0 %vm1093_vm14, %v7848_v14  ;;  %vm1101_vm15 = vcmp.gt.s32.totalorder %v7908_v5, %v1052_v23  ;;  %vm6405_vm0 = vcmp.gt.s32.totalorder %v7909_v7, %v1051_v62  ;;  %v801_v29 = vshrl.u32 %v752_v9, 15  ;;  %v674_v28 = vshrl.u32 %v625_v19, 16  ;;  %v7914_v23 = vld [vmem:[#allocation87_spill] sm:$0xff] }
 0x171   : >> { %v814_v27 = vshrl.u32 %v765_v63, 15  ;;  %2962 = vmatprep.mubr.msk.f32.mxu0 %vm1101_vm15, %v7848_v14  ;;  %v764_v25 = vmul.u32 2146121005, %v715_v58  ;;  %v710_v44 = vxor.u32 %v661_v12, %v612_v60  ;;  %v624_v6 = vxor.u32 %v6095_v15, %v7912_v1 }
 0x172   : >> { %v850_v10 = vxor.u32 %v801_v29, %v752_v9  ;;  %v619_v5 = vxor.u32 %v6095_v15, %v7913_v57  ;;  %v632_v62 = vxor.u32 %v6095_v15, %v7914_v23  ;;  %v723_v54 = vxor.u32 %v674_v28, %v625_v19 }
 0x173   : >> { %v863_v38 = vxor.u32 %v814_v27, %v765_v63  ;;  %v813_v7 = vshrl.u32 %v764_v25, 15  ;;  %v759_v17 = vmul.u32 2146121005, %v710_v44  ;;  %v673_v43 = vshrl.u32 %v624_v6, 16 }
 0x174   : >> { %2963 = vmatmul.mubr.msk.f32.gmra.mrb[16].mxu0 %vm6405_vm0, %v7848_v14  ;;  %v899_v60 = vmul.u32 2221713035, %v850_v10  ;;  %v668_v12 = vshrl.u32 %v619_v5, 16  ;;  %v681_v1 = vshrl.u32 %v632_v62, 16  ;;  %v772_v9 = vmul.u32 2146121005, %v723_v54 }
 0x175   : >> { %v912_v58 = vmul.u32 2221713035, %v863_v38  ;;  %v862_v29 = vxor.u32 %v813_v7, %v764_v25  ;;  %v808_v27 = vshrl.u32 %v759_v17, 15  ;;  %v722_v63 = vxor.u32 %v673_v43, %v624_v6 }
 0x176   : >> { %v948_v57 = vshrl.u32 %v899_v60, 16  ;;  %v717_v46 = vxor.u32 %v668_v12, %v619_v5  ;;  %v730_v23 = vxor.u32 %v681_v1, %v632_v62  ;;  %v821_v19 = vshrl.u32 %v772_v9, 15  ;;  %v7917_v1 = vld [vmem:[#allocation18_spill] sm:$0xff] }
 0x177   : >> { %v961_v35 = vshrl.u32 %v912_v58, 16  ;;  %v911_v11 = vmul.u32 2221713035, %v862_v29  ;;  %v857_v44 = vxor.u32 %v808_v27, %v759_v17  ;;  %v771_v28 = vmul.u32 2146121005, %v722_v63 }
 0x178   : >> { %v6419_v52 = vxor.u32 %v948_v57, %v899_v60  ;;  %v766_v10 = vmul.u32 2146121005, %v717_v46  ;;  %v779_v38 = vmul.u32 2146121005, %v730_v23  ;;  %v870_v25 = vxor.u32 %v821_v19, %v772_v9 }
 0x179   : >> { %v6421_v41 = vxor.u32 %v961_v35, %v912_v58  ;;  %v960_v37 = vshrl.u32 %v911_v11, 16  ;;  %v906_v20 = vmul.u32 2221713035, %v857_v44  ;;  %v820_v7 = vshrl.u32 %v771_v28, 15  ;;  %v7918_v35 = vld [vmem:[#allocation36_spill] sm:$0xff]  ;;  %v7921_v44 = vld [vmem:[#allocation83_spill] sm:$0xff] }
 0x17a   : >> { %7915 = vst [vmem:[#allocation336_spill] sm:$0xff] %v6419_v52  ;;  %v1046_v43 = vand.u32 65535, %v6419_v52  ;;  %v815_v6 = vshrl.u32 %v766_v10, 15  ;;  %v828_v5 = vshrl.u32 %v779_v38, 15  ;;  %v919_v12 = vmul.u32 2221713035, %v870_v25 }
 0x17b   : >> { %v1059_v54 = vand.u32 65535, %v6421_v41  ;;  %v6425_v62 = vxor.u32 %v960_v37, %v911_v11  ;;  %v955_v17 = vshrl.u32 %v906_v20, 16  ;;  %v869_v60 = vxor.u32 %v820_v7, %v771_v28  ;;  %v7922_v28 = vld [vmem:[#allocation75_spill] sm:$0xff] }
 0x17c   : >> { %vm1095_vm1 = vcmp.gt.s32.totalorder %v7917_v1, %v1046_v43  ;;  %v864_v46 = vxor.u32 %v815_v6, %v766_v10  ;;  %v877_v58 = vxor.u32 %v828_v5, %v779_v38  ;;  %v968_v9 = vshrl.u32 %v919_v12, 16  ;;  %v7923_v38 = vld [vmem:[#allocation276_spill] sm:$0xff]  ;;  %v7924_v25 = vld [vmem:[#allocation35_spill] sm:$0xff]  ;;  %v7927_v1 = vld [vmem:[#allocation25_spill] sm:$0xff] }
 0x17d   : >> { %7916 = vst [vmem:[#allocation337_spill] sm:$0xff] %v6425_v62  ;;  %vm1108_vm2 = vcmp.gt.s32.totalorder %v7918_v35, %v1059_v54  ;;  %3568 = vmatmul.mubr.msk.f32.vlgmr.msra.gmra.mrb[14].mxu1 %vm1095_vm1, %v7848_v14  ;;  %v1058_v29 = vand.u32 65535, %v6425_v62  ;;  %v6432_v27 = vxor.u32 %v955_v17, %v906_v20  ;;  %v918_v37 = vmul.u32 2221713035, %v869_v60  ;;  %v7926_v54 = vld [vmem:[#allocation278_spill] sm:$0xff]  ;;  %v7945_v62 = vld [vmem:[#allocation288_spill] sm:$0xff] }
 0x17e   : >> { %2964 = vmatprep.mubr.msk.f32.mxu0 %vm1108_vm2, %v7848_v14  ;;  %v7920_v11 = vmov 0.0   ;;  %v913_v63 = vmul.u32 2221713035, %v864_v46  ;;  %v926_v23 = vmul.u32 2221713035, %v877_v58  ;;  %v631_v19 = vxor.u32 %v6095_v15, %v7921_v44  ;;  %3894 = vmatpush3.bf16.msra.mxu1 %v7923_v38 }
 0x17f   : >> { %7919 = vst [vmem:[#allocation338_spill] sm:$0xff] %v6432_v27  ;;  %3570 = vmatprep.mubr.msk.f32.mxu1 %vm4860_vm13, %v7920_v11  ;;  %v626_v10 = vxor.u32 %v6095_v15, %v7922_v28  ;;  %vm1107_vm3 = vcmp.gt.s32.totalorder %v7924_v25, %v1058_v29  ;;  %v1053_v20 = vand.u32 65535, %v6432_v27  ;;  %v6443_v7 = vxor.u32 %v968_v9, %v919_v12  ;;  %v7929_v29 = vld [vmem:[#allocation97_spill] sm:$0xff] }
 0x180   : >> { %v967_v43 = vshrl.u32 %v918_v37, 16  ;;  %3896 = vmatprep.subr.bf16.mxu1 %v7926_v54  ;;  %2965 = vmatmul.mubr.msk.f32.gmra.mrb[18].mxu0 %vm1107_vm3, %v7848_v14  ;;  %v962_v6 = vshrl.u32 %v913_v63, 16  ;;  %v975_v5 = vshrl.u32 %v926_v23, 16  ;;  %v680_v17 = vshrl.u32 %v631_v19, 16  ;;  %v7932_v54 = vld [vmem:[#allocation51_spill] sm:$0xff] }
 0x181   : >> { %7925 = vst [vmem:[#allocation276_spill] sm:$0xff] %v6443_v7  ;;  %v675_v60 = vshrl.u32 %v626_v10, 16  ;;  %vm1102_vm4 = vcmp.gt.s32.totalorder %v7927_v1, %v1053_v20  ;;  %v1066_v35 = vand.u32 65535, %v6443_v7  ;;  %v639_v44 = vxor.u32 %v6095_v15, %v7929_v29  ;;  %v7933_v20 = vld [vmem:[#allocation96_spill] sm:$0xff]  ;;  %v7934_v1 = vld [vmem:[#allocation281_spill] sm:$0xff] }
 0x182   : >> { %v6449_v58 = vxor.u32 %v967_v43, %v918_v37  ;;  %3571 = vmatmul.mubr.msk.f32.gmra.mrb[16].mxu1 %vm1102_vm4, %v7848_v14  ;;  %v6454_v12 = vxor.u32 %v962_v6, %v913_v63  ;;  %v6456_v9 = vxor.u32 %v975_v5, %v926_v23  ;;  %v729_v28 = vxor.u32 %v680_v17, %v631_v19  ;;  %v7935_v6 = vld [vmem:[#allocation282_spill] sm:$0xff]  ;;  %v7937_v29 = vld [vmem:[#allocation88_spill] sm:$0xff] }
 0x183   : >> { %v724_v38 = vxor.u32 %v675_v60, %v626_v10  ;;  %vm1115_vm5 = vcmp.gt.s32.totalorder %v7932_v54, %v1066_v35  ;;  %3573 = vmatprep.mubr.msk.f32.mxu1 %vm4860_vm13, %v7920_v11  ;;  %v688_v37 = vshrl.u32 %v639_v44, 16  ;;  %v638_v43 = vxor.u32 %v6095_v15, %v7933_v20  ;;  %3898 = vmatpush3.bf16.msra.mxu1 %v7934_v1  ;;  %v7936_v5 = vld [vmem:[#allocation50_spill] sm:$0xff]  ;;  %v7938_v20 = vld [vmem:[#allocation37_spill] sm:$0xff] }
 0x184   : >> { %7928 = vst [vmem:[#allocation278_spill] sm:$0xff] %v6449_v58  ;;  %7930 = vst [vmem:[#allocation339_spill] sm:$0xff] %v6454_v12  ;;  %v1065_v46 = vand.u32 65535, %v6449_v58  ;;  %2966 = vmatprep.mubr.msk.f32.mxu0 %vm1115_vm5, %v7848_v14  ;;  %v1060_v63 = vand.u32 65535, %v6454_v12  ;;  %v1073_v23 = vand.u32 65535, %v6456_v9  ;;  %3900 = vmatprep.subr.bf16.mxu1 %v7935_v6  ;;  %v633_v27 = vxor.u32 %v6095_v15, %v7937_v29  ;;  %v7939_v1 = vld [vmem:[#allocation70_spill] sm:$0xff] }
 0x185   : >> { %7931 = vst [vmem:[#allocation340_spill] sm:$0xff] %v6456_v9  ;;  %v778_v19 = vmul.u32 2146121005, %v729_v28  ;;  %v773_v10 = vmul.u32 2146121005, %v724_v38  ;;  %v737_v60 = vxor.u32 %v688_v37, %v639_v44  ;;  %v687_v35 = vshrl.u32 %v638_v43, 16 }
 0x186   : >> { %vm1114_vm6 = vcmp.gt.s32.totalorder %v7936_v5, %v1065_v46  ;;  %vm1109_vm7 = vcmp.gt.s32.totalorder %v7938_v20, %v1060_v63  ;;  %vm1122_vm8 = vcmp.gt.s32.totalorder %v7939_v1, %v1073_v23  ;;  %v682_v46 = vshrl.u32 %v633_v27, 16  ;;  %v7940_v44 = vld [vmem:[#allocation110_spill] sm:$0xff]  ;;  %v7941_v63 = vld [vmem:[#allocation109_spill] sm:$0xff] }
 0x187   : >> { %2967 = vmatmul.mubr.msk.f32.gmra.mrb[20].mxu0 %vm1114_vm6, %v7848_v14  ;;  %v827_v12 = vshrl.u32 %v778_v19, 15  ;;  %v822_v54 = vshrl.u32 %v773_v10, 15  ;;  %3574 = vmatmul.mubr.msk.f32.gmra.mrb[18].mxu1 %vm1109_vm7, %v7848_v14  ;;  %v786_v28 = vmul.u32 2146121005, %v737_v60  ;;  %v736_v38 = vxor.u32 %v687_v35, %v638_v43  ;;  %v7942_v29 = vld [vmem:[#allocation101_spill] sm:$0xff]  ;;  %v7943_v43 = vld [vmem:[#allocation284_spill] sm:$0xff] }
 0x188   : >> { %2968 = vmatprep.mubr.msk.f32.mxu0 %vm1122_vm8, %v7848_v14  ;;  %v646_v37 = vxor.u32 %v6095_v15, %v7940_v44  ;;  %3576 = vmatprep.mubr.msk.f32.mxu1 %vm4860_vm13, %v7920_v11  ;;  %v645_v23 = vxor.u32 %v6095_v15, %v7941_v63  ;;  %v640_v20 = vxor.u32 %v6095_v15, %v7942_v29 }
 0x189   : >> { %v876_v6 = vxor.u32 %v827_v12, %v778_v19  ;;  %v871_v5 = vxor.u32 %v822_v54, %v773_v10  ;;  %v835_v1 = vshrl.u32 %v786_v28, 15  ;;  %v785_v57 = vmul.u32 2146121005, %v736_v38  ;;  %3902 = vmatpush3.bf16.msra.mxu1 %v7943_v43  ;;  %v7944_v19 = vld [vmem:[#allocation286_spill] sm:$0xff] }
 0x18a   : >> { %v731_v52 = vxor.u32 %v682_v46, %v633_v27  ;;  %v695_v60 = vshrl.u32 %v646_v37, 16  ;;  %v694_v44 = vshrl.u32 %v645_v23, 16  ;;  %v689_v12 = vshrl.u32 %v640_v20, 16  ;;  %3904 = vmatprep.subr.bf16.mxu1 %v7944_v19 }
 0x18b   : >> { %v925_v35 = vmul.u32 2221713035, %v876_v6  ;;  %v920_v9 = vmul.u32 2221713035, %v871_v5  ;;  %v884_v17 = vxor.u32 %v835_v1, %v786_v28  ;;  %v834_v54 = vshrl.u32 %v785_v57, 15  ;;  %v7946_v28 = vld [vmem:[#allocation290_spill] sm:$0xff] }
 0x18c   : >> { %v780_v10 = vmul.u32 2146121005, %v731_v52  ;;  %v744_v58 = vxor.u32 %v695_v60, %v646_v37  ;;  %v743_v25 = vxor.u32 %v694_v44, %v645_v23  ;;  %v738_v29 = vxor.u32 %v689_v12, %v640_v20  ;;  %v7949_v44 = vld [vmem:[#allocation56_spill] sm:$0xff] }
 0x18d   : >> { %v974_v63 = vshrl.u32 %v925_v35, 16  ;;  %v969_v7 = vshrl.u32 %v920_v9, 16  ;;  %v933_v18 = vmul.u32 2221713035, %v884_v17  ;;  %v883_v38 = vxor.u32 %v834_v54, %v785_v57  ;;  %3906 = vmatpush3.bf16.msra.mxu1 %v7945_v62 }
 0x18e   : >> { %v829_v27 = vshrl.u32 %v780_v10, 15  ;;  %v793_v46 = vmul.u32 2146121005, %v744_v58  ;;  %v792_v43 = vmul.u32 2146121005, %v743_v25  ;;  %3908 = vmatprep.subr.bf16.mxu1 %v7946_v28  ;;  %v7948_v25 = vld [vmem:[#allocation65_spill] sm:$0xff]  ;;  %v7950_v12 = vmov %v7949_v44 }
 0x18f   : >> { %v6488_v6 = vxor.u32 %v974_v63, %v925_v35  ;;  %v6490_v5 = vxor.u32 %v969_v7, %v920_v9  ;;  %v787_v19 = vmul.u32 2146121005, %v738_v29  ;;  %v982_v52 = vshrl.u32 %v933_v18, 16  ;;  %v7947_v9 = vld [vmem:[#allocation292_spill] sm:$0xff]  ;;  %v7951_v28 = vld [vmem:[#allocation111_spill] sm:$0xff] }
 0x190   : >> { %v932_v37 = vmul.u32 2221713035, %v883_v38  ;;  %v878_v1 = vxor.u32 %v829_v27, %v780_v10  ;;  %v842_v60 = vshrl.u32 %v793_v46, 15  ;;  %v841_v17 = vshrl.u32 %v792_v43, 15 }
 0x191   : >> { %v1072_v23 = vand.u32 65535, %v6488_v6  ;;  %v1067_v57 = vand.u32 65535, %v6490_v5  ;;  %v836_v58 = vshrl.u32 %v787_v19, 15  ;;  %v6495_v20 = vxor.u32 %v982_v52, %v933_v18  ;;  %3910 = vmatpush3.bf16.msra.mxu1 %v7947_v9 }
 0x192   : >> { %v981_v62 = vshrl.u32 %v932_v37, 16  ;;  %v927_v35 = vmul.u32 2221713035, %v878_v1  ;;  %v891_v7 = vxor.u32 %v842_v60, %v793_v46  ;;  %v890_v54 = vxor.u32 %v841_v17, %v792_v43  ;;  %3912 = vmatprep.subr.bf16.mxu1 %v5959_v53  ;;  %v7953_v53 = vld [vmem:[#allocation223_spill] sm:$0xff]  ;;  %v7954_v1 = vld [vmem:[#allocation85_spill] sm:$0xff] }
 0x193   : >> { %vm1121_vm9 = vcmp.gt.s32.totalorder %v7948_v25, %v1072_v23  ;;  %vm1116_vm10 = vcmp.gt.s32.totalorder %v7949_v44, %v1067_v57  ;;  %v885_v10 = vxor.u32 %v836_v58, %v787_v19  ;;  %v1080_v18 = vand.u32 65535, %v6495_v20  ;;  %v7952_v19 = vld [vmem:[#allocation222_spill] sm:$0xff]  ;;  %v7958_v44 = vld [vmem:[#allocation225_spill] sm:$0xff] }
 0x194   : >> { %2969 = vmatmul.mubr.msk.f32.gmra.mrb[22].mxu0 %vm1121_vm9, %v7848_v14  ;;  %3577 = vmatmul.mubr.msk.f32.gmra.mrb[20].mxu1 %vm1116_vm10, %v7848_v14  ;;  %v6504_v63 = vxor.u32 %v981_v62, %v932_v37  ;;  %v976_v29 = vshrl.u32 %v927_v35, 16  ;;  %v940_v38 = vmul.u32 2221713035, %v891_v7  ;;  %v939_v27 = vmul.u32 2221713035, %v890_v54 }
 0x195   : >> { %3579 = vmatprep.mubr.msk.f32.mxu1 %vm4860_vm13, %v7920_v11  ;;  %v934_v46 = vmul.u32 2221713035, %v885_v10  ;;  %v647_v43 = vxor.u32 %v6095_v15, %v7951_v28  ;;  %v6512_v52 = vpack.c.bf16 %v7953_v53, %v7952_v19  ;;  %v7955_v23 = vmov %v7954_v1  ;;  %3914 = vmatpush3.bf16.msra.mxu1 %v5967_v33  ;;  %v7956_v15 = vld [vmem:[#allocation84_spill] sm:$0xff] }
 0x196   : >> { %vm1129_vm11 = vcmp.gt.s32.totalorder %v7954_v1, %v1080_v18  ;;  %v1079_v60 = vand.u32 65535, %v6504_v63  ;;  %v6516_v37 = vxor.u32 %v976_v29, %v927_v35  ;;  %v989_v57 = vshrl.u32 %v940_v38, 16  ;;  %v7957_v35 = vld [vmem:[#allocation224_spill] sm:$0xff]  ;;  %3916 = vmatprep.subr.bf16.mxu1 %v5977_v26  ;;  %v7959_v29 = vld [vmem:[#allocation71_spill] sm:$0xff] }
 0x197   : >> { %2970 = vmatprep.mubr.msk.f32.mxu0 %vm1129_vm11, %v7848_v14  ;;  %v988_v17 = vshrl.u32 %v939_v27, 16  ;;  %v983_v58 = vshrl.u32 %v934_v46, 16  ;;  %v696_v62 = vshrl.u32 %v647_v43, 16  ;;  %3869 = vmatpush3.bf16.msra.mxu0 %v6512_v52  ;;  %v6528_v54 = vpack.c.bf16 %v7958_v44, %v7957_v35  ;;  %v7967_v35 = vld [vmem:[#allocation105_spill] sm:$0xff]  ;;  %v7969_v44 = vld [vmem:[#allocation228_spill] sm:$0xff] }
 0x198   : >> { %vm1128_vm12 = vcmp.gt.s32.totalorder %v7956_v15, %v1079_v60  ;;  %v1074_v7 = vand.u32 65535, %v6516_v37  ;;  %v6523_v9 = vxor.u32 %v989_v57, %v940_v38  ;;  %3870 = vmatprep.subr.bf16.mxu0 %v7837_v36  ;;  %v7960_v53 = vmov %v7959_v29 }
 0x199   : >> { %2971 = vmatmul.mubr.msk.f32.gmra.mrb[24].mxu0 %vm1128_vm12, %v7848_v14  ;;  %v6532_v33 = vxor.u32 %v988_v17, %v939_v27  ;;  %v6534_v10 = vxor.u32 %v983_v58, %v934_v46  ;;  %v745_v18 = vxor.u32 %v696_v62, %v647_v43  ;;  %3918 = vmatpush3.bf16.msra.mxu1 %v5985_v32  ;;  %v7961_v27 = vld [vmem:[#allocation100_spill] sm:$0xff]  ;;  %v7963_v46 = vld [vmem:[#allocation99_spill] sm:$0xff]  ;;  %v7964_v32 = vld [vmem:[#allocation86_spill] sm:$0xff] }
 0x19a   : >> { %vm1123_vm14 = vcmp.gt.s32.totalorder %v7959_v29, %v1074_v7  ;;  %v1087_v38 = vand.u32 65535, %v6523_v9  ;;  %v7962_v57 = vmov %v7961_v27  ;;  %3920 = vmatprep.subr.bf16.mxu1 %v5995_v8  ;;  %v7965_v8 = vld [vmem:[#allocation226_spill] sm:$0xff]  ;;  %v7966_v62 = vld [vmem:[#allocation227_spill] sm:$0xff] }
 0x19b   : >> { %3580 = vmatmul.mubr.msk.f32.gmra.mrb[22].mxu1 %vm1123_vm14, %v7848_v14  ;;  %v1086_v28 = vand.u32 65535, %v6532_v33  ;;  %v1081_v19 = vand.u32 65535, %v6534_v10  ;;  %v794_v26 = vmul.u32 2146121005, %v745_v18  ;;  %3872 = vmatpush3.bf16.msra.mxu0 %v6528_v54  ;;  %v6563_v7 = vpack.c.bf16 %v7966_v62, %v7965_v8  ;;  %v7977_v8 = vld [vmem:[#allocation236_spill] sm:$0xff]  ;;  %v7978_v62 = vld [vmem:[#allocation237_spill] sm:$0xff] }
 0x19c   : >> { %vm1136_vm15 = vcmp.gt.s32.totalorder %v7961_v27, %v1087_v38  ;;  %3582 = vmatprep.mubr.msk.f32.mxu1 %vm4860_vm13, %v7920_v11  ;;  %3873 = vmatprep.subr.bf16.mxu0 %v7837_v36  ;;  %v7968_v18 = vmov %v7967_v35  ;;  %v7971_v38 = vld [vmem:[#allocation230_spill] sm:$0xff]  ;;  %v7974_v27 = vld [vmem:[#allocation233_spill] sm:$0xff] }
 0x19d   : >> { %2972 = vmatprep.mubr.msk.f32.mxu0 %vm1136_vm15, %v7848_v14  ;;  %vm1135_vm0 = vcmp.gt.s32.totalorder %v7963_v46, %v1086_v28  ;;  %vm1130_vm1 = vcmp.gt.s32.totalorder %v7964_v32, %v1081_v19  ;;  %v843_v43 = vshrl.u32 %v794_v26, 15  ;;  %3922 = vmatpush3.bf16.msra.mxu1 %v6003_v56  ;;  %v7972_v28 = vld [vmem:[#allocation231_spill] sm:$0xff] }
 0x19e   : >> { %2973 = vmatmul.mubr.msk.f32.gmra.mrb[26].mxu0 %vm1135_vm0, %v7848_v14  ;;  %3956 = vmatprep.subr.bf16.mxu1 %v6015_v48  ;;  %v7970_v48 = vld [vmem:[#allocation229_spill] sm:$0xff]  ;;  %v6578_v19 = vpack.c.bf16 %v7972_v28, %v7971_v38  ;;  %v7980_v38 = vld [vmem:[#allocation20_spill] sm:$0xff]  ;;  %v7981_v28 = vld [vmem:[#allocation19_spill] sm:$0xff] }
 0x19f   : >> { %3583 = vmatmul.mubr.msk.f32.gmra.mrb[24].mxu1 %vm1130_vm1, %v7848_v14  ;;  %v892_v1 = vxor.u32 %v843_v43, %v794_v26  ;;  %3620 = vmatprep.mubr.msk.f32.mxu0 %vm4860_vm13, %v7920_v11  ;;  %v6572_v29 = vpack.c.bf16 %v7970_v48, %v7969_v44  ;;  %v7973_v26 = vld [vmem:[#allocation232_spill] sm:$0xff]  ;;  %v1842_v44 = vshrl.u32 %v6153_v39, 16  ;;  %v1841_v48 = vshrl.u32 %v6156_v42, 16 }
 0x1a0   : >> { %3585 = vmatprep.mubr.msk.f32.mxu1 %vm4860_vm13, %v7920_v11  ;;  %3875 = vmatpush3.bf16.msra.mxu0 %v6563_v7  ;;  %v6584_v43 = vpack.c.bf16 %v7974_v27, %v7973_v26  ;;  %v1849_v39 = vshrl.u32 %v6165_v0, 16  ;;  %v1848_v42 = vshrl.u32 %v6171_v34, 16  ;;  %v7988_v0 = vld [vmem:[#allocation321_spill] sm:$0xff] }
 0x1a1   : >> { %v941_v60 = vmul.u32 2221713035, %v892_v1  ;;  %3876 = vmatprep.subr.bf16.mxu0 %v7837_v36  ;;  %v7975_v1 = vld [vmem:[#allocation234_spill] sm:$0xff]  ;;  %vm1891_vm3 = vcmp.gt.s32.totalorder %v7824_v22, %v1842_v44  ;;  %vm1890_vm4 = vcmp.gt.s32.totalorder %v7826_v47, %v1841_v48  ;;  %v1869_v34 = vshrl.u32 %v7988_v0, 16  ;;  %v7991_v27 = vld [vmem:[#allocation57_spill] sm:$0xff] }
 0x1a2   : >> { %vm1898_vm5 = vcmp.gt.s32.totalorder %v7980_v38, %v1849_v39  ;;  %vm1897_vm6 = vcmp.gt.s32.totalorder %v7981_v28, %v1848_v42  ;;  %v7993_v44 = vld [vmem:[#allocation325_spill] sm:$0xff]  ;;  %v7994_v39 = vld [vmem:[#allocation238_spill] sm:$0xff] }
 0x1a3   : >> { %v990_v17 = vshrl.u32 %v941_v60, 16  ;;  %vm1918_vm12 = vcmp.gt.s32.totalorder %v7991_v27, %v1869_v34  ;;  %v1876_v48 = vshrl.u32 %v7993_v44, 16  ;;  %v7996_v28 = vld [vmem:[#allocation77_spill] sm:$0xff]  ;;  %v8007_v44 = vld [vmem:[#allocation335_spill] sm:$0xff] }
 0x1a4   : >> { %3878 = vmatpush3.bf16.msra.mxu0 %v6572_v29  ;;  %v8003_v27 = vld [vmem:[#allocation333_spill] sm:$0xff] }
 0x1a5   : >> { %v6559_v58 = vxor.u32 %v990_v17, %v941_v60  ;;  %3879 = vmatprep.subr.bf16.mxu0 %v7837_v36  ;;  %v7976_v60 = vld [vmem:[#allocation235_spill] sm:$0xff] }
 0x1a6   : >> { %v6589_v17 = vpack.c.bf16 %v7976_v60, %v7975_v1 }
 0x1a7   : >> { %v1088_v56 = vand.u32 65535, %v6559_v58 }
 0x1a8   : >> { %3881 = vmatpush3.bf16.msra.mxu0 %v6578_v19 }
 0x1a9   : >> { %vm1137_vm2 = vcmp.gt.s32.totalorder %v7967_v35, %v1088_v56  ;;  %3882 = vmatprep.subr.bf16.mxu0 %v7837_v36  ;;  %v6596_v56 = vpack.c.bf16 %v7978_v62, %v7977_v8  ;;  %v7979_v35 = vld [vmem:[#allocation277_spill] sm:$0xff]  ;;  %v7992_v8 = vld [vmem:[#allocation324_spill] sm:$0xff] }
 0x1aa   : >> { %3586 = vmatmul.mubr.msk.f32.gmra.mrb[26].mxu1 %vm1137_vm2, %v7848_v14  ;;  %v1877_v62 = vshrl.u32 %v7992_v8, 16  ;;  %v8005_v8 = vld [vmem:[#allocation16_spill] sm:$0xff] }
 0x1ab   : >> { %3051 = vmatprep.mubr.msk.f32.mxu1 %vm1891_vm3, %v7848_v14 }
 0x1ac   : >> { %3884 = vmatpush3.bf16.msra.mxu0 %v6584_v43  ;;  %vm1926_vm14 = vcmp.gt.s32.totalorder %v7996_v28, %v1877_v62  ;;  %v8006_v62 = vld [vmem:[#allocation334_spill] sm:$0xff]  ;;  %v8010_v28 = vld [vmem:[#allocation337_spill] sm:$0xff] }
 0x1ad   : >> { %3885 = vmatprep.subr.bf16.mxu0 %v7837_v36 }
 0x1ae   : >> { %3052 = vmatmul.mubr.msk.f32.vlgmr.msra.gmra.mrb[28].mxu1 %vm1890_vm4, %v7848_v14 }
 0x1af   : >> { %3958 = vmatpush3.bf16.msra.mxu1 %v6019_v4  ;;  %3053 = vmatprep.mubr.msk.f32.mxu1 %vm1898_vm5, %v7848_v14  ;;  %v1863_v4 = vshrl.u32 %v6250_v24, 16 }
 0x1b0   : >> { %3887 = vmatpush3.bf16.msra.mxu0 %v6589_v17  ;;  %3960 = vmatprep.subr.bf16.mxu1 %v6023_v50  ;;  %v1856_v50 = vshrl.u32 %v6228_v16, 16 }
 0x1b1   : >> { %3888 = vmatprep.subr.bf16.mxu0 %v7837_v36 }
 0x1b2   : >> { %3054 = vmatmul.mubr.msk.f32.gmra.mrb[30].mxu1 %vm1897_vm6, %v7848_v14  ;;  %vm1905_vm7 = vcmp.gt.s32.totalorder %v7846_v21, %v1856_v50 }
 0x1b3   : >> { %3962 = vmatpush3.bf16.msra.mxu1 %v6027_v59  ;;  %v1855_v59 = vshrl.u32 %v6230_v51, 16  ;;  %3055 = vmatprep.mubr.msk.f32.mxu1 %vm1905_vm7, %v7848_v14  ;;  %v7989_v51 = vld [vmem:[#allocation58_spill] sm:$0xff] }
 0x1b4   : >> { %3890 = vmatpush3.bf16.msra.mxu0 %v6596_v56  ;;  %3964 = vmatprep.subr.bf16.mxu1 %v6037_v2  ;;  %v7983_v2 = vld [vmem:[#allocation43_spill] sm:$0xff] }
 0x1b5   : >> { %3924 = vmatprep.subr.bf16.mxu0 %v7979_v35  ;;  %vm1904_vm8 = vcmp.gt.s32.totalorder %v7847_v13, %v1855_v59  ;;  %vm1912_vm9 = vcmp.gt.s32.totalorder %v7983_v2, %v1863_v4  ;;  %v7997_v4 = vld [vmem:[#allocation72_spill] sm:$0xff] }
 0x1b6   : >> { %3056 = vmatmul.mubr.msk.f32.gmra.mrb[32].mxu1 %vm1904_vm8, %v7848_v14  ;;  %vm1925_vm15 = vcmp.gt.s32.totalorder %v7997_v4, %v1876_v48  ;;  %v1852_v48 = vshrl.u32 %v8007_v44, 16 }
 0x1b7   : >> { %3966 = vmatpush3.bf16.msra.mxu1 %v6041_v61  ;;  %v7984_v61 = vld [vmem:[#allocation42_spill] sm:$0xff]  ;;  %3057 = vmatprep.mubr.msk.f32.mxu1 %vm1912_vm9, %v7848_v14 }
 0x1b8   : >> { %3968 = vmatprep.subr.bf16.mxu1 %v6051_v49  ;;  %v7982_v49 = vld [vmem:[#allocation318_spill] sm:$0xff] }
 0x1bb   : >> { %3970 = vmatpush3.bf16.msra.mxu1 %v6055_v45  ;;  %v7985_v45 = vld [vmem:[#allocation306_spill] sm:$0xff] }
 0x1bc   : >> { %3972 = vmatprep.subr.bf16.mxu1 %v6063_v55  ;;  %v7986_v55 = vld [vmem:[#allocation308_spill] sm:$0xff] }
 0x1bf   : >> { %3974 = vmatpush3.bf16.msra.mxu1 %v6067_v40  ;;  %v1862_v40 = vshrl.u32 %v7982_v49, 16 }
 0x1c0   : >> { %3976 = vmatprep.subr.bf16.mxu1 %v6075_v31 }
 0x1c1   : >> { %vm1911_vm10 = vcmp.gt.s32.totalorder %v7984_v61, %v1862_v40  ;;  %v7995_v61 = vmov %v7994_v39 }
 0x1c2   : >> { %3058 = vmatmul.mubr.msk.f32.gmra.mrb[34].mxu1 %vm1911_vm10, %v7848_v14 }
 0x1c3   : >> { %3978 = vmatpush3.bf16.msra.mxu1 %v6079_v30  ;;  %v7987_v30 = vld [vmem:[#allocation275_spill] sm:$0xff] }
 0x1c4   : >> { %3980 = vmatprep.subr.bf16.mxu1 %v6087_v3  ;;  %v1870_v31 = vshrl.u32 %v7987_v30, 16  ;;  %v7990_v3 = vld [vmem:[#allocation309_spill] sm:$0xff] }
 0x1c5   : >> { %v7999_v30 = vld [vmem:[#allocation329_spill] sm:$0xff] }
 0x1c6   : >> { %vm1919_vm11 = vcmp.gt.s32.totalorder %v7989_v51, %v1870_v31  ;;  %v1883_v31 = vshrl.u32 %v7999_v30, 16  ;;  %v8001_v51 = vld [vmem:[#allocation91_spill] sm:$0xff]  ;;  %v8014_v30 = vld [vmem:[#allocation278_spill] sm:$0xff] }
 0x1c7   : >> { %3982 = vmatpush3.bf16.msra.mxu1 %v7985_v45  ;;  %3059 = vmatprep.mubr.msk.f32.mxu1 %vm1919_vm11, %v7848_v14  ;;  %v7998_v45 = vld [vmem:[#allocation328_spill] sm:$0xff] }
 0x1c8   : >> { %3984 = vmatprep.subr.bf16.mxu1 %v7986_v55  ;;  %3060 = vmatmul.mubr.msk.f32.gmra.mrb[36].mxu1 %vm1918_vm12, %v7848_v14  ;;  %v1884_v55 = vshrl.u32 %v7998_v45, 16  ;;  %vm1932_vm1 = vcmp.gt.s32.totalorder %v8001_v51, %v1883_v31  ;;  %v1866_v31 = vshrl.u32 %v8014_v30, 16  ;;  %v8016_v51 = vld [vmem:[#allocation50_spill] sm:$0xff] }
 0x1c9   : >> { %3061 = vmatprep.mubr.msk.f32.mxu1 %vm1926_vm14, %v7848_v14 }
 0x1ca   : >> { %vm1915_vm9 = vcmp.gt.s32.totalorder %v8016_v51, %v1866_v31 }
 0x1cb   : >> { %3986 = vmatpush3.bf16.msra.mxu1 %v7990_v3  ;;  %v8002_v3 = vld [vmem:[#allocation332_spill] sm:$0xff] }
 0x1cc   : >> { %4011 = vmatprep.subr.bf16.mxu1 %v7837_v36  ;;  %3062 = vmatmul.mubr.msk.f32.gmra.mrb[38].mxu1 %vm1925_vm15, %v7848_v14 }
 0x1fc   : >> { %v3157_v16 = vpop.f32.mrb[0].mxu0  ;;  %v3210_v26 = vpop.f32.mrb[0].mxu1 }
 0x1fd   : >> { %v3158_v24 = vpop.f32.mrb[1].mxu0  ;;  %v3211_v60 = vpop.f32.mrb[1].mxu1 }
 0x1fe   : >> { %v3159_v1 = vadd.f32 %v3158_v24, %v3157_v16  ;;  %v3212_v35 = vadd.f32 %v3211_v60, %v3210_v26  ;;  %v8000_v16 = vld [vmem:[#allocation92_spill] sm:$0xff]  ;;  %v1846_v24 = vshrl.u32 %v8002_v3, 16  ;;  %v8004_v60 = vld [vmem:[#allocation17_spill] sm:$0xff] }
 0x1ff   : >> { %vm1933_vm0 = vcmp.gt.s32.totalorder %v8000_v16, %v1884_v55  ;;  %v8017_v3 = vld [vmem:[#allocation340_spill] sm:$0xff] }
 0x200   : >> { %v1303_v42 = vadd.f32 %v3159_v1, %v7994_v39  ;;  %v3160_v38 = vpop.f32.mrb[2].mxu0  ;;  %v3213_v59 = vpop.f32.mrb[2].mxu1  ;;  %3063 = vmatprep.mubr.msk.f32.mxu1 %vm1933_vm0, %v7848_v14  ;;  %v1845_v1 = vshrl.u32 %v8003_v27, 16  ;;  %vm1895_vm2 = vcmp.gt.s32.totalorder %v8004_v60, %v1846_v24  ;;  %v8008_v39 = vld [vmem:[#allocation24_spill] sm:$0xff]  ;;  %v1874_v24 = vshrl.u32 %v8017_v3, 16 }
 0x201   : >> { %v3161_v50 = vpop.f32.mrb[3].mxu0  ;;  %v3214_v2 = vpop.f32.mrb[3].mxu1  ;;  %3064 = vmatmul.mubr.msk.f32.gmra.mrb[40].mxu1 %vm1932_vm1, %v7848_v14  ;;  %v1873_v60 = vshrl.u32 %v6488_v6, 16  ;;  %v1880_v6 = vshrl.u32 %v6504_v63, 16 }
 0x202   : >> { %v6652_v49 = vadd.f32 %v3212_v35, %v1303_v42  ;;  %v3162_v40 = vadd.f32 %v3161_v50, %v3160_v38  ;;  %v3215_v0 = vadd.f32 %v3214_v2, %v3213_v59  ;;  %3079 = vmatprep.mubr.msk.f32.mxu1 %vm1895_vm2, %v7848_v14  ;;  %vm1894_vm3 = vcmp.gt.s32.totalorder %v8005_v8, %v1845_v1  ;;  %v8009_v42 = vld [vmem:[#allocation23_spill] sm:$0xff]  ;;  %v8011_v59 = vld [vmem:[#allocation36_spill] sm:$0xff] }
 0x203   : >> { %v1853_v35 = vshrl.u32 %v8006_v62, 16  ;;  %vm1901_vm5 = vcmp.gt.s32.totalorder %v8009_v42, %v1852_v48  ;;  %v1860_v38 = vshrl.u32 %v6421_v41, 16  ;;  %v1859_v50 = vshrl.u32 %v8010_v28, 16  ;;  %v8013_v2 = vld [vmem:[#allocation276_spill] sm:$0xff] }
 0x204   : >> { %v1308_v34 = vadd.f32 %v3162_v40, %v7995_v61  ;;  %v1867_v45 = vshrl.u32 %v8013_v2, 16  ;;  %vm1922_vm11 = vcmp.gt.s32.totalorder %v7948_v25, %v1873_v60  ;;  %v1881_v48 = vshrl.u32 %v6495_v20, 16 }
 0x205   : >> { %3080 = vmatmul.mubr.msk.f32.vlgmr.msra.gmra.mrb[42].mxu1 %vm1894_vm3, %v7848_v14  ;;  %vm1902_vm4 = vcmp.gt.s32.totalorder %v8008_v39, %v1853_v35  ;;  %vm1909_vm6 = vcmp.gt.s32.totalorder %v8011_v59, %v1860_v38  ;;  %vm1929_vm14 = vcmp.gt.s32.totalorder %v7956_v15, %v1880_v6  ;;  %v1888_v20 = vshrl.u32 %v6523_v9, 16 }
 0x206   : >> { %v6662_v26 = vadd.f32 %v3215_v0, %v1308_v34  ;;  %4013 = vmatpush3.bf16.msra.mxu1 %v6512_v52  ;;  %3081 = vmatprep.mubr.msk.f32.mxu1 %vm1902_vm4, %v7848_v14  ;;  %v8012_v52 = vld [vmem:[#allocation35_spill] sm:$0xff]  ;;  %vm1930_vm12 = vcmp.gt.s32.totalorder %v7955_v23, %v1881_v48  ;;  %v1887_v38 = vshrl.u32 %v6532_v33, 16 }
 0x207   : >> { %4014 = vmatprep.subr.bf16.mxu1 %v7837_v36  ;;  %vm1908_vm7 = vcmp.gt.s32.totalorder %v8012_v52, %v1859_v50  ;;  %v8015_v34 = vld [vmem:[#allocation51_spill] sm:$0xff]  ;;  %vm1937_vm15 = vcmp.gt.s32.totalorder %v7962_v57, %v1888_v20 }
 0x208   : >> { %vm1916_vm8 = vcmp.gt.s32.totalorder %v8015_v34, %v1867_v45  ;;  %vm1936_vm0 = vcmp.gt.s32.totalorder %v7963_v46, %v1887_v38  ;;  %v8020_v48 = vld [vmem:[#allocation267_spill] sm:$0xff]  ;;  %v8021_v38 = vld [vmem:[#allocation273_spill] sm:$0xff] }
 0x209   : >> { %3082 = vmatmul.mubr.msk.f32.gmra.mrb[44].mxu1 %vm1901_vm5, %v7848_v14 }
 0x20a   : >> { %4016 = vmatpush3.bf16.msra.mxu1 %v6528_v54  ;;  %3083 = vmatprep.mubr.msk.f32.mxu1 %vm1909_vm6, %v7848_v14 }
 0x20b   : >> { %4017 = vmatprep.subr.bf16.mxu1 %v7837_v36 }
 0x20d   : >> { %3084 = vmatmul.mubr.msk.f32.gmra.mrb[46].mxu1 %vm1908_vm7, %v7848_v14 }
 0x20e   : >> { %4019 = vmatpush3.bf16.msra.mxu1 %v6563_v7  ;;  %3085 = vmatprep.mubr.msk.f32.mxu1 %vm1916_vm8, %v7848_v14  ;;  %v8018_v7 = vld [vmem:[#allocation70_spill] sm:$0xff] }
 0x20f   : >> { %4020 = vmatprep.subr.bf16.mxu1 %v7837_v36  ;;  %vm1923_vm10 = vcmp.gt.s32.totalorder %v8018_v7, %v1874_v24 }
 0x211   : >> { %v3163_v4 = vpop.f32.mrb[4].mxu0  ;;  %3086 = vmatmul.mubr.msk.f32.gmra.mrb[48].mxu1 %vm1915_vm9, %v7848_v14 }
 0x212   : >> { %v3164_v40 = vpop.f32.mrb[5].mxu0  ;;  %v3216_v41 = vpop.f32.mrb[4].mxu1  ;;  %4022 = vmatpush3.bf16.msra.mxu1 %v6572_v29  ;;  %3087 = vmatprep.mubr.msk.f32.mxu1 %vm1923_vm10, %v7848_v14 }
 0x213   : >> { %v3165_v55 = vadd.f32 %v3164_v40, %v3163_v4  ;;  %v3217_v0 = vpop.f32.mrb[5].mxu1  ;;  %4023 = vmatprep.subr.bf16.mxu1 %v7837_v36 }
 0x214   : >> { %v3218_v16 = vadd.f32 %v3217_v0, %v3216_v41 }
 0x215   : >> { %v1313_v54 = vadd.f32 %v3165_v55, %v7995_v61  ;;  %3088 = vmatmul.mubr.msk.f32.gmra.mrb[50].mxu1 %vm1922_vm11, %v7848_v14 }
 0x216   : >> { %4025 = vmatpush3.bf16.msra.mxu1 %v6578_v19  ;;  %3089 = vmatprep.mubr.msk.f32.mxu1 %vm1930_vm12, %v7848_v14 }
 0x217   : >> { %v6695_v27 = vadd.f32 %v3218_v16, %v1313_v54  ;;  %v3166_v1 = vpop.f32.mrb[6].mxu0  ;;  %4026 = vmatprep.subr.bf16.mxu1 %v7837_v36 }
 0x218   : >> { %v3167_v8 = vpop.f32.mrb[7].mxu0 }
 0x219   : >> { %v3168_v62 = vadd.f32 %v3167_v8, %v3166_v1  ;;  %v3219_v35 = vpop.f32.mrb[6].mxu1  ;;  %3090 = vmatmul.mubr.msk.f32.gmra.mrb[52].mxu1 %vm1929_vm14, %v7848_v14 }
 0x21a   : >> { %v3220_v44 = vpop.f32.mrb[7].mxu1  ;;  %4028 = vmatpush3.bf16.msra.mxu1 %v6584_v43  ;;  %3091 = vmatprep.mubr.msk.f32.mxu1 %vm1937_vm15, %v7848_v14 }
 0x21b   : >> { %v1318_v39 = vadd.f32 %v3168_v62, %v7995_v61  ;;  %v3221_v42 = vadd.f32 %v3220_v44, %v3219_v35  ;;  %4029 = vmatprep.subr.bf16.mxu1 %v7837_v36  ;;  %v8019_v35 = vld [vmem:[#allocation274_spill] sm:$0xff] }
 0x21c   : >> { %v1636_v44 = vmul.f32 0.2, %v8019_v35 }
 0x21d   : >> { %v6710_v29 = vadd.f32 %v3221_v42, %v1318_v39  ;;  %3092 = vmatmul.mubr.msk.f32.gmra.mrb[54].mxu1 %vm1936_vm0, %v7848_v14  ;;  %v1643_v39 = vsub.f32 1.0, %v8020_v48 }
 0x21e   : >> { %4031 = vmatpush3.bf16.msra.mxu1 %v6589_v17  ;;  %3726 = vmatprep.mubr.msk.f32.mxu1 %vm4860_vm13, %v7920_v11 }
 0x21f   : >> { %4032 = vmatprep.subr.bf16.mxu1 %v7837_v36  ;;  %v1650_v6 = vmul.f32 %v1643_v39, %v1636_v44 }
 0x222   : >> { %4034 = vmatpush3.bf16.msra.mxu1 %v6596_v56 }
 0x224   : >> { %v3169_v63 = vpop.f32.mrb[8].mxu0 }
 0x225   : >> { %v3170_v9 = vpop.f32.mrb[9].mxu0 }
 0x226   : >> { %v3171_v33 = vadd.f32 %v3170_v9, %v3169_v63  ;;  %v1637_v63 = vmul.f32 0.2, %v8021_v38  ;;  %v8022_v9 = vld [vmem:[#allocation266_spill] sm:$0xff]  ;;  %v8028_v38 = vld [vmem:[#allocation285_spill] sm:$0xff] }
 0x228   : >> { %v1323_v19 = vadd.f32 %v3171_v33, %v7995_v61  ;;  %v3222_v43 = vpop.f32.mrb[8].mxu1  ;;  %v1644_v33 = vsub.f32 1.0, %v8022_v9 }
 0x229   : >> { %v3223_v28 = vpop.f32.mrb[9].mxu1 }
 0x22a   : >> { %v3224_v50 = vadd.f32 %v3223_v28, %v3222_v43 }
 0x22c   : >> { %v6730_v59 = vadd.f32 %v3224_v50, %v1323_v19 }
 0x22d   : >> { %v3172_v4 = vpop.f32.mrb[10].mxu0 }
 0x22e   : >> { %v3173_v52 = vpop.f32.mrb[11].mxu0  ;;  %v3225_v40 = vpop.f32.mrb[10].mxu1 }
 0x22f   : >> { %v3174_v17 = vadd.f32 %v3173_v52, %v3172_v4  ;;  %v3226_v2 = vpop.f32.mrb[11].mxu1 }
 0x230   : >> { %v3227_v55 = vadd.f32 %v3226_v2, %v3225_v40  ;;  %v8023_v40 = vld [vmem:[#allocation272_spill] sm:$0xff] }
 0x231   : >> { %v1328_v45 = vadd.f32 %v3174_v17, %v7995_v61  ;;  %v1638_v2 = vmul.f32 0.2, %v8023_v40  ;;  %v8033_v40 = vld [vmem:[#allocation291_spill] sm:$0xff] }
 0x233   : >> { %v6733_v41 = vadd.f32 %v3227_v55, %v1328_v45  ;;  %v8024_v45 = vld [vmem:[#allocation265_spill] sm:$0xff] }
 0x234   : >> { %v1645_v55 = vsub.f32 1.0, %v8024_v45 }
 0x23a   : >> { %v3175_v30 = vpop.f32.mrb[12].mxu0 }
 0x23b   : >> { %v3176_v31 = vpop.f32.mrb[13].mxu0 }
 0x23c   : >> { %v3177_v56 = vadd.f32 %v3176_v31, %v3175_v30 }
 0x23e   : >> { %v1333_v0 = vadd.f32 %v3177_v56, %v7995_v61  ;;  %v3228_v34 = vpop.f32.mrb[12].mxu1 }
 0x23f   : >> { %v3229_v54 = vpop.f32.mrb[13].mxu1 }
 0x240   : >> { %v3230_v16 = vadd.f32 %v3229_v54, %v3228_v34  ;;  %v8025_v34 = vld [vmem:[#allocation279_spill] sm:$0xff] }
 0x242   : >> { %v6736_v51 = vadd.f32 %v3230_v16, %v1333_v0 }
 0x243   : >> { %v3263_v3 = vpop.f32.mrb[14].mxu0 }
 0x244   : >> { %v3264_v24 = vpop.f32.mrb[15].mxu0 }
 0x245   : >> { %v3265_v1 = vadd.f32 %v3264_v24, %v3263_v3  ;;  %v8026_v3 = vld [vmem:[#allocation280_spill] sm:$0xff] }
 0x247   : >> { %v3266_v60 = vpop.f32.mrb[16].mxu0  ;;  %v1503_v8 = vadd.f32 %v3265_v1, %v6652_v49  ;;  %v1651_v49 = vmul.f32 %v1644_v33, %v1637_v63  ;;  %v1652_v1 = vmul.f32 %v1645_v55, %v1638_v2  ;;  %v8034_v55 = vld [vmem:[#allocation293_spill] sm:$0xff] }
 0x248   : >> { %v3267_v7 = vpop.f32.mrb[17].mxu0 }
 0x249   : >> { %v3268_v62 = vadd.f32 %v3267_v7, %v3266_v60 }
 0x24b   : >> { %v1508_v42 = vadd.f32 %v3268_v62, %v6662_v26 }
 0x250   : >> { %v1602_v20 = vpop.f32.mrb[14].mxu1 }
 0x251   : >> { %v1603_v19 = vadd.f32 %v1602_v20, %v1503_v8  ;;  %v3569_v43 = vpop.f32.mrb[15].mxu1 }
 0x253   : >> { %v1657_v28 = vadd.f32 %v1650_v6, %v1603_v19  ;;  %v3269_v50 = vpop.f32.mrb[18].mxu0  ;;  %v8029_v19 = vld [vmem:[#allocation271_spill] sm:$0xff] }
 0x254   : >> { %v3270_v4 = vpop.f32.mrb[19].mxu0  ;;  %v1639_v43 = vmul.f32 0.2, %v8029_v19 }
 0x255   : >> { %vm1664_vm1 = vcmp.gt.f32.partialorder %v1657_v28, 0.5  ;;  %v3271_v52 = vadd.f32 %v3270_v4, %v3269_v50  ;;  %v1607_v17 = vpop.f32.mrb[16].mxu1  ;;  %v2437_v56 = vmul.f32 0.2, %v1657_v28  ;;  %v8030_v28 = vld [vmem:[#allocation264_spill] sm:$0xff] }
 0x256   : >> { %v2981_v26 = vsel %vm1664_vm1, 1.0, %v7920_v11  ;;  %v1608_v30 = vadd.f32 %v1607_v17, %v1508_v42  ;;  %3621 = vmatmul.mubr.msk.f32.vlgmr.msra.gmra.mrb[28].mxu0 %vm1664_vm1, %v7848_v14  ;;  %v3572_v31 = vpop.f32.mrb[17].mxu1  ;;  %v8027_v42 = vld [vmem:[#allocation283_spill] sm:$0xff]  ;;  %v1646_v50 = vsub.f32 1.0, %v8030_v28 }
 0x257   : >> { %v2444_v0 = vsub.f32 1.0, %v2981_v26  ;;  %3926 = vmatpush3.bf16.msra.mxu0 %v8025_v34  ;;  %v1513_v54 = vadd.f32 %v3271_v52, %v6695_v27  ;;  %3623 = vmatprep.mubr.msk.f32.mxu0 %vm4860_vm13, %v7920_v11 }
 0x258   : >> { %v1658_v16 = vadd.f32 %v1651_v49, %v1608_v30  ;;  %3928 = vmatprep.subr.bf16.mxu0 %v8026_v3  ;;  %v8031_v49 = vld [vmem:[#allocation287_spill] sm:$0xff]  ;;  %v1653_v17 = vmul.f32 %v1646_v50, %v1639_v43  ;;  %v8042_v43 = vld [vmem:[#allocation297_spill] sm:$0xff] }
 0x259   : >> { %v6753_v60 = vmul.f32 %v2444_v0, %v2437_v56  ;;  %v8035_v0 = vld [vmem:[#allocation270_spill] sm:$0xff] }
 0x25a   : >> { %v3272_v24 = vpop.f32.mrb[20].mxu0  ;;  %v1612_v7 = vpop.f32.mrb[18].mxu1  ;;  %vm1665_vm2 = vcmp.gt.f32.partialorder %v1658_v16, 0.5  ;;  %v2438_v48 = vmul.f32 0.2, %v1658_v16 }
 0x25b   : >> { %v3273_v8 = vpop.f32.mrb[21].mxu0  ;;  %v1613_v35 = vadd.f32 %v1612_v7, %v1513_v54  ;;  %v2982_v44 = vsel %vm1665_vm2, 1.0, %v7920_v11  ;;  %3624 = vmatmul.mubr.msk.f32.gmra.mrb[30].mxu0 %vm1665_vm2, %v7848_v14  ;;  %v3575_v27 = vpop.f32.mrb[19].mxu1  ;;  %v1640_v34 = vmul.f32 0.2, %v8035_v0  ;;  %v8036_v54 = vld [vmem:[#allocation263_spill] sm:$0xff] }
 0x25c   : >> { %v3274_v62 = vadd.f32 %v3273_v8, %v3272_v24  ;;  %v2445_v39 = vsub.f32 1.0, %v2982_v44  ;;  %3930 = vmatpush3.bf16.msra.mxu0 %v8027_v42  ;;  %3626 = vmatprep.mubr.msk.f32.mxu0 %vm4860_vm13, %v7920_v11  ;;  %v1647_v16 = vsub.f32 1.0, %v8036_v54  ;;  %v8037_v24 = vld [vmem:[#allocation294_spill] sm:$0xff]  ;;  %v8038_v8 = vld [vmem:[#allocation295_spill] sm:$0xff]  ;;  %v8039_v27 = vld [vmem:[#allocation269_spill] sm:$0xff] }
 0x25d   : >> { %v1659_v6 = vadd.f32 %v1652_v1, %v1613_v35  ;;  %3932 = vmatprep.subr.bf16.mxu0 %v8028_v38  ;;  %v8045_v54 = vld [vmem:[#allocation300_spill] sm:$0xff] }
 0x25e   : >> { %v1518_v20 = vadd.f32 %v3274_v62, %v6710_v29  ;;  %v6762_v63 = vmul.f32 %v2445_v39, %v2438_v48  ;;  %v8032_v29 = vld [vmem:[#allocation289_spill] sm:$0xff]  ;;  %v1654_v35 = vmul.f32 %v1647_v16, %v1640_v34  ;;  %v1641_v48 = vmul.f32 0.2, %v8039_v27  ;;  %v8040_v39 = vld [vmem:[#allocation262_spill] sm:$0xff] }
 0x25f   : >> { %vm1666_vm3 = vcmp.gt.f32.partialorder %v1659_v6, 0.5  ;;  %v2439_v33 = vmul.f32 0.2, %v1659_v6  ;;  %v1648_v42 = vsub.f32 1.0, %v8040_v39 }
 0x260   : >> { %v2983_v9 = vsel %vm1666_vm3, 1.0, %v7920_v11  ;;  %3627 = vmatmul.mubr.msk.f32.gmra.mrb[32].mxu0 %vm1666_vm3, %v7848_v14 }
 0x261   : >> { %v2446_v4 = vsub.f32 1.0, %v2983_v9  ;;  %3934 = vmatpush3.bf16.msra.mxu0 %v8031_v49  ;;  %3629 = vmatprep.mubr.msk.f32.mxu0 %vm4860_vm13, %v7920_v11 }
 0x262   : >> { %3936 = vmatprep.subr.bf16.mxu0 %v8032_v29  ;;  %v1655_v29 = vmul.f32 %v1648_v42, %v1641_v48  ;;  %v8048_v48 = vld [vmem:[#allocation312_spill] sm:$0xff] }
 0x263   : >> { %v6772_v52 = vmul.f32 %v2446_v4, %v2439_v33  ;;  %v1844_v39 = vshrl.u32 %v8048_v48, 16 }
 0x265   : >> { %3938 = vmatpush3.bf16.msra.mxu0 %v8033_v40 }
 0x266   : >> { %3940 = vmatprep.subr.bf16.mxu0 %v8034_v55 }
 0x267   : >> { %v3275_v2 = vpop.f32.mrb[22].mxu0  ;;  %v1617_v45 = vpop.f32.mrb[20].mxu1 }
 0x268   : >> { %v3276_v26 = vpop.f32.mrb[23].mxu0  ;;  %v1618_v30 = vadd.f32 %v1617_v45, %v1518_v20  ;;  %v3578_v31 = vpop.f32.mrb[21].mxu1 }
 0x269   : >> { %v3277_v56 = vadd.f32 %v3276_v26, %v3275_v2  ;;  %3942 = vmatpush3.bf16.msra.mxu0 %v8037_v24  ;;  %v8043_v2 = vld [vmem:[#allocation298_spill] sm:$0xff] }
 0x26a   : >> { %v1660_v3 = vadd.f32 %v1653_v17, %v1618_v30  ;;  %3944 = vmatprep.subr.bf16.mxu0 %v8038_v8  ;;  %v8044_v30 = vld [vmem:[#allocation299_spill] sm:$0xff] }
 0x26b   : >> { %v1523_v1 = vadd.f32 %v3277_v56, %v6730_v59  ;;  %v8041_v59 = vld [vmem:[#allocation296_spill] sm:$0xff] }
 0x26c   : >> { %v3278_v7 = vpop.f32.mrb[24].mxu0  ;;  %vm1667_vm4 = vcmp.gt.f32.partialorder %v1660_v3, 0.5  ;;  %v2440_v6 = vmul.f32 0.2, %v1660_v3  ;;  %v8046_v3 = vld [vmem:[#allocation268_spill] sm:$0xff] }
 0x26d   : >> { %v3279_v62 = vpop.f32.mrb[25].mxu0  ;;  %v2984_v44 = vsel %vm1667_vm4, 1.0, %v7920_v11  ;;  %3630 = vmatmul.mubr.msk.f32.gmra.mrb[34].mxu0 %vm1667_vm4, %v7848_v14  ;;  %v1642_v24 = vmul.f32 0.2, %v8046_v3  ;;  %v8062_v3 = vld [vmem:[#allocation30_spill] sm:$0xff] }
 0x26e   : >> { %v3280_v20 = vadd.f32 %v3279_v62, %v3278_v7  ;;  %v1622_v38 = vpop.f32.mrb[22].mxu1  ;;  %v2447_v9 = vsub.f32 1.0, %v2984_v44  ;;  %3632 = vmatprep.mubr.msk.f32.mxu0 %vm4860_vm13, %v7920_v11  ;;  %3946 = vmatpush3.bf16.msra.mxu0 %v8041_v59  ;;  %v8050_v59 = vld [vmem:[#allocation15_spill] sm:$0xff] }
 0x26f   : >> { %v1623_v33 = vadd.f32 %v1622_v38, %v1523_v1  ;;  %v3581_v19 = vpop.f32.mrb[23].mxu1  ;;  %3948 = vmatprep.subr.bf16.mxu0 %v8042_v43  ;;  %v8047_v1 = vld [vmem:[#allocation261_spill] sm:$0xff]  ;;  %vm1893_vm7 = vcmp.gt.s32.totalorder %v8050_v59, %v1844_v39  ;;  %v8069_v39 = vld [vmem:[#allocation64_spill] sm:$0xff] }
 0x270   : >> { %v1528_v28 = vadd.f32 %v3280_v20, %v6733_v41  ;;  %v6790_v50 = vmul.f32 %v2447_v9, %v2440_v6  ;;  %v1649_v8 = vsub.f32 1.0, %v8047_v1  ;;  %v8049_v20 = vld [vmem:[#allocation313_spill] sm:$0xff] }
 0x271   : >> { %v1661_v4 = vadd.f32 %v1654_v35, %v1623_v33  ;;  %v3281_v49 = vpop.f32.mrb[26].mxu0  ;;  %v1843_v38 = vshrl.u32 %v8049_v20, 16  ;;  %v8051_v33 = vld [vmem:[#allocation314_spill] sm:$0xff]  ;;  %v8071_v20 = vld [vmem:[#allocation304_spill] sm:$0xff] }
 0x272   : >> { %v3282_v17 = vpop.f32.mrb[27].mxu0  ;;  %v1627_v40 = vpop.f32.mrb[24].mxu1  ;;  %3950 = vmatpush3.bf16.msra.mxu0 %v8043_v2  ;;  %v1656_v44 = vmul.f32 %v1649_v8, %v1642_v24  ;;  %v1851_v19 = vshrl.u32 %v8051_v33, 16  ;;  %v8055_v2 = vld [vmem:[#allocation316_spill] sm:$0xff]  ;;  %v8064_v8 = vld [vmem:[#allocation49_spill] sm:$0xff]  ;;  %v8074_v33 = vld [vmem:[#allocation79_spill] sm:$0xff] }
 0x273   : >> { %v3283_v45 = vadd.f32 %v3282_v17, %v3281_v49  ;;  %v1628_v55 = vadd.f32 %v1627_v40, %v1528_v28  ;;  %vm1668_vm5 = vcmp.gt.f32.partialorder %v1661_v4, 0.5  ;;  %v3584_v26 = vpop.f32.mrb[25].mxu1  ;;  %3952 = vmatprep.subr.bf16.mxu0 %v8044_v30  ;;  %v2441_v41 = vmul.f32 0.2, %v1661_v4  ;;  %v8052_v49 = vld [vmem:[#allocation14_spill] sm:$0xff]  ;;  %v8057_v30 = vld [vmem:[#allocation21_spill] sm:$0xff] }
 0x274   : >> { %v2985_v31 = vsel %vm1668_vm5, 1.0, %v7920_v11  ;;  %3633 = vmatmul.mubr.msk.f32.gmra.mrb[36].mxu0 %vm1668_vm5, %v7848_v14  ;;  %vm1892_vm9 = vcmp.gt.s32.totalorder %v8052_v49, %v1843_v38  ;;  %v8054_v40 = vld [vmem:[#allocation22_spill] sm:$0xff]  ;;  %v8056_v26 = vld [vmem:[#allocation301_spill] sm:$0xff]  ;;  %v8063_v24 = vld [vmem:[#allocation320_spill] sm:$0xff] }
 0x275   : >> { %v1662_v56 = vadd.f32 %v1655_v29, %v1628_v55  ;;  %v2448_v0 = vsub.f32 1.0, %v2985_v31  ;;  %v1533_v34 = vadd.f32 %v3283_v45, %v6736_v51  ;;  %3635 = vmatprep.mubr.msk.f32.mxu0 %vm4860_vm13, %v7920_v11  ;;  %v8053_v29 = vld [vmem:[#allocation315_spill] sm:$0xff]  ;;  %vm1900_vm10 = vcmp.gt.s32.totalorder %v8054_v40, %v1851_v19  ;;  %v8058_v31 = vld [vmem:[#allocation317_spill] sm:$0xff]  ;;  %v8075_v19 = vld [vmem:[#allocation330_spill] sm:$0xff] }
 0x276   : >> { %3954 = vmatpush3.bf16.msra.mxu0 %v8045_v54  ;;  %v1850_v17 = vshrl.u32 %v8053_v29, 16  ;;  %v1858_v45 = vshrl.u32 %v8055_v2, 16  ;;  %v8061_v54 = vld [vmem:[#allocation302_spill] sm:$0xff]  ;;  %v1864_v1 = vshrl.u32 %v8063_v24, 16  ;;  %v8072_v38 = vld [vmem:[#allocation63_spill] sm:$0xff]  ;;  %v8081_v2 = vld [vmem:[#allocation93_spill] sm:$0xff] }
 0x277   : >> { %vm1669_vm6 = vcmp.gt.f32.partialorder %v1662_v56, 0.5  ;;  %3987 = vmatprep.subr.bf16.mxu0 %v7837_v36  ;;  %v6801_v16 = vmul.f32 %v2448_v0, %v2441_v41  ;;  %v2442_v62 = vmul.f32 0.2, %v1662_v56  ;;  %v1857_v41 = vshrl.u32 %v8058_v31, 16  ;;  %v8059_v56 = vld [vmem:[#allocation31_spill] sm:$0xff] }
 0x278   : >> { %v2986_v7 = vsel %vm1669_vm6, 1.0, %v7920_v11  ;;  %3636 = vmatmul.mubr.msk.f32.gmra.mrb[38].mxu0 %vm1669_vm6, %v7848_v14  ;;  %vm1899_vm11 = vcmp.gt.s32.totalorder %v8057_v30, %v1850_v17  ;;  %vm1907_vm12 = vcmp.gt.s32.totalorder %v8059_v56, %v1858_v45  ;;  %v8060_v0 = vld [vmem:[#allocation319_spill] sm:$0xff]  ;;  %v8079_v17 = vld [vmem:[#allocation98_spill] sm:$0xff]  ;;  %v1868_v24 = vshrl.u32 %v6490_v5, 16 }
 0x279   : >> { %v2449_v51 = vsub.f32 1.0, %v2986_v7  ;;  %3638 = vmatprep.mubr.msk.f32.mxu0 %vm4860_vm13, %v7920_v11  ;;  %vm1906_vm14 = vcmp.gt.s32.totalorder %v8062_v3, %v1857_v41  ;;  %v8065_v7 = vld [vmem:[#allocation322_spill] sm:$0xff]  ;;  %v8078_v49 = vld [vmem:[#allocation331_spill] sm:$0xff]  ;;  %v1889_v5 = vshrl.u32 %v6559_v58, 16 }
 0x27a   : >> { %v1885_v29 = vshrl.u32 %v8078_v49, 16  ;;  %v8080_v40 = vld [vmem:[#allocation307_spill] sm:$0xff]  ;;  %v8082_v45 = vld [vmem:[#allocation310_spill] sm:$0xff] }
 0x27b   : >> { %v6809_v35 = vmul.f32 %v2449_v51, %v2442_v62  ;;  %v1872_v62 = vshrl.u32 %v8065_v7, 16  ;;  %v8066_v51 = vld [vmem:[#allocation303_spill] sm:$0xff]  ;;  %v8085_v41 = vld [vmem:[#allocation18_spill] sm:$0xff] }
 0x27c   : >> { %vm1934_vm6 = vcmp.gt.s32.totalorder %v8081_v2, %v1885_v29  ;;  %v8084_v31 = vld [vmem:[#allocation311_spill] sm:$0xff]  ;;  %v8086_v56 = vld [vmem:[#allocation338_spill] sm:$0xff] }
 0x27d   : >> { %v1632_v27 = vpop.f32.mrb[26].mxu1  ;;  %vm1921_vm1 = vcmp.gt.s32.totalorder %v8069_v39, %v1872_v62 }
 0x27e   : >> { %v1633_v42 = vadd.f32 %v1632_v27, %v1533_v34  ;;  %v3587_v6 = vpop.f32.mrb[27].mxu1  ;;  %v1865_v34 = vshrl.u32 %v8060_v0, 16  ;;  %v8068_v27 = vld [vmem:[#allocation323_spill] sm:$0xff]  ;;  %v1854_v0 = vshrl.u32 %v8086_v56, 16 }
 0x27f   : >> { %v1871_v48 = vshrl.u32 %v8068_v27, 16 }
 0x280   : >> { %v1663_v9 = vadd.f32 %v1656_v44, %v1633_v42  ;;  %vm1914_vm15 = vcmp.gt.s32.totalorder %v8064_v8, %v1865_v34  ;;  %v8067_v44 = vld [vmem:[#allocation44_spill] sm:$0xff]  ;;  %v8070_v42 = vld [vmem:[#allocation326_spill] sm:$0xff]  ;;  %v8087_v34 = vld [vmem:[#allocation25_spill] sm:$0xff]  ;;  %v1882_v8 = vshrl.u32 %v6534_v10, 16 }
 0x281   : >> { %vm1913_vm0 = vcmp.gt.s32.totalorder %v8067_v44, %v1864_v1  ;;  %v1879_v6 = vshrl.u32 %v8070_v42, 16  ;;  %vm1920_vm2 = vcmp.gt.s32.totalorder %v8072_v38, %v1871_v48  ;;  %v1875_v1 = vshrl.u32 %v6516_v37, 16  ;;  %v3362_v37 = vpop.f32.mrb[28].mxu1 }
 0x282   : >> { %vm1670_vm8 = vcmp.gt.f32.partialorder %v1663_v9, 0.5  ;;  %v2443_v28 = vmul.f32 0.2, %v1663_v9  ;;  %v8073_v9 = vld [vmem:[#allocation327_spill] sm:$0xff]  ;;  %v3363_v10 = vpop.f32.mrb[29].mxu1 }
 0x283   : >> { %v2987_v43 = vsel %vm1670_vm8, 1.0, %v7920_v11  ;;  %3639 = vmatmul.mubr.msk.f32.gmra.mrb[40].mxu0 %vm1670_vm8, %v7848_v14  ;;  %v1878_v59 = vshrl.u32 %v8073_v9, 16  ;;  %vm1928_vm3 = vcmp.gt.s32.totalorder %v8074_v33, %v1879_v6  ;;  %vm1903_vm8 = vcmp.gt.s32.totalorder %v8087_v34, %v1854_v0 }
 0x284   : >> { %v2450_v4 = vsub.f32 1.0, %v2987_v43  ;;  %3065 = vmatprep.mubr.msk.f32.mxu0 %vm1893_vm7, %v7848_v14  ;;  %v1886_v43 = vshrl.u32 %v8075_v19, 16  ;;  %v3364_v7 = vadd.f32 %v3363_v10, %v3362_v37 }
 0x285   : >> { %v3365_v62 = vpop.f32.mrb[30].mxu1 }
 0x286   : >> { %v6822_v55 = vmul.f32 %v2450_v4, %v2443_v28  ;;  %v8076_v28 = vld [vmem:[#allocation305_spill] sm:$0xff]  ;;  %v8077_v4 = vld [vmem:[#allocation78_spill] sm:$0xff]  ;;  %vm1935_vm5 = vcmp.gt.s32.totalorder %v8079_v17, %v1886_v43 }
 0x287   : >> { %3066 = vmatmul.mubr.msk.f32.vlgmr.msra.gmra.mrb[42].mxu0 %vm1892_vm9, %v7848_v14  ;;  %vm1927_vm4 = vcmp.gt.s32.totalorder %v8077_v4, %v1878_v59 }
 0x288   : >> { %3989 = vmatpush3.bf16.msra.mxu0 %v8056_v26  ;;  %3067 = vmatprep.mubr.msk.f32.mxu0 %vm1900_vm10, %v7848_v14  ;;  %v8083_v26 = vld [vmem:[#allocation336_spill] sm:$0xff]  ;;  %vm1917_vm10 = vcmp.gt.s32.totalorder %v7950_v12, %v1868_v24 }
 0x289   : >> { %3990 = vmatprep.subr.bf16.mxu0 %v7837_v36  ;;  %v1847_v30 = vshrl.u32 %v8083_v26, 16 }
 0x28b   : >> { %3068 = vmatmul.mubr.msk.f32.gmra.mrb[44].mxu0 %vm1899_vm11, %v7848_v14  ;;  %vm1896_vm7 = vcmp.gt.s32.totalorder %v8085_v41, %v1847_v30  ;;  %vm1924_vm11 = vcmp.gt.s32.totalorder %v7960_v53, %v1875_v1 }
 0x28c   : >> { %3992 = vmatpush3.bf16.msra.mxu0 %v8061_v54  ;;  %3069 = vmatprep.mubr.msk.f32.mxu0 %vm1907_vm12, %v7848_v14  ;;  %v8088_v54 = vld [vmem:[#allocation339_spill] sm:$0xff]  ;;  %vm1931_vm12 = vcmp.gt.s32.totalorder %v7964_v32, %v1882_v8 }
 0x28d   : >> { %3993 = vmatprep.subr.bf16.mxu0 %v7837_v36  ;;  %v1861_v3 = vshrl.u32 %v8088_v54, 16 }
 0x28f   : >> { %3070 = vmatmul.mubr.msk.f32.gmra.mrb[46].mxu0 %vm1906_vm14, %v7848_v14  ;;  %vm1938_vm14 = vcmp.gt.s32.totalorder %v7968_v18, %v1889_v5 }
 0x290   : >> { %3995 = vmatpush3.bf16.msra.mxu0 %v8066_v51  ;;  %3071 = vmatprep.mubr.msk.f32.mxu0 %vm1914_vm15, %v7848_v14  ;;  %v3366_v51 = vpop.f32.mrb[31].mxu1 }
 0x291   : >> { %3996 = vmatprep.subr.bf16.mxu0 %v7837_v36  ;;  %v3367_v44 = vadd.f32 %v3366_v51, %v3365_v62  ;;  %v3368_v27 = vpop.f32.mrb[32].mxu1 }
 0x292   : >> { %v3369_v48 = vpop.f32.mrb[33].mxu1 }
 0x293   : >> { %3072 = vmatmul.mubr.msk.f32.gmra.mrb[48].mxu0 %vm1913_vm0, %v7848_v14  ;;  %v3370_v9 = vadd.f32 %v3369_v48, %v3368_v27 }
 0x294   : >> { %3998 = vmatpush3.bf16.msra.mxu0 %v8071_v20  ;;  %3073 = vmatprep.mubr.msk.f32.mxu0 %vm1921_vm1, %v7848_v14 }
 0x295   : >> { %3999 = vmatprep.subr.bf16.mxu0 %v7837_v36  ;;  %v3371_v39 = vpop.f32.mrb[34].mxu1 }
 0x296   : >> { %v3372_v42 = vpop.f32.mrb[35].mxu1 }
 0x297   : >> { %3074 = vmatmul.mubr.msk.f32.gmra.mrb[50].mxu0 %vm1920_vm2, %v7848_v14  ;;  %v3373_v59 = vadd.f32 %v3372_v42, %v3371_v39 }
 0x298   : >> { %4001 = vmatpush3.bf16.msra.mxu0 %v8076_v28  ;;  %3075 = vmatprep.mubr.msk.f32.mxu0 %vm1928_vm3, %v7848_v14 }
 0x299   : >> { %4002 = vmatprep.subr.bf16.mxu0 %v7837_v36 }
 0x29b   : >> { %3076 = vmatmul.mubr.msk.f32.gmra.mrb[52].mxu0 %vm1927_vm4, %v7848_v14  ;;  %v3374_v58 = vpop.f32.mrb[36].mxu1 }
 0x29c   : >> { %4004 = vmatpush3.bf16.msra.mxu0 %v8080_v40  ;;  %3077 = vmatprep.mubr.msk.f32.mxu0 %vm1935_vm5, %v7848_v14  ;;  %v3375_v6 = vpop.f32.mrb[37].mxu1 }
 0x29d   : >> { %4005 = vmatprep.subr.bf16.mxu0 %v7837_v36  ;;  %v3376_v33 = vadd.f32 %v3375_v6, %v3374_v58 }
 0x29f   : >> { %3078 = vmatmul.mubr.msk.f32.gmra.mrb[54].mxu0 %vm1934_vm6, %v7848_v14  ;;  %v3377_v20 = vpop.f32.mrb[38].mxu1 }
 0x2a0   : >> { %4007 = vmatpush3.bf16.msra.mxu0 %v8082_v45  ;;  %3673 = vmatprep.mubr.msk.f32.mxu0 %vm4860_vm13, %v7920_v11  ;;  %v3378_v38 = vpop.f32.mrb[39].mxu1 }
 0x2a1   : >> { %4008 = vmatprep.subr.bf16.mxu0 %v7837_v36  ;;  %v8089_v36 = vld [vmem:[#allocation37_spill] sm:$0xff]  ;;  %v6907_v19 = vadd.f32 %v3378_v38, %v3377_v20 }
 0x2a2   : >> { %vm1910_vm9 = vcmp.gt.s32.totalorder %v8089_v36, %v1861_v3 }
 0x2a4   : >> { %4010 = vmatpush3.bf16.msra.mxu0 %v8084_v31 }
 0x2a7   : >> { %3674 = vmatmul.mubr.msk.f32.vlgmr.msra.gmra.mrb[56].mxu0 %vm1896_vm7, %v7848_v14 }
 0x2a8   : >> { %3676 = vmatprep.mubr.msk.f32.mxu0 %vm4860_vm13, %v7920_v11 }
 0x2ab   : >> { %3677 = vmatmul.mubr.msk.f32.gmra.mrb[58].mxu0 %vm1903_vm8, %v7848_v14 }
 0x2ac   : >> { %3679 = vmatprep.mubr.msk.f32.mxu0 %vm4860_vm13, %v7920_v11 }
 0x2af   : >> { %3680 = vmatmul.mubr.msk.f32.gmra.mrb[60].mxu0 %vm1910_vm9, %v7848_v14 }
 0x2b0   : >> { %3682 = vmatprep.mubr.msk.f32.mxu0 %vm4860_vm13, %v7920_v11 }
 0x2b3   : >> { %3683 = vmatmul.mubr.msk.f32.gmra.mrb[62].mxu0 %vm1917_vm10, %v7848_v14 }
 0x2b4   : >> { %3685 = vmatprep.mubr.msk.f32.mxu0 %vm4860_vm13, %v7920_v11 }
 0x2b7   : >> { %3686 = vmatmul.mubr.msk.f32.gmra.mrb[64].mxu0 %vm1924_vm11, %v7848_v14 }
 0x2b8   : >> { %3688 = vmatprep.mubr.msk.f32.mxu0 %vm4860_vm13, %v7920_v11 }
 0x2bb   : >> { %3689 = vmatmul.mubr.msk.f32.gmra.mrb[66].mxu0 %vm1931_vm12, %v7848_v14 }
 0x2bc   : >> { %3691 = vmatprep.mubr.msk.f32.mxu0 %vm4860_vm13, %v7920_v11 }
 0x2bf   : >> { %3692 = vmatmul.mubr.msk.f32.gmra.mrb[68].mxu0 %vm1938_vm14, %v7848_v14 }
 0x2d4   : >> { %v3380_v43 = vpop.f32.mrb[40].mxu1 }
 0x2d5   : >> { %v3381_v28 = vpop.f32.mrb[41].mxu1 }
 0x2d6   : >> { %v6909_v49 = vadd.f32 %v3381_v28, %v3380_v43 }
 0x2d8   : >> { %v3468_v4 = vpop.f32.mrb[42].mxu1 }
 0x2d9   : >> { %v3469_v29 = vpop.f32.mrb[43].mxu1 }
 0x2da   : >> { %v3470_v17 = vadd.f32 %v3469_v29, %v3468_v4 }
 0x2dc   : >> { %v3471_v40 = vpop.f32.mrb[44].mxu1 }
 0x2dd   : >> { %v3472_v2 = vpop.f32.mrb[45].mxu1 }
 0x2de   : >> { %v3473_v45 = vadd.f32 %v3472_v2, %v3471_v40  ;;  %v2104_v2 = vadd.f32 %v3364_v7, %v7995_v61 }
 0x2e0   : >> { %v3474_v26 = vpop.f32.mrb[46].mxu1 }
 0x2e1   : >> { %v3475_v30 = vpop.f32.mrb[47].mxu1 }
 0x2e2   : >> { %v3476_v31 = vadd.f32 %v3475_v30, %v3474_v26  ;;  %v2109_v30 = vadd.f32 %v3367_v44, %v7995_v61  ;;  %v2124_v44 = vadd.f32 %v3376_v33, %v7995_v61 }
 0x2e4   : >> { %v3477_v41 = vpop.f32.mrb[48].mxu1 }
 0x2e5   : >> { %v3478_v56 = vpop.f32.mrb[49].mxu1 }
 0x2e6   : >> { %v3479_v0 = vadd.f32 %v3478_v56, %v3477_v41 }
 0x2e8   : >> { %v3480_v34 = vpop.f32.mrb[50].mxu1 }
 0x2e9   : >> { %v3481_v54 = vpop.f32.mrb[51].mxu1 }
 0x2ea   : >> { %v3482_v3 = vadd.f32 %v3481_v54, %v3480_v34 }
 0x2ec   : >> { %v3483_v36 = vpop.f32.mrb[52].mxu1 }
 0x2ed   : >> { %v3484_v24 = vpop.f32.mrb[53].mxu1 }
 0x2ee   : >> { %v3485_v1 = vadd.f32 %v3484_v24, %v3483_v36  ;;  %v2114_v24 = vadd.f32 %v3370_v9, %v7995_v61  ;;  %v2129_v9 = vadd.f32 %v6907_v19, %v7995_v61 }
 0x2f0   : >> { %v3486_v8 = vpop.f32.mrb[54].mxu1 }
 0x2f1   : >> { %v3487_v5 = vpop.f32.mrb[55].mxu1 }
 0x2f2   : >> { %v3488_v37 = vadd.f32 %v3487_v5, %v3486_v8 }
 0x329   : >> { %v6911_v10 = vpop.f32.mrb[28].mxu0 }
 0x32a   : >> { %v3622_v62 = vpop.f32.mrb[29].mxu0 }
 0x32e   : >> { %v6913_v51 = vpop.f32.mrb[30].mxu0 }
 0x32f   : >> { %v3625_v27 = vpop.f32.mrb[31].mxu0 }
 0x333   : >> { %v6915_v48 = vpop.f32.mrb[32].mxu0 }
 0x334   : >> { %v3628_v39 = vpop.f32.mrb[33].mxu0 }
 0x340   : >> { %v6917_v42 = vpop.f32.mrb[34].mxu0 }
 0x341   : >> { %v3631_v58 = vpop.f32.mrb[35].mxu0 }
 0x342   : >> { %v2119_v58 = vadd.f32 %v3373_v59, %v7995_v61 }
 0x347   : >> { %v6919_v6 = vpop.f32.mrb[36].mxu0 }
 0x348   : >> { %v3634_v20 = vpop.f32.mrb[37].mxu0 }
 0x34b   : >> { %v6921_v38 = vpop.f32.mrb[38].mxu0 }
 0x34c   : >> { %v3637_v43 = vpop.f32.mrb[39].mxu0 }
 0x356   : >> { %v6923_v28 = vpop.f32.mrb[40].mxu0 }
 0x357   : >> { %v3640_v4 = vpop.f32.mrb[41].mxu0 }
 0x35a   : >> { %v3415_v29 = vpop.f32.mrb[42].mxu0 }
 0x35b   : >> { %v3416_v40 = vpop.f32.mrb[43].mxu0 }
 0x35c   : >> { %v3417_v26 = vadd.f32 %v3416_v40, %v3415_v29 }
 0x35e   : >> { %v2204_v41 = vadd.f32 %v3417_v26, %v2104_v2  ;;  %v3418_v56 = vpop.f32.mrb[44].mxu0 }
 0x35f   : >> { %v3419_v34 = vpop.f32.mrb[45].mxu0 }
 0x360   : >> { %v3420_v54 = vadd.f32 %v3419_v34, %v3418_v56  ;;  %v2304_v36 = vadd.f32 %v3470_v17, %v2204_v41 }
 0x362   : >> { %v2209_v8 = vadd.f32 %v3420_v54, %v2109_v30  ;;  %v3421_v5 = vpop.f32.mrb[46].mxu0  ;;  %v2134_v54 = vadd.f32 %v6909_v49, %v7995_v61 }
 0x363   : >> { %v3422_v62 = vpop.f32.mrb[47].mxu0 }
 0x364   : >> { %v3423_v27 = vadd.f32 %v3422_v62, %v3421_v5  ;;  %v2309_v39 = vadd.f32 %v3473_v45, %v2209_v8 }
 0x366   : >> { %v2214_v20 = vadd.f32 %v3423_v27, %v2114_v24  ;;  %v3424_v43 = vpop.f32.mrb[48].mxu0 }
 0x367   : >> { %v3425_v7 = vpop.f32.mrb[49].mxu0 }
 0x368   : >> { %v3426_v4 = vadd.f32 %v3425_v7, %v3424_v43  ;;  %v2314_v29 = vadd.f32 %v3476_v31, %v2214_v20 }
 0x36a   : >> { %v2219_v40 = vadd.f32 %v3426_v4, %v2119_v58  ;;  %v3427_v2 = vpop.f32.mrb[50].mxu0 }
 0x36b   : >> { %v3428_v26 = vpop.f32.mrb[51].mxu0 }
 0x36c   : >> { %v3429_v17 = vadd.f32 %v3428_v26, %v3427_v2  ;;  %v2319_v41 = vadd.f32 %v3479_v0, %v2219_v40 }
 0x36e   : >> { %v2224_v30 = vadd.f32 %v3429_v17, %v2124_v44  ;;  %v3430_v56 = vpop.f32.mrb[52].mxu0 }
 0x36f   : >> { %v3431_v45 = vpop.f32.mrb[53].mxu0 }
 0x370   : >> { %v3432_v34 = vadd.f32 %v3431_v45, %v3430_v56  ;;  %v2324_v59 = vadd.f32 %v3482_v3, %v2224_v30 }
 0x372   : >> { %v2229_v24 = vadd.f32 %v3432_v34, %v2129_v9  ;;  %v3433_v31 = vpop.f32.mrb[54].mxu0  ;;  %v8093_v34 = vld [vmem:[#allocation253_spill] sm:$0xff] }
 0x373   : >> { %v3434_v8 = vpop.f32.mrb[55].mxu0 }
 0x374   : >> { %v3435_v33 = vadd.f32 %v3434_v8, %v3433_v31  ;;  %v2329_v5 = vadd.f32 %v3485_v1, %v2229_v24  ;;  %v8095_v8 = vld [vmem:[#allocation252_spill] sm:$0xff] }
 0x376   : >> { %v2234_v62 = vadd.f32 %v3435_v33, %v2134_v54  ;;  %v8094_v54 = vld [vmem:[#allocation259_spill] sm:$0xff]  ;;  %v1793_v33 = vsub.f32 1.0, %v8095_v8 }
 0x377   : >> { %v1786_v31 = vmul.f32 0.2, %v8094_v54 }
 0x378   : >> { %v2334_v27 = vadd.f32 %v3488_v37, %v2234_v62 }
 0x37a   : >> { %v2403_v58 = vpop.f32.mrb[56].mxu0 }
 0x37b   : >> { %v2404_v0 = vadd.f32 %v2403_v58, %v2304_v36  ;;  %v3675_v20 = vpop.f32.mrb[57].mxu0 }
 0x37c   : >> { %v1800_v20 = vmul.f32 %v1793_v33, %v1786_v31 }
 0x37d   : >> { %v6935_v9 = vadd.f32 %v6753_v60, %v2404_v0  }
 0x37e   : >> { %v2408_v19 = vpop.f32.mrb[58].mxu0 }
 0x37f   : >> { %vm2465_vm15 = vcmp.gt.f32.partialorder %v6935_v9, 0.5  ;;  %v2409_v3 = vadd.f32 %v2408_v19, %v2309_v39  ;;  %v3678_v43 = vpop.f32.mrb[59].mxu0 }
 0x380   : >> { %v6939_v49 = vsel %vm2465_vm15, 1.0, %v7920_v11   ;;  %3727 = vmatmul.mubr.msk.f32.vlgmr.msra.gmra.mrb[56].mxu1 %vm2465_vm15, %v7848_v14 }
 0x381   : >> { %v8090_v26 = vmov %v6939_v49  ;;  %v6943_v24 = vadd.f32 %v6762_v63, %v2409_v3   ;;  %3729 = vmatprep.mubr.msk.f32.mxu1 %vm4860_vm13, %v7920_v11  ;;  %v8098_v49 = vld [vmem:[#allocation258_spill] sm:$0xff] }
 0x382   : >> { %v2413_v1 = vpop.f32.mrb[60].mxu0 }
 0x383   : >> { %vm2466_vm0 = vcmp.gt.f32.partialorder %v6943_v24, 0.5  ;;  %v2414_v60 = vadd.f32 %v2413_v1, %v2314_v29  ;;  %v3681_v37 = vpop.f32.mrb[61].mxu0 }
 0x384   : >> { %v6949_v0 = vsel %vm2466_vm0, 1.0, %v7920_v11   ;;  %3730 = vmatmul.mubr.msk.f32.gmra.mrb[58].mxu1 %vm2466_vm0, %v7848_v14 }
 0x385   : >> { %v6953_v36 = vadd.f32 %v6772_v52, %v2414_v60   ;;  %3732 = vmatprep.mubr.msk.f32.mxu1 %vm4860_vm13, %v7920_v11  ;;  %v1787_v60 = vmul.f32 0.2, %v8098_v49 }
 0x386   : >> { %v2418_v63 = vpop.f32.mrb[62].mxu0 }
 0x387   : >> { %vm2467_vm1 = vcmp.gt.f32.partialorder %v6953_v36, 0.5  ;;  %v2419_v39 = vadd.f32 %v2418_v63, %v2319_v41  ;;  %v3684_v7 = vpop.f32.mrb[63].mxu0  ;;  %v8099_v63 = vld [vmem:[#allocation251_spill] sm:$0xff] }
 0x388   : >> { %v6959_v1 = vsel %vm2467_vm1, 1.0, %v7920_v11   ;;  %3733 = vmatmul.mubr.msk.f32.gmra.mrb[60].mxu1 %vm2467_vm1, %v7848_v14  ;;  %v1794_v7 = vsub.f32 1.0, %v8099_v63 }
 0x389   : >> { %v6963_v39 = vadd.f32 %v6790_v50, %v2419_v39   ;;  %3735 = vmatprep.mubr.msk.f32.mxu1 %vm4860_vm13, %v7920_v11 }
 0x38a   : >> { %v2423_v52 = vpop.f32.mrb[64].mxu0 }
 0x38b   : >> { %vm2468_vm2 = vcmp.gt.f32.partialorder %v6963_v39, 0.5  ;;  %v2424_v4 = vadd.f32 %v2423_v52, %v2324_v59  ;;  %v3687_v29 = vpop.f32.mrb[65].mxu0  ;;  %v1792_v59 = vsub.f32 1.0, %v8093_v34 }
 0x38c   : >> { %v6969_v62 = vsel %vm2468_vm2, 1.0, %v7920_v11   ;;  %3736 = vmatmul.mubr.msk.f32.gmra.mrb[62].mxu1 %vm2468_vm2, %v7848_v14 }
 0x38d   : >> { %v6973_v44 = vadd.f32 %v6801_v16, %v2424_v4   ;;  %3738 = vmatprep.mubr.msk.f32.mxu1 %vm4860_vm13, %v7920_v11  ;;  %v8100_v4 = vld [vmem:[#allocation257_spill] sm:$0xff] }
 0x38e   : >> { %v2428_v50 = vpop.f32.mrb[66].mxu0  ;;  %v1788_v29 = vmul.f32 0.2, %v8100_v4 }
 0x38f   : >> { %v8091_v17 = vmov %v6973_v44  ;;  %v2429_v40 = vadd.f32 %v2428_v50, %v2329_v5  ;;  %v3690_v2 = vpop.f32.mrb[67].mxu0  ;;  %v8096_v5 = vld [vmem:[#allocation239_spill] sm:$0xff]  ;;  %v8101_v44 = vld [vmem:[#allocation250_spill] sm:$0xff] }
 0x390   : >> { %vm2469_vm3 = vcmp.gt.f32.partialorder %v8091_v17, 0.5  ;;  %v8097_v43 = vmov %v8096_v5  ;;  %v1752_v58 = vadd.f32 %v8096_v5, %v6911_v10  ;;  %v1795_v50 = vsub.f32 1.0, %v8101_v44  ;;  %v8105_v5 = vld [vmem:[#allocation248_spill] sm:$0xff] }
 0x391   : >> { %v6979_v41 = vsel %vm2469_vm3, 1.0, %v7920_v11   ;;  %3739 = vmatmul.mubr.msk.f32.gmra.mrb[64].mxu1 %vm2469_vm3, %v7848_v14  ;;  %v6983_v3 = vadd.f32 %v6809_v35, %v2429_v40   ;;  %v8092_v35 = vld [vmem:[#allocation260_spill] sm:$0xff]  ;;  %v1801_v40 = vmul.f32 %v1794_v7, %v1787_v60  ;;  %v1772_v33 = vadd.f32 %v8097_v43, %v6919_v6  ;;  %v8106_v60 = vld [vmem:[#allocation254_spill] sm:$0xff]  ;;  %v8107_v7 = vld [vmem:[#allocation247_spill] sm:$0xff] }
 0x392   : >> { %3741 = vmatprep.mubr.msk.f32.mxu1 %vm4860_vm13, %v7920_v11  ;;  %v2433_v16 = vpop.f32.mrb[68].mxu0  ;;  %v1785_v45 = vmul.f32 0.2, %v8092_v35  ;;  %v1802_v10 = vmul.f32 %v1795_v50, %v1788_v29  ;;  %v8103_v35 = vld [vmem:[#allocation249_spill] sm:$0xff]  ;;  %v1791_v63 = vmul.f32 0.2, %v8106_v60 }
 0x393   : >> { %vm2470_vm4 = vcmp.gt.f32.partialorder %v6983_v3, 0.5  ;;  %v2434_v30 = vadd.f32 %v2433_v16, %v2334_v27  ;;  %v3693_v56 = vpop.f32.mrb[69].mxu0  ;;  %v1762_v16 = vadd.f32 %v8097_v43, %v6915_v48  ;;  %v8104_v48 = vld [vmem:[#allocation255_spill] sm:$0xff] }
 0x394   : >> { %v6989_v37 = vsel %vm2470_vm4, 1.0, %v7920_v11  }
 0x395   : >> { %3742 = vmatmul.mubr.msk.f32.gmra.mrb[66].mxu1 %vm2470_vm4, %v7848_v14  ;;  %v6993_v27 = vadd.f32 %v6822_v55, %v2434_v30   ;;  %v1799_v55 = vmul.f32 %v1792_v59, %v1785_v45  ;;  %v8102_v30 = vld [vmem:[#allocation256_spill] sm:$0xff]  ;;  %v1796_v45 = vsub.f32 1.0, %v8103_v35  ;;  %v1808_v59 = vadd.f32 %v1801_v40, %v1762_v16 }
 0x396   : >> { %3744 = vmatprep.mubr.msk.f32.mxu1 %vm4860_vm13, %v7920_v11  ;;  %v1789_v56 = vmul.f32 0.2, %v8102_v30 }
 0x397   : >> { %vm2471_vm5 = vcmp.gt.f32.partialorder %v6993_v27, 0.5  ;;  %v1806_v52 = vadd.f32 %v1799_v55, %v1752_v58  ;;  %v1790_v55 = vmul.f32 0.2, %v8104_v48  ;;  %v1797_v58 = vsub.f32 1.0, %v8105_v5 }
 0x398   : >> { %v6999_v19 = vsel %vm2471_vm5, 1.0, %v7920_v11   ;;  %v1803_v54 = vmul.f32 %v1796_v45, %v1789_v56  ;;  %vm1815_vm7 = vcmp.gt.f32.partialorder %v1808_v59, 0.5 }
 0x399   : >> { %3745 = vmatmul.mubr.msk.f32.gmra.mrb[68].mxu1 %vm2471_vm5, %v7848_v14  ;;  %v1757_v14 = vadd.f32 %v8097_v43, %v6913_v51  ;;  %vm1813_vm13 = vcmp.gt.f32.partialorder %v1806_v52, 0.5  ;;  %v1767_v51 = vadd.f32 %v8097_v43, %v6917_v42  ;;  %v2997_v40 = vsel %vm1815_vm7, 1.0, %v7920_v11 }
 0x39a   : >> { %v2995_v34 = vsel %vm1813_vm13, 1.0, %v7920_v11  ;;  %v1810_v6 = vadd.f32 %v1803_v54, %v1772_v33  ;;  %v1804_v16 = vmul.f32 %v1797_v58, %v1790_v55  ;;  %v2588_v54 = vmul.f32 0.2, %v1808_v59  ;;  %v8110_v55 = vld [vmem:[#allocation245_spill] sm:$0xff] }
 0x39b   : >> { %v1807_v2 = vadd.f32 %v1800_v20, %v1757_v14  ;;  %v2593_v31 = vsub.f32 1.0, %v2995_v34  ;;  %v2586_v20 = vmul.f32 0.2, %v1806_v52  ;;  %v1809_v49 = vadd.f32 %v1802_v10, %v1767_v51  ;;  %v8108_v10 = vld [vmem:[#allocation246_spill] sm:$0xff] }
 0x39c   : >> { %v1798_v14 = vsub.f32 1.0, %v8107_v7  ;;  %v1777_v52 = vadd.f32 %v8097_v43, %v6921_v38  ;;  %v1834_v56 = vadd.f32 %v8108_v10, %v2995_v34  ;;  %vm1817_vm10 = vcmp.gt.f32.partialorder %v1810_v6, 0.5 }
 0x39d   : >> { %vm1814_vm6 = vcmp.gt.f32.partialorder %v1807_v2, 0.5  ;;  %v2600_v29 = vmul.f32 %v2593_v31, %v2586_v20  ;;  %v2587_v30 = vmul.f32 0.2, %v1807_v2  ;;  %vm1816_vm8 = vcmp.gt.f32.partialorder %v1809_v49, 0.5 }
 0x39e   : >> { %v2996_v8 = vsel %vm1814_vm6, 1.0, %v7920_v11  ;;  %v1805_v35 = vmul.f32 %v1798_v14, %v1791_v63  ;;  %v2595_v20 = vsub.f32 1.0, %v2997_v40  ;;  %v2998_v2 = vsel %vm1816_vm8, 1.0, %v7920_v11 }
 0x39f   : >> { %v2594_v50 = vsub.f32 1.0, %v2996_v8  ;;  %v1811_v38 = vadd.f32 %v1804_v16, %v1777_v52  ;;  %v1782_v34 = vadd.f32 %v8097_v43, %v6923_v28  ;;  %v1835_v60 = vadd.f32 %v8110_v55, %v2996_v8  ;;  %v8112_v8 = vld [vmem:[#allocation244_spill] sm:$0xff] }
 0x3a0   : >> { %v2602_v7 = vmul.f32 %v2595_v20, %v2588_v54 }
 0x3a1   : >> { %v2601_v48 = vmul.f32 %v2594_v50, %v2587_v30  ;;  %vm1818_vm12 = vcmp.gt.f32.partialorder %v1811_v38, 0.5  ;;  %v1812_v28 = vadd.f32 %v1805_v35, %v1782_v34  ;;  %v1836_v50 = vadd.f32 %v8112_v8, %v2997_v40 }
 0x3a3   : >> { %vm1819_vm15 = vcmp.gt.f32.partialorder %v1812_v28, 0.5 }
 0x453   : >> { %v2552_v4 = vpop.f32.mrb[56].mxu1 }
 0x454   : >> { %v2553_v42 = vadd.f32 %v8097_v43, %v2552_v4  ;;  %v3728_v44 = vpop.f32.mrb[57].mxu1 }
 0x455   : >> { %v2999_v44 = vsel %vm1817_vm10, 1.0, %v7920_v11 }
 0x456   : >> { %v7032_v31 = vadd.f32 %v2600_v29, %v2553_v42   ;;  %v2596_v42 = vsub.f32 1.0, %v2998_v2  ;;  %v2589_v29 = vmul.f32 0.2, %v1809_v49 }
 0x457   : >> { %v2557_v45 = vpop.f32.mrb[58].mxu1 }
 0x458   : >> { %vm2614_vm9 = vcmp.gt.f32.partialorder %v7032_v31, 0.5  ;;  %v2558_v51 = vadd.f32 %v8097_v43, %v2557_v45  ;;  %v3731_v5 = vpop.f32.mrb[59].mxu1  ;;  %v2603_v49 = vmul.f32 %v2596_v42, %v2589_v29  ;;  %v3000_v45 = vsel %vm1818_vm12, 1.0, %v7920_v11 }
 0x459   : >> { %v7039_v33 = vsel %vm2614_vm9, 1.0, %v7920_v11   ;;  %v3001_v42 = vsel %vm1819_vm15, 1.0, %v7920_v11  ;;  %v2591_v29 = vmul.f32 0.2, %v1811_v38 }
 0x45a   : >> { %v7044_v10 = vadd.f32 %v7039_v33, %v1834_v56   ;;  %v7046_v58 = vadd.f32 %v2601_v48, %v2558_v51   ;;  %v2597_v56 = vsub.f32 1.0, %v2999_v44  ;;  %v2590_v51 = vmul.f32 0.2, %v1810_v6  ;;  %v8115_v6 = vld [vmem:[#allocation242_spill] sm:$0xff] }
 0x45b   : >> { %v2562_v63 = vpop.f32.mrb[60].mxu1 }
 0x45c   : >> { %v8109_v14 = vmov %v7044_v10  ;;  %vm2615_vm11 = vcmp.gt.f32.partialorder %v7046_v58, 0.5  ;;  %v2563_v59 = vadd.f32 %v8097_v43, %v2562_v63  ;;  %v3734_v4 = vpop.f32.mrb[61].mxu1 }
 0x45d   : >> { %v7053_v20 = vsel %vm2615_vm11, 1.0, %v7920_v11  }
 0x45e   : >> { %v7056_v35 = vadd.f32 %v7053_v20, %v1835_v60   ;;  %v7058_v59 = vadd.f32 %v2602_v7, %v2563_v59   ;;  %v2604_v60 = vmul.f32 %v2597_v56, %v2590_v51  ;;  %v2598_v7 = vsub.f32 1.0, %v3000_v45 }
 0x45f   : >> { %v2567_v30 = vpop.f32.mrb[62].mxu1  ;;  %v2592_v56 = vmul.f32 0.2, %v1812_v28  ;;  %v8133_v28 = vmov %v8091_v17 }
 0x460   : >> { %v8111_v16 = vmov %v7056_v35  ;;  %vm2616_vm14 = vcmp.gt.f32.partialorder %v7058_v59, 0.5  ;;  %v2568_v52 = vadd.f32 %v8097_v43, %v2567_v30  ;;  %v3737_v10 = vpop.f32.mrb[63].mxu1  ;;  %v8114_v35 = vld [vmem:[#allocation243_spill] sm:$0xff] }
 0x461   : >> { %v3116_v48 = vsel %vm2616_vm14, 1.0, %v7920_v11   ;;  %v1837_v5 = vadd.f32 %v8114_v35, %v2998_v2  ;;  %v2599_v10 = vsub.f32 1.0, %v3001_v42  ;;  %v8116_v35 = vld [vmem:[#allocation241_spill] sm:$0xff] }
 0x462   : >> { %v7065_v34 = vadd.f32 %v3116_v48, %v1836_v50   ;;  %v2610_v4 = vadd.f32 %v2603_v49, %v2568_v52   ;;  %v2605_v52 = vmul.f32 %v2598_v7, %v2591_v29  ;;  %v1839_v38 = vadd.f32 %v8116_v35, %v3000_v45 }
 0x463   : >> { %v8124_v35 = vmov %v8111_v16 }
 0x464   : >> { %v8113_v54 = vmov %v7065_v34  ;;  %v2572_v40 = vpop.f32.mrb[64].mxu1  ;;  %vm2617_vm0 = vcmp.gt.f32.partialorder %v2610_v4, 0.5  ;;  %v1838_v34 = vadd.f32 %v8115_v6, %v2999_v44 }
 0x465   : >> { %v2573_v55 = vadd.f32 %v8097_v43, %v2572_v40  ;;  %v3740_v63 = vpop.f32.mrb[65].mxu1  ;;  %v3117_v8 = vsel %vm2617_vm0, 1.0, %v7920_v11   ;;  %v2644_v9 = vmul.f32 (%p7084_p11), 0.05, %v8113_v54 }
 0x466   : >> { %v7071_v30 = vadd.f32 %v3117_v8, %v1837_v5   ;;  %v8127_v45 = vmov %v3117_v8 }
 0x467   : >> { %v2611_v12 = vadd.f32 %v2604_v60, %v2573_v55   ;;  %v2606_v55 = vmul.f32 %v2599_v10, %v2592_v56  ;;  %v8117_v60 = vld [vmem:[#allocation240_spill] sm:$0xff]  ;;  %v8125_v10 = vmov %v8109_v14  ;;  %2651 = vst [vmem:[%s5692_s30 + $0x10] sm:$0xff] (%p7084_p11), %v2644_v9 }
 0x468   : >> { %v2577_v50 = vpop.f32.mrb[66].mxu1  ;;  %v1840_v7 = vadd.f32 %v8117_v60, %v3001_v42  ;;  %v8134_v42 = vmov %v6953_v36 }
 0x469   : >> { %vm2618_vm1 = vcmp.gt.f32.partialorder %v2611_v12, 0.5  ;;  %v2578_v2 = vadd.f32 %v8097_v43, %v2577_v50  ;;  %v3743_v49 = vpop.f32.mrb[67].mxu1  ;;  %v8128_v50 = vmov %v3116_v48 }
 0x46a   : >> { %v3118_v29 = vsel %vm2618_vm1, 1.0, %v7920_v11   ;;  %v8129_v49 = vmov %v7039_v33 }
 0x46b   : >> { %v2639_v13 = vadd.f32 %v3118_v29, %v1838_v34   ;;  %v2612_v5 = vadd.f32 %v2605_v52, %v2578_v2   ;;  %v8123_v34 = vmov %v8113_v54 }
 0x46c   : >> { %v2582_v51 = vpop.f32.mrb[68].mxu1 }
 0x46d   : >> { %vm2619_vm2 = vcmp.gt.f32.partialorder %v2612_v5, 0.5  ;;  %v2583_v40 = vadd.f32 %v8097_v43, %v2582_v51  ;;  %v3746_v44 = vpop.f32.mrb[69].mxu1  ;;  %v8121_v51 = vmov %v2639_v13  ;;  %v2646_v36 = vmul.f32 (%p7084_p11), 0.05, %v2639_v13 }
 0x46e   : >> { %v3119_v63 = vsel %vm2619_vm2, 1.0, %v7920_v11   ;;  %v8122_v44 = vmov %v7071_v30 }
 0x46f   : >> { %v2640_v15 = vadd.f32 %v3119_v63, %v1839_v38   ;;  %v2613_v6 = vadd.f32 %v2606_v55, %v2583_v40   ;;  %v8126_v55 = vmov %v3119_v63  ;;  %v8131_v40 = vmov %v6979_v41  ;;  %551 = sbr.rel (!%p7084_p11) target bundleno = 227 (0xe3), region = 100  ;;  %2653 = vst [vmem:[%s5692_s30 + $0x20] sm:$0xff] (%p7084_p11), %v2646_v36 }
 0x470   : >> { %v8132_v63 = vmov %v8090_v26  ;;  %v2645_v26 = vmul.f32 (%p7084_p11), 0.05, %v7071_v30 }
 0x471   : >> { %vm2620_vm3 = vcmp.gt.f32.partialorder %v2613_v6, 0.5  ;;  %v8120_v60 = vmov %v2640_v15  ;;  %v2647_v17 = vmul.f32 (%p7084_p11), 0.05, %v2640_v15 }
 0x472   : >> { %v3120_v2 = vsel %vm2620_vm3, 1.0, %v7920_v11   ;;  %v2642_v11 = vmul.f32 (%p7084_p11), 0.05, %v8109_v14  ;;  %2652 = vst [vmem:[%s5692_s30 + $0x18] sm:$0xff] (%p7084_p11), %v2645_v26 }
 0x473   : >> { %v2641_v18 = vadd.f32 %v3120_v2, %v1840_v7   ;;  %v8130_v7 = vmov %v2611_v12  ;;  %v2643_v12 = vmul.f32 (%p7084_p11), 0.05, %v8111_v16  ;;  %2654 = vst [vmem:[%s5692_s30 + $0x28] sm:$0xff] (%p7084_p11), %v2647_v17 }
 0x474   : > { %2649 = vst [vmem:[%s5692_s30] sm:$0xff] (%p7084_p11), %v2642_v11 }
 0x475   : >> { %v8119_v38 = vmov %v2641_v18  ;;  %2650 = vst [vmem:[%s5692_s30 + $0x8] sm:$0xff] (%p7084_p11), %v2643_v12  ;;  %v2648_v22 = vmul.f32 (%p7084_p11), 0.05, %v2641_v18 }
 0x477   : > { %2655 = vst [vmem:[%s5692_s30 + $0x30] sm:$0xff] %v2648_v22  ;;  %s4497_s30 = scalar_lea.vmem %s4496_s7, 1792 }
 0x478   : > { %p4499_p12 = scmp.lt.s32.totalorder %s4497_s30, %s4491_s17 }
 0x47a   : > { %p4500_p2 = por %p4499_p12, %p4498_p7 }
 0x47c   : > { %p4501_p13 = pnand %p4500_p2, %p4494_p5 }
 0x47e   : > { %4504 = shalt.err (!%p4501_p13)
}
 0x47f   : > { %s4505_s15 = scalar_lea.hbm %s7203_s12, 896  ;;  %s4509_s24 = scalar_lea.hbm %s7254_s5, 1792 }
 0x480   : > { %p4506_p6 = scmp.ne.s32.totalorder %s7203_s12, %s4505_s15  ;;  %p4510_p9 = scmp.lt.u32.totalorder %s7203_s12, %s7254_s5 }
 0x481   : > { %p4511_p8 = scmp.lt.u32.totalorder %s4509_s24, %s4505_s15  ;;  %p4513_p0 = scmp.lt.u32.totalorder %s4505_s15, %s7203_s12 }
 0x482   : > { %p4507_p10 = pnand %p4506_p6, %p8136_p1 }
 0x483   : > { %p4512_p11 = por %p4511_p8, %p4510_p9 }
 0x484   : > { %p4508_p4 = pneg %p4507_p10 }
 0x485   : > { %p4514_p3 = por %p4513_p0, %p4512_p11 }
 0x487   : > { %p4515_p5 = pnand %p4514_p3, %p4508_p4 }
 0x489   : > { %4518 = shalt.err (!%p4515_p5)
}
 0x48a   : > { %s4863_s28 = smov 128   ;;  %s4864_s16 = smov 8  }
 0x48b   : > { %4049 = dma.vmem_to_hbm [thread:$0]  (%p8136_p1), %s7205_s6, 896, %s7203_s12, %s2657_s13, %s4863_s28, %s4863_s28, %s4864_s16  }
 0x48c PF: > { %s2685_s10 = sand.u32 1, %s4693_s18   ;;  %p8137_p7 = scmp.ne.s32.totalorder %s7389_s25, 0 }
 0x48d   : > { %p8138_p12 = scmp.ge.s32.totalorder %s4705_s21, 2  ;;  %s2686_s17 = scalar_lea.sflag [#allocation4], %s2685_s10 }
 0x48f   : > { %p4063_p2 = pnand %p8138_p12, %p8137_p7 }
 0x491   : > { %4688 = dma.done.wait (!%p4063_p2), %s2686_s17, 896  }
 0x492   : > { %4690 = vsyncadd (!%p4063_p2), %s2686_s17, 4294966400  ;;  %p19_p13 = scmp.ge.s32.totalorder %s5005_s14, 4   ;;  %s8139_s18 = smov %s4697_s19 }
 0x493   : > { %s8140_s19 = smov %s4701_s20  ;;  %s8141_s20 = smov %s5015_s23 }
 0x494   : > { %s8142_s21 = smov %s5005_s14  ;;  %21 = sbr.rel (!%p19_p13) target bundleno = 6 (0x6), region = 111 }
 0x49b   :  { %2691 = vsyncpa [#allocation3], 1 }
 0x49c   :  { %2693 = vsyncpa [#allocation3 + $0x1], 1 }
 0x49d   :  { %2694 = vsyncpa [#allocation6], 1 }
 0x49e   :  { %2695 = vsyncpa [#allocation4], 1 }
 0x49f   :  { %2697 = vsyncpa [#allocation4 + $0x1], 1 }

</bundles_post_ra>
